<compile_context>
chip_gen: v5e
topology: v5e:2x2
jax: 0.10.0
libtpu: 0.0.40
codegen_flags: <defaults>
</compile_context>

<pallas_src>
import jax
import jax.numpy as jnp
from jax.experimental import pallas as pl
from jax.experimental.pallas import tpu as pltpu

# Logical dims (PyTorch module) and lane-padded dims (multiples of 128) for hidden/out.
D_IN, H1, H2, D_OUT = 784, 800, 500, 10
H1_P, H2_P, D_OUT_P = 896, 512, 128


def _round_up(n, m):
    return -(-n // m) * m


def _choose_tm(batch):
    """Batch tile: multiple of 16 (bf16 sublane packing), capped at 1024 rows,
    and sized to ~half the batch so the grid has >= 2 steps (v7x megacore)."""
    b16 = _round_up(max(batch, 1), 16)
    tm = _round_up(-(-b16 // 2), 16)
    return int(min(max(tm, 16), 1024))


def fc_nn_kernel(x_ref, w1_ref, b1_ref, w2_ref, b2_ref, w3_ref, b3_ref, o_ref):
    # fc1 + ReLU: cast f32 x tile to bf16 in VMEM (no extra HBM pass), f32 accumulation.
    x = x_ref[...].astype(jnp.bfloat16)                      # (TM, 784)
    h1 = jnp.dot(x, w1_ref[...], preferred_element_type=jnp.float32)
    h1 = jnp.maximum(h1 + b1_ref[...], 0.0).astype(jnp.bfloat16)
    # fc2 + ReLU
    h2 = jnp.dot(h1, w2_ref[...], preferred_element_type=jnp.float32)
    h2 = jnp.maximum(h2 + b2_ref[...], 0.0).astype(jnp.bfloat16)
    # fc3 + sigmoid (lane-dense 128-wide output; extra lanes sliced off by the wrapper).
    logits = jnp.dot(h2, w3_ref[...], preferred_element_type=jnp.float32) + b3_ref[...]
    o_ref[...] = jax.nn.sigmoid(logits)


def prepare_params(params):
    """One-time preprocessing: transpose to (in, out), cast weights to bf16,
    zero-pad hidden/output dims to lane multiples. Do this once, outside the hot loop."""
    w1, b1, w2, b2, w3, b3 = params

    def pad_wt(w, in_p, out_p):
        wt = w.T.astype(jnp.bfloat16)  # (in, out)
        return jnp.pad(wt, ((0, in_p - wt.shape[0]), (0, out_p - wt.shape[1])))

    def pad_b(b, out_p):
        return jnp.pad(b.astype(jnp.float32), (0, out_p - b.shape[0])).reshape(1, out_p)

    return (
        pad_wt(w1, D_IN, H1_P), pad_b(b1, H1_P),     # K = 784: no input-dim padding
        pad_wt(w2, H1_P, H2_P), pad_b(b2, H2_P),
        pad_wt(w3, H2_P, D_OUT_P), pad_b(b3, D_OUT_P),
    )


def fc_nn_forward(x_nchw, prepared_params):
    """x_nchw: (B, C, H, W) float32 with C*H*W == 784. Returns (B, 10) float32."""
    B = x_nchw.shape[0]
    feat = x_nchw.shape[1] * x_nchw.shape[2] * x_nchw.shape[3]
    assert feat == D_IN, f"expected C*H*W == {D_IN}, got {feat}"
    x2d = x_nchw.reshape(B, feat)  # matches torch .view(-1, C*H*W); no pad/cast pass

    TM = _choose_tm(B)
    grid = (pl.cdiv(B, TM),)

    w1t, b1r, w2t, b2r, w3t, b3r = prepared_params

    # Weights/biases: constant index maps -> VMEM-resident across all batch tiles.
    # NOTE: pipeline_mode=pl.Buffered(1) would drop their dead double-buffers (~2.5 MiB),
    # but the footprint is nowhere near the limit, so we keep the default for robustness.
    const = lambda i: (0, 0)
    out = pl.pallas_call(
        fc_nn_kernel,
        out_shape=jax.ShapeDtypeStruct((B, D_OUT_P), jnp.float32),
        grid=grid,
        in_specs=[
            pl.BlockSpec((TM, D_IN), lambda i: (i, 0)),     # x: batch-tiled, f32, K=784
            pl.BlockSpec((D_IN, H1_P), const),              # w1 (resident, bf16)
            pl.BlockSpec((1, H1_P), const),                 # b1 (f32)
            pl.BlockSpec((H1_P, H2_P), const),              # w2
            pl.BlockSpec((1, H2_P), const),                 # b2
            pl.BlockSpec((H2_P, D_OUT_P), const),           # w3
            pl.BlockSpec((1, D_OUT_P), const),              # b3
        ],
        out_specs=pl.BlockSpec((TM, D_OUT_P), lambda i: (i, 0)),
        compiler_params=pltpu.CompilerParams(
            dimension_semantics=("parallel",),   # megacore batch sharding on v7x
            vmem_limit_bytes=40 << 20,           # ~20-23 MiB footprint at TM=1024
        ),
    )(x2d, w1t, b1r, w2t, b2r, w3t, b3r)
    return out[:, :D_OUT]


def init_params(key):
    """Deterministic init mimicking nn.Linear default: U(-1/sqrt(fan_in), 1/sqrt(fan_in))."""
    dims = [(H1, D_IN), (H2, H1), (D_OUT, H2)]  # (out, in), PyTorch convention
    params = []
    for (out_f, in_f) in dims:
        key, kw, kb = jax.random.split(key, 3)
        bound = 1.0 / (in_f ** 0.5)
        w = jax.random.uniform(kw, (out_f, in_f), jnp.float32, -bound, bound)
        b = jax.random.uniform(kb, (out_f,), jnp.float32, -bound, bound)
        params.extend([w, b])
    return tuple(params)


if __name__ == "__main__":
    key = jax.random.PRNGKey(0)
    kx, kp = jax.random.split(key)

    # Small batch, MNIST-like spatial layout: (B=2, C=1, H=28, W=28) -> 784 features.
    x = jax.random.normal(kx, (2, 1, 28, 28), jnp.float32)
    params = init_params(kp)
    prepared = prepare_params(params)  # one-time: transpose + bf16 cast + lane padding

    out = fc_nn_forward(x, prepared)
    out = jax.block_until_ready(out)

    # Reference check in plain JAX (f32). bf16 MXU inputs -> relaxed tolerance.
    w1, b1, w2, b2, w3, b3 = params
    xf = x.reshape(x.shape[0], -1)
    h = jnp.maximum(xf @ w1.T + b1, 0.0)
    h = jnp.maximum(h @ w2.T + b2, 0.0)
    ref = jax.nn.sigmoid(h @ w3.T + b3)
    assert out.shape == (2, 10)
    assert jnp.allclose(out, ref, atol=3e-2, rtol=0.0), "mismatch vs JAX reference"

    print("KERNEL_OK")
</pallas_src>

<mosaic_0001>
module attributes {stable_mosaic.version = 11 : i64} {
  func.func @fc_nn_kernel(%arg0: i32, %arg1: memref<16x784xf32, #tpu.memory_space<vmem>>, %arg2: memref<784x896xbf16, #tpu.memory_space<vmem>>, %arg3: memref<1x896xf32, #tpu.memory_space<vmem>>, %arg4: memref<896x512xbf16, #tpu.memory_space<vmem>>, %arg5: memref<1x512xf32, #tpu.memory_space<vmem>>, %arg6: memref<512x128xbf16, #tpu.memory_space<vmem>>, %arg7: memref<1x128xf32, #tpu.memory_space<vmem>>, %arg8: memref<16x128xf32, #tpu.memory_space<vmem>>) attributes {dimension_semantics = [#tpu.dimension_semantics<parallel>], iteration_bounds = array<i64: 1>, scalar_prefetch = 0 : i64, scratch_operands = 0 : i64, tpu.core_type = #tpu.core_type<tc>, window_params = [{transform_indices = @transform_0, window_bounds = array<i64: 16, 784>}, {pipeline_mode = #tpu.pipeline_mode<synchronous>, transform_indices = @transform_1, window_bounds = array<i64: 784, 896>}, {pipeline_mode = #tpu.pipeline_mode<synchronous>, transform_indices = @transform_2, window_bounds = array<i64: 1, 896>}, {pipeline_mode = #tpu.pipeline_mode<synchronous>, transform_indices = @transform_3, window_bounds = array<i64: 896, 512>}, {pipeline_mode = #tpu.pipeline_mode<synchronous>, transform_indices = @transform_4, window_bounds = array<i64: 1, 512>}, {pipeline_mode = #tpu.pipeline_mode<synchronous>, transform_indices = @transform_5, window_bounds = array<i64: 512, 128>}, {pipeline_mode = #tpu.pipeline_mode<synchronous>, transform_indices = @transform_6, window_bounds = array<i64: 1, 128>}, {transform_indices = @transform_7, window_bounds = array<i64: 16, 128>}]} {
    %c0 = arith.constant 0 : index
    %c0_0 = arith.constant 0 : index
    %0 = vector.load %arg1[%c0, %c0_0] : memref<16x784xf32, #tpu.memory_space<vmem>>, vector<16x784xf32>
    %1 = arith.truncf %0 : vector<16x784xf32> to vector<16x784xbf16>
    %c0_1 = arith.constant 0 : index
    %c0_2 = arith.constant 0 : index
    %2 = vector.load %arg2[%c0_1, %c0_2] : memref<784x896xbf16, #tpu.memory_space<vmem>>, vector<784x896xbf16>
    %cst = arith.constant dense<0.000000e+00> : vector<16x896xf32>
    %3 = tpu.matmul %1, %2, %cst {dimension_numbers = #tpu.dot_dimension_numbers<[1], [0], [0], [1], [0, 0, 1, 1], [], []>} : vector<16x784xbf16>, vector<784x896xbf16>, vector<16x896xf32> -> vector<16x896xf32>
    %c0_3 = arith.constant 0 : index
    %c0_4 = arith.constant 0 : index
    %4 = vector.load %arg3[%c0_3, %c0_4] : memref<1x896xf32, #tpu.memory_space<vmem>>, vector<1x896xf32>
    %5 = vector.broadcast %4 : vector<1x896xf32> to vector<16x896xf32>
    %6 = arith.addf %3, %5 : vector<16x896xf32>
    %cst_5 = arith.constant 0.000000e+00 : f32
    %7 = vector.broadcast %cst_5 : f32 to vector<16x896xf32>
    %8 = arith.maximumf %6, %7 : vector<16x896xf32>
    %9 = arith.truncf %8 : vector<16x896xf32> to vector<16x896xbf16>
    %c0_6 = arith.constant 0 : index
    %c0_7 = arith.constant 0 : index
    %10 = vector.load %arg4[%c0_6, %c0_7] : memref<896x512xbf16, #tpu.memory_space<vmem>>, vector<896x512xbf16>
    %cst_8 = arith.constant dense<0.000000e+00> : vector<16x512xf32>
    %11 = tpu.matmul %9, %10, %cst_8 {dimension_numbers = #tpu.dot_dimension_numbers<[1], [0], [0], [1], [0, 0, 1, 1], [], []>} : vector<16x896xbf16>, vector<896x512xbf16>, vector<16x512xf32> -> vector<16x512xf32>
    %c0_9 = arith.constant 0 : index
    %c0_10 = arith.constant 0 : index
    %12 = vector.load %arg5[%c0_9, %c0_10] : memref<1x512xf32, #tpu.memory_space<vmem>>, vector<1x512xf32>
    %13 = vector.broadcast %12 : vector<1x512xf32> to vector<16x512xf32>
    %14 = arith.addf %11, %13 : vector<16x512xf32>
    %cst_11 = arith.constant 0.000000e+00 : f32
    %15 = vector.broadcast %cst_11 : f32 to vector<16x512xf32>
    %16 = arith.maximumf %14, %15 : vector<16x512xf32>
    %17 = arith.truncf %16 : vector<16x512xf32> to vector<16x512xbf16>
    %c0_12 = arith.constant 0 : index
    %c0_13 = arith.constant 0 : index
    %18 = vector.load %arg6[%c0_12, %c0_13] : memref<512x128xbf16, #tpu.memory_space<vmem>>, vector<512x128xbf16>
    %cst_14 = arith.constant dense<0.000000e+00> : vector<16x128xf32>
    %19 = tpu.matmul %17, %18, %cst_14 {dimension_numbers = #tpu.dot_dimension_numbers<[1], [0], [0], [1], [0, 0, 1, 1], [], []>} : vector<16x512xbf16>, vector<512x128xbf16>, vector<16x128xf32> -> vector<16x128xf32>
    %c0_15 = arith.constant 0 : index
    %c0_16 = arith.constant 0 : index
    %20 = vector.load %arg7[%c0_15, %c0_16] : memref<1x128xf32, #tpu.memory_space<vmem>>, vector<1x128xf32>
    %21 = vector.broadcast %20 : vector<1x128xf32> to vector<16x128xf32>
    %22 = arith.addf %19, %21 : vector<16x128xf32>
    %23 = arith.negf %22 : vector<16x128xf32>
    %24 = math.exp %23 : vector<16x128xf32>
    %cst_17 = arith.constant 1.000000e+00 : f32
    %25 = vector.broadcast %cst_17 : f32 to vector<16x128xf32>
    %26 = arith.addf %25, %24 : vector<16x128xf32>
    %27 = arith.divf %25, %26 : vector<16x128xf32>
    %c0_18 = arith.constant 0 : index
    %c0_19 = arith.constant 0 : index
    %28 = vector.load %arg8[%c0_18, %c0_19] : memref<16x128xf32, #tpu.memory_space<vmem>>, vector<16x128xf32>
    tpu.vector_store %arg8[%c0_18, %c0_19], %27 {strides = array<i32>} : memref<16x128xf32, #tpu.memory_space<vmem>>, vector<16x128xf32>,
    return
  }
  func.func @transform_0(%arg0: i32) -> (i32, i32) {
    %c0_i32 = arith.constant 0 : i32
    %c0_i32_0 = arith.constant 0 : i32
    return %arg0, %c0_i32 : i32, i32
  }
  func.func @transform_1(%arg0: i32) -> (i32, i32) {
    %c0_i32 = arith.constant 0 : i32
    %c0_i32_0 = arith.constant 0 : i32
    %c0_i32_1 = arith.constant 0 : i32
    return %c0_i32, %c0_i32_0 : i32, i32
  }
  func.func @transform_2(%arg0: i32) -> (i32, i32) {
    %c0_i32 = arith.constant 0 : i32
    %c0_i32_0 = arith.constant 0 : i32
    %c0_i32_1 = arith.constant 0 : i32
    return %c0_i32, %c0_i32_0 : i32, i32
  }
  func.func @transform_3(%arg0: i32) -> (i32, i32) {
    %c0_i32 = arith.constant 0 : i32
    %c0_i32_0 = arith.constant 0 : i32
    %c0_i32_1 = arith.constant 0 : i32
    return %c0_i32, %c0_i32_0 : i32, i32
  }
  func.func @transform_4(%arg0: i32) -> (i32, i32) {
    %c0_i32 = arith.constant 0 : i32
    %c0_i32_0 = arith.constant 0 : i32
    %c0_i32_1 = arith.constant 0 : i32
    return %c0_i32, %c0_i32_0 : i32, i32
  }
  func.func @transform_5(%arg0: i32) -> (i32, i32) {
    %c0_i32 = arith.constant 0 : i32
    %c0_i32_0 = arith.constant 0 : i32
    %c0_i32_1 = arith.constant 0 : i32
    return %c0_i32, %c0_i32_0 : i32, i32
  }
  func.func @transform_6(%arg0: i32) -> (i32, i32) {
    %c0_i32 = arith.constant 0 : i32
    %c0_i32_0 = arith.constant 0 : i32
    %c0_i32_1 = arith.constant 0 : i32
    return %c0_i32, %c0_i32_0 : i32, i32
  }
  func.func @transform_7(%arg0: i32) -> (i32, i32) {
    %c0_i32 = arith.constant 0 : i32
    %c0_i32_0 = arith.constant 0 : i32
    return %arg0, %c0_i32 : i32, i32
  }
}

</mosaic_0001>

<bundles_post_ra>
// kernel: tpu_custom_call.1
= control target key start
LH: loop header
LB: loop body
LE: loop exit
PB: predicated region body
PF: predicated region fallthrough
CT: control target
= control target key end

     0   :  { %12 = vsyncpa [#allocation3], 0  ;;  %s8836_s0 = inlined_call_operand.hbm [shape: f32[2,784], index: 0, kind: input, shape index: {}]   ;;  %s8837_s1 = inlined_call_operand.hbm [shape: bf16[784,896], index: 1, kind: input, shape index: {}]   ;;  %s8838_s2 = inlined_call_operand.hbm [shape: f32[1,896], index: 2, kind: input, shape index: {}]   ;;  %s8839_s3 = inlined_call_operand.hbm [shape: bf16[896,512], index: 3, kind: input, shape index: {}]   ;;  %s8840_s4 = inlined_call_operand.hbm [shape: f32[1,512], index: 4, kind: input, shape index: {}]   ;;  %s8841_s5 = inlined_call_operand.hbm [shape: bf16[512,128], index: 5, kind: input, shape index: {}]   ;;  %s8842_s6 = inlined_call_operand.hbm [shape: f32[1,128], index: 6, kind: input, shape index: {}]   ;;  %s8843_s7 = inlined_call_operand.hbm [shape: f32[2,128], index: 7, kind: output, shape index: {}]  }
   0x1   :  { %13 = vsyncpa [#allocation6], 0 }
   0x2   :  { %14 = vsyncpa [#allocation9], 0 }
   0x3   :  { %15 = vsyncpa [#allocation12], 0 }
   0x4   :  { %16 = vsyncpa [#allocation4], 0  ;;  %s34_s26 = sshll.u32 %s8837_s1, 4  ;;  %s35_s26 = int_to_ptr.hbm [resolvable:$true] %s34_s26 }
   0x5   :  { %20 = vsyncadd [#allocation3], 1568  ;;  %s8475_s27 = smov [#allocation5]   ;;  %s58_s8 = sshll.u32 %s8839_s3, 4  ;;  %s59_s8 = int_to_ptr.hbm [resolvable:$true] %s58_s8 }
   0x6   :  { %s36_s28 = sshll.u32 %s8475_s27, 4  ;;  %s8476_s9 = smov 448   ;;  %s37_s28 = int_to_ptr.vmem [resolvable:$true] %s36_s28 }
   0x7   :  { %s8477_s10 = smov 28   ;;  %s8478_s11 = smov [#allocation8]  }
   0x8   :  { %42 = dma.hbm_to_vmem [thread:$0]  %s35_s26, 43904, %s37_s28, [#allocation6], %s8476_s9, %s8476_s9, %s8477_s10  }
   0x9   :  { %s60_s12 = sshll.u32 %s8478_s11, 4  ;;  %s8479_s13 = smov 256   ;;  %s61_s12 = int_to_ptr.vmem [resolvable:$true] %s60_s12 }
   0xa   :  { %s8480_s14 = smov 16   ;;  %s82_s16 = sshll.u32 %s8841_s5, 4  ;;  %s83_s16 = int_to_ptr.hbm [resolvable:$true] %s82_s16 }
   0xb   :  { %66 = dma.hbm_to_vmem [thread:$0]  %s59_s8, 28672, %s61_s12, [#allocation9], %s8479_s13, %s8479_s13, %s8480_s14  }
   0xc   :  { %s8481_s17 = smov [#allocation11]   ;;  %s21_s20 = sshll.u32 %s8836_s0, 4  ;;  %s22_s20 = int_to_ptr.hbm [resolvable:$true] %s21_s20 }
   0xd   :  { %s84_s18 = sshll.u32 %s8481_s17, 4  ;;  %s8482_s21 = smov 64   ;;  %s85_s18 = int_to_ptr.vmem [resolvable:$true] %s84_s18 }
   0xe   :  { %s8483_s22 = smov 4   ;;  %s8484_s23 = smov [#allocation2]  }
   0xf   :  { %90 = dma.hbm_to_vmem [thread:$0]  %s83_s16, 4096, %s85_s18, [#allocation12], %s8482_s21, %s8482_s21, %s8483_s22  }
  0x10   :  { %s23_s24 = sshll.u32 %s8484_s23, 4  ;;  %s8485_s25 = smov 224   ;;  %s24_s24 = int_to_ptr.vmem [resolvable:$true] %s23_s24 }
  0x11   :  { %s8486_s26 = smov 14   ;;  %s48_s28 = sshll.u32 %s8838_s2, 4  ;;  %s49_s28 = int_to_ptr.hbm [resolvable:$true] %s48_s28 }
  0x12   :  { %29 = dma.hbm_to_vmem [thread:$0]  %s22_s20, 224, %s24_s24, [#allocation3], %s8485_s25, %s8485_s25, %s8486_s26  }
  0x13   :  { %s8487_s29 = smov [#allocation7]   ;;  %s72_s9 = sshll.u32 %s8840_s4, 4  ;;  %s73_s9 = int_to_ptr.hbm [resolvable:$true] %s72_s9 }
  0x14   :  { %s50_s30 = sshll.u32 %s8487_s29, 4  ;;  %s8488_s10 = smov [#allocation10]   ;;  %s51_s30 = int_to_ptr.vmem [resolvable:$true] %s50_s30 }
  0x15   :  { %53 = dma.hbm_to_vmem [thread:$0]  %s49_s28, 112, %s51_s30, [#allocation6]  }
  0x16   :  { %s74_s11 = sshll.u32 %s8488_s10, 4  ;;  %s96_s14 = sshll.u32 %s8842_s6, 4  ;;  %s75_s11 = int_to_ptr.vmem [resolvable:$true] %s74_s11  ;;  %s97_s14 = int_to_ptr.hbm [resolvable:$true] %s96_s14 }
  0x17   :  { %77 = dma.hbm_to_vmem [thread:$0]  %s73_s9, 64, %s75_s11, [#allocation9]  }
  0x18   :  { %s8489_s2 = smov [#allocation13]  }
  0x19   :  { %s98_s1 = sshll.u32 %s8489_s2, 4  ;;  %s99_s1 = int_to_ptr.vmem [resolvable:$true] %s98_s1 }
  0x1a   :  { %101 = dma.hbm_to_vmem [thread:$0]  %s97_s14, 16, %s99_s1, [#allocation12]  }
  0x1b   :  { %8465 = dma.done.wait [#allocation3], 1792  }
  0x1c   :  { %8466 = vsyncadd [#allocation3], 4294965504 }
  0x1d   :  { %8467 = dma.done.wait [#allocation6], 44016  }
  0x1e   :  { %8468 = vsyncadd [#allocation6], 4294923280 }
  0x1f   :  { %8469 = dma.done.wait [#allocation9], 28736  }
  0x20   :  { %8470 = vsyncadd [#allocation9], 4294938560 }
  0x21   :  { %8471 = dma.done.wait [#allocation12], 4112  }
  0x22   :  { %8472 = vsyncadd [#allocation12], 4294963184  ;;  %v5438_v0 = vld [vmem:[#allocation5 + $0x188] sm:$0xf]  ;;  %v7697_v1 = vld [vmem:[#allocation5 + $0x1a0] sm:$0xf0] }
  0x23   :  { %v5662_v2 = vld [vmem:[#allocation5 + $0x348] sm:$0xf]  ;;  %v5439_v3 = vor.u32 %v7697_v1, %v5438_v0  ;;  %v7753_v4 = vld [vmem:[#allocation5 + $0x360] sm:$0xf0]  ;;  %v5410_v11 = vld [vmem:[#allocation5 + $0x150] sm:$0xf] }
  0x24   :  { %v5886_v5 = vld [vmem:[#allocation5 + $0x508] sm:$0xf]  ;;  %v7809_v6 = vld [vmem:[#allocation5 + $0x520] sm:$0xf0]  ;;  %v5663_v7 = vor.u32 %v7753_v4, %v5662_v2  ;;  %v7690_v13 = vld [vmem:[#allocation5 + $0x168] sm:$0xf0] }
  0x25   :  { %v5887_v8 = vor.u32 %v7809_v6, %v5886_v5  ;;  %v6110_v9 = vld [vmem:[#allocation5 + $0x6c8] sm:$0xf]  ;;  %v7865_v10 = vld [vmem:[#allocation5 + $0x6e0] sm:$0xf0]  ;;  %2397 = vmatpush.bf16.msra.mxu0 %v5439_v3  ;;  %v5634_v14 = vld [vmem:[#allocation5 + $0x310] sm:$0xf]  ;;  %v5411_v16 = vor.u32 %v7690_v13, %v5410_v11 }
  0x26   :  { %v6111_v12 = vor.u32 %v7865_v10, %v6110_v9  ;;  %v7746_v15 = vld [vmem:[#allocation5 + $0x328] sm:$0xf0]  ;;  %2411 = vmatpush.bf16.msra.mxu1 %v5663_v7  ;;  %v5858_v18 = vld [vmem:[#allocation5 + $0x4d0] sm:$0xf]  ;;  %v5382_v23 = vld [vmem:[#allocation5 + $0x118] sm:$0xf] }
  0x27   :  { %2425 = vmatpush.bf16.msra.mxu2 %v5887_v8  ;;  %v5635_v17 = vor.u32 %v7746_v15, %v5634_v14  ;;  %v7802_v19 = vld [vmem:[#allocation5 + $0x4e8] sm:$0xf0]  ;;  %v6082_v20 = vld [vmem:[#allocation5 + $0x690] sm:$0xf]  ;;  %v7683_v24 = vld [vmem:[#allocation5 + $0x130] sm:$0xf0] }
  0x28   :  { %2439 = vmatpush.bf16.msra.mxu3 %v6111_v12  ;;  %v5859_v21 = vor.u32 %v7802_v19, %v5858_v18  ;;  %v7858_v22 = vld [vmem:[#allocation5 + $0x6a8] sm:$0xf0]  ;;  %v5606_v26 = vld [vmem:[#allocation5 + $0x2d8] sm:$0xf]  ;;  %v7739_v27 = vld [vmem:[#allocation5 + $0x2f0] sm:$0xf0]  ;;  %v5383_v29 = vor.u32 %v7683_v24, %v5382_v23 }
  0x29   :  { %v6083_v25 = vor.u32 %v7858_v22, %v6082_v20  ;;  %v5830_v28 = vld [vmem:[#allocation5 + $0x498] sm:$0xf]  ;;  %2398 = vmatpush.bf16.msra.mxu0 %v5411_v16  ;;  %v7795_v30 = vld [vmem:[#allocation5 + $0x4b0] sm:$0xf0]  ;;  %v5607_v33 = vor.u32 %v7739_v27, %v5606_v26  ;;  %v5354_v35 = vld [vmem:[#allocation5 + $0xe0] sm:$0xf] }
  0x2a   :  { %v6054_v31 = vld [vmem:[#allocation5 + $0x658] sm:$0xf]  ;;  %v7851_v32 = vld [vmem:[#allocation5 + $0x670] sm:$0xf0]  ;;  %2412 = vmatpush.bf16.msra.mxu1 %v5635_v17  ;;  %v5831_v34 = vor.u32 %v7795_v30, %v5830_v28  ;;  %v7676_v36 = vld [vmem:[#allocation5 + $0xf8] sm:$0xf0] }
  0x2b   :  { %2426 = vmatpush.bf16.msra.mxu2 %v5859_v21  ;;  %v5578_v37 = vld [vmem:[#allocation5 + $0x2a0] sm:$0xf]  ;;  %v6055_v38 = vor.u32 %v7851_v32, %v6054_v31  ;;  %v7732_v39 = vld [vmem:[#allocation5 + $0x2b8] sm:$0xf0]  ;;  %v5355_v44 = vor.u32 %v7676_v36, %v5354_v35  ;;  %v5326_v47 = vld [vmem:[#allocation5 + $0xa8] sm:$0xf] }
  0x2c   :  { %2440 = vmatpush.bf16.msra.mxu3 %v6083_v25  ;;  %v5802_v40 = vld [vmem:[#allocation5 + $0x460] sm:$0xf]  ;;  %v7788_v41 = vld [vmem:[#allocation5 + $0x478] sm:$0xf0]  ;;  %v5579_v45 = vor.u32 %v7732_v39, %v5578_v37  ;;  %v7669_v48 = vld [vmem:[#allocation5 + $0xc0] sm:$0xf0] }
  0x2d   :  { %v6026_v42 = vld [vmem:[#allocation5 + $0x620] sm:$0xf]  ;;  %v7844_v43 = vld [vmem:[#allocation5 + $0x638] sm:$0xf0]  ;;  %2399 = vmatpush.bf16.msra.mxu0 %v5383_v29  ;;  %v5803_v46 = vor.u32 %v7788_v41, %v5802_v40  ;;  %v5550_v49 = vld [vmem:[#allocation5 + $0x268] sm:$0xf]  ;;  %v5327_v56 = vor.u32 %v7669_v48, %v5326_v47 }
  0x2e   :  { %2413 = vmatpush.bf16.msra.mxu1 %v5607_v33  ;;  %v6027_v50 = vor.u32 %v7844_v43, %v6026_v42  ;;  %v7725_v51 = vld [vmem:[#allocation5 + $0x280] sm:$0xf0]  ;;  %v5774_v52 = vld [vmem:[#allocation5 + $0x428] sm:$0xf]  ;;  %v5298_v59 = vld [vmem:[#allocation5 + $0x70] sm:$0xf] }
  0x2f   :  { %2427 = vmatpush.bf16.msra.mxu2 %v5831_v34  ;;  %v7781_v53 = vld [vmem:[#allocation5 + $0x440] sm:$0xf0]  ;;  %v5998_v54 = vld [vmem:[#allocation5 + $0x5e8] sm:$0xf]  ;;  %v5551_v57 = vor.u32 %v7725_v51, %v5550_v49  ;;  %v7662_v60 = vld [vmem:[#allocation5 + $0x88] sm:$0xf0] }
  0x30   :  { %2441 = vmatpush.bf16.msra.mxu3 %v6055_v38  ;;  %v7837_v55 = vld [vmem:[#allocation5 + $0x600] sm:$0xf0]  ;;  %v5775_v58 = vor.u32 %v7781_v53, %v5774_v52  ;;  %v5522_v61 = vld [vmem:[#allocation5 + $0x230] sm:$0xf]  ;;  %v7718_v63 = vld [vmem:[#allocation5 + $0x248] sm:$0xf0]  ;;  %v5299_v4 = vor.u32 %v7662_v60, %v5298_v59 }
  0x31   :  { %2400 = vmatpush.bf16.msra.mxu0 %v5355_v44  ;;  %v5999_v62 = vor.u32 %v7837_v55, %v5998_v54  ;;  %v5746_v0 = vld [vmem:[#allocation5 + $0x3f0] sm:$0xf]  ;;  %v7774_v1 = vld [vmem:[#allocation5 + $0x408] sm:$0xf0]  ;;  %v5270_v5 = vld [vmem:[#allocation5 + $0x38] sm:$0xf]  ;;  %v5523_v6 = vor.u32 %v7718_v63, %v5522_v61 }
  0x32   :  { %2414 = vmatpush.bf16.msra.mxu1 %v5579_v45  ;;  %v5970_v2 = vld [vmem:[#allocation5 + $0x5b0] sm:$0xf]  ;;  %v7830_v3 = vld [vmem:[#allocation5 + $0x5c8] sm:$0xf0]  ;;  %v5747_v7 = vor.u32 %v7774_v1, %v5746_v0  ;;  %v7655_v8 = vld [vmem:[#allocation5 + $0x50] sm:$0xf0] }
  0x33   :  { %2428 = vmatpush.bf16.msra.mxu2 %v5803_v46  ;;  %v5494_v9 = vld [vmem:[#allocation5 + $0x1f8] sm:$0xf]  ;;  %v7711_v10 = vld [vmem:[#allocation5 + $0x210] sm:$0xf0]  ;;  %v5971_v11 = vor.u32 %v7830_v3, %v5970_v2  ;;  %v5242_v16 = vld [vmem:[#allocation5] sm:$0xf]  ;;  %v5271_v18 = vor.u32 %v7655_v8, %v5270_v5 }
  0x34   :  { %2442 = vmatpush.bf16.msra.mxu3 %v6027_v50  ;;  %v5718_v12 = vld [vmem:[#allocation5 + $0x3b8] sm:$0xf]  ;;  %v7767_v13 = vld [vmem:[#allocation5 + $0x3d0] sm:$0xf0]  ;;  %v7648_v17 = vld [vmem:[#allocation5 + $0x18] sm:$0xf0]  ;;  %v5495_v23 = vor.u32 %v7711_v10, %v5494_v9 }
  0x35   :  { %2401 = vmatpush.bf16.msra.mxu0 %v5327_v56  ;;  %v5942_v14 = vld [vmem:[#allocation5 + $0x578] sm:$0xf]  ;;  %v7823_v15 = vld [vmem:[#allocation5 + $0x590] sm:$0xf0]  ;;  %v5466_v19 = vld [vmem:[#allocation5 + $0x1c0] sm:$0xf]  ;;  %v5719_v24 = vor.u32 %v7767_v13, %v5718_v12  ;;  %v5243_v36 = vor.u32 %v7648_v17, %v5242_v16 }
  0x36   :  { %2415 = vmatpush.bf16.msra.mxu1 %v5551_v57  ;;  %v7704_v20 = vld [vmem:[#allocation5 + $0x1d8] sm:$0xf0]  ;;  %v5690_v21 = vld [vmem:[#allocation5 + $0x380] sm:$0xf]  ;;  %v6334_v27 = vld [vmem:[#allocation5 + $0x888] sm:$0xf]  ;;  %v5943_v31 = vor.u32 %v7823_v15, %v5942_v14 }
  0x37   :  { %2429 = vmatpush.bf16.msra.mxu2 %v5775_v58  ;;  %v7760_v22 = vld [vmem:[#allocation5 + $0x398] sm:$0xf0]  ;;  %v5914_v25 = vld [vmem:[#allocation5 + $0x540] sm:$0xf]  ;;  %v131_v28 = vld [vmem:[#allocation2] sm:$0xff]  ;;  %v5467_v39 = vor.u32 %v7704_v20, %v5466_v19  ;;  %vm2393_vm0 = vcmask 130048  }
  0x38   :  { %2443 = vmatpush.bf16.msra.mxu3 %v5999_v62  ;;  %v7816_v26 = vld [vmem:[#allocation5 + $0x558] sm:$0xf0]  ;;  %v135_v30 = vld [vmem:[#allocation2 + $0x1c] sm:$0xff]  ;;  %v7921_v32 = vld [vmem:[#allocation5 + $0x8a0] sm:$0xf0]  ;;  %v5691_v40 = vor.u32 %v7760_v22, %v5690_v21 }
  0x39   :  { %2402 = vmatpush.bf16.msra.mxu0 %v5299_v4  ;;  %v133_v29 = vld [vmem:[#allocation2 + $0xe] sm:$0xff]  ;;  %163 = vst [vmem:[#allocation1] ss:$4 sm:$0xff] %v131_v28  ;;  %v6558_v34 = vld [vmem:[#allocation5 + $0xa48] sm:$0xf]  ;;  %v5915_v43 = vor.u32 %v7816_v26, %v5914_v25  ;;  %v6335_v44 = vor.u32 %v7921_v32, %v6334_v27  ;;  %v141_v55 = vld [vmem:[#allocation2 + $0x46] sm:$0xff] }
  0x3a   :  { %2416 = vmatpush.bf16.msra.mxu1 %v5523_v6  ;;  %v137_v33 = vld [vmem:[#allocation2 + $0x2a] sm:$0xff]  ;;  %v7977_v35 = vld [vmem:[#allocation5 + $0xa60] sm:$0xf0]  ;;  %165 = vst [vmem:[#allocation1 + $0x1] ss:$4 sm:$0xff] %v133_v29  ;;  %v139_v54 = vld [vmem:[#allocation2 + $0x38] sm:$0xff] }
  0x3b   :  { %2430 = vmatpush.bf16.msra.mxu2 %v5747_v7  ;;  %v7694_v37 = vld [vmem:[#allocation5 + $0x18c] sm:$0xf]  ;;  %v5440_v38 = vld [vmem:[#allocation5 + $0x1a4] sm:$0xf0]  ;;  %167 = vst [vmem:[#allocation1 + $0x2] ss:$4 sm:$0xff] %v135_v30  ;;  %v6559_v45 = vor.u32 %v7977_v35, %v6558_v34 }
  0x3c   :  { %2444 = vmatpush.bf16.msra.mxu3 %v5971_v11  ;;  %v6586_v41 = vld [vmem:[#allocation5 + $0xa80] sm:$0xf]  ;;  %v7984_v42 = vld [vmem:[#allocation5 + $0xa98] sm:$0xf0]  ;;  %169 = vst [vmem:[#allocation1 + $0x3] ss:$4 sm:$0xff] %v137_v33  ;;  %v5443_v46 = vor.u32 %v7694_v37, %v5440_v38 }
  0x3d   :  { %2403 = vmatpush.bf16.msra.mxu0 %v5271_v18  ;;  %v6306_v47 = vld [vmem:[#allocation5 + $0x850] sm:$0xf]  ;;  %v7914_v48 = vld [vmem:[#allocation5 + $0x868] sm:$0xf0]  ;;  %v6587_v50 = vor.u32 %v7984_v42, %v6586_v41  ;;  %v7687_v52 = vld [vmem:[#allocation5 + $0x154] sm:$0xf] }
  0x3e   :  { %2417 = vmatpush.bf16.msra.mxu1 %v5495_v23  ;;  %v6530_v49 = vld [vmem:[#allocation5 + $0xa10] sm:$0xf]  ;;  %v7970_v51 = vld [vmem:[#allocation5 + $0xa28] sm:$0xf0]  ;;  %v6307_v56 = vor.u32 %v7914_v48, %v6306_v47  ;;  %v6278_v57 = vld [vmem:[#allocation5 + $0x818] sm:$0xf] }
  0x3f   :  { %2431 = vmatpush.bf16.msra.mxu2 %v5719_v24  ;;  %v5412_v53 = vld [vmem:[#allocation5 + $0x16c] sm:$0xf0]  ;;  %v7907_v58 = vld [vmem:[#allocation5 + $0x830] sm:$0xf0]  ;;  %v6502_v59 = vld [vmem:[#allocation5 + $0x9d8] sm:$0xf]  ;;  %v6531_v61 = vor.u32 %v7970_v51, %v6530_v49 }
  0x40   :  { %2445 = vmatpush.bf16.msra.mxu3 %v5943_v31  ;;  %v143_v60 = vld [vmem:[#allocation2 + $0x54] sm:$0xff]  ;;  %v5415_v62 = vor.u32 %v7687_v52, %v5412_v53  ;;  %v7963_v63 = vld [vmem:[#allocation5 + $0x9f0] sm:$0xf0]  ;;  %v7680_v0 = vld [vmem:[#allocation5 + $0x11c] sm:$0xf]  ;;  %v6279_v7 = vor.u32 %v7907_v58, %v6278_v57 }
  0x41   :  { %2404 = vmatpush.bf16.msra.mxu0 %v5243_v36  ;;  %v5384_v1 = vld [vmem:[#allocation5 + $0x134] sm:$0xf0]  ;;  %v6250_v8 = vld [vmem:[#allocation5 + $0x7e0] sm:$0xf]  ;;  %v7900_v9 = vld [vmem:[#allocation5 + $0x7f8] sm:$0xf0]  ;;  %v6503_v10 = vor.u32 %v7963_v63, %v6502_v59 }
  0x42   :  { %2418 = vmatpush.bf16.msra.mxu1 %v5467_v39  ;;  %v145_v2 = vld [vmem:[#allocation2 + $0x62] sm:$0xff]  ;;  %v5387_v11 = vor.u32 %v7680_v0, %v5384_v1  ;;  %v6474_v12 = vld [vmem:[#allocation5 + $0x9a0] sm:$0xf]  ;;  %v7956_v13 = vld [vmem:[#allocation5 + $0x9b8] sm:$0xf0]  ;;  %v6251_v16 = vor.u32 %v7900_v9, %v6250_v8 }
  0x43   :  { %2432 = vmatpush.bf16.msra.mxu2 %v5691_v40  ;;  %v178_v3 = vld.sshfl [vmem:[#allocation1] sm:$0xff pattern:$0x73625140]  ;;  %v179_v4 = vld.sshfl [vmem:[#allocation1 + $0x8] sm:$0xff pattern:$0x73625140]  ;;  %v6475_v17 = vor.u32 %v7956_v13, %v6474_v12 }
  0x44   :  { %2446 = vmatpush.bf16.msra.mxu3 %v5915_v43  ;;  %v180_v5 = vld.sshfl [vmem:[#allocation1 + $0x10] sm:$0xff pattern:$0x73625140]  ;;  %v181_v6 = vld.sshfl [vmem:[#allocation1 + $0x18] sm:$0xff pattern:$0x73625140] }
  0x45   :  { %2453 = vmatpush.bf16.msrb.mxu0 %v6335_v44  ;;  %185 = vst [vmem:[#allocation1] ss:$4 sm:$0xff] %v139_v54  ;;  %v7673_v14 = vld [vmem:[#allocation5 + $0xe4] sm:$0xf]  ;;  %v5356_v15 = vld [vmem:[#allocation5 + $0xfc] sm:$0xf0] }
  0x46   :  { %2467 = vmatpush.bf16.msrb.mxu1 %v6559_v45  ;;  %186 = vst [vmem:[#allocation1 + $0x1] ss:$4 sm:$0xff] %v141_v55  ;;  %v5359_v18 = vor.u32 %v7673_v14, %v5356_v15  ;;  %v6222_v19 = vld [vmem:[#allocation5 + $0x7a8] sm:$0xf]  ;;  %v7893_v20 = vld [vmem:[#allocation5 + $0x7c0] sm:$0xf0] }
  0x47   :  { %2488 = vmatpush.bf16.msrb.mxu2 %v6587_v50  ;;  %187 = vst [vmem:[#allocation1 + $0x2] ss:$4 sm:$0xff] %v143_v60  ;;  %v7750_v21 = vld [vmem:[#allocation5 + $0x34c] sm:$0xf]  ;;  %v5664_v22 = vld [vmem:[#allocation5 + $0x364] sm:$0xf0]  ;;  %v6223_v25 = vor.u32 %v7893_v20, %v6222_v19 }
  0x48   :  { %2495 = vmatpush.bf16.msrb.mxu3 %v5443_v46  ;;  %188 = vst [vmem:[#allocation1 + $0x3] ss:$4 sm:$0xff] %v145_v2  ;;  %v6446_v23 = vld [vmem:[#allocation5 + $0x968] sm:$0xf]  ;;  %v7949_v24 = vld [vmem:[#allocation5 + $0x980] sm:$0xf0]  ;;  %v5667_v35 = vor.u32 %v7750_v21, %v5664_v22 }
  0x49   :  { %2454 = vmatpush.bf16.msrb.mxu0 %v6307_v56  ;;  %v7666_v26 = vld [vmem:[#allocation5 + $0xac] sm:$0xf]  ;;  %v5328_v27 = vld [vmem:[#allocation5 + $0xc4] sm:$0xf0]  ;;  %v6194_v28 = vld [vmem:[#allocation5 + $0x770] sm:$0xf]  ;;  %v6447_v37 = vor.u32 %v7949_v24, %v6446_v23 }
  0x4a   :  { %2468 = vmatpush.bf16.msrb.mxu1 %v6531_v61  ;;  %v7743_v29 = vld [vmem:[#allocation5 + $0x314] sm:$0xf]  ;;  %v5636_v30 = vld [vmem:[#allocation5 + $0x32c] sm:$0xf0]  ;;  %v7886_v31 = vld [vmem:[#allocation5 + $0x788] sm:$0xf0]  ;;  %v5331_v40 = vor.u32 %v7666_v26, %v5328_v27 }
  0x4b   :  { %v6418_v32 = vld [vmem:[#allocation5 + $0x930] sm:$0xf]  ;;  %v7942_v33 = vld [vmem:[#allocation5 + $0x948] sm:$0xf0]  ;;  %v6195_v45 = vor.u32 %v7886_v31, %v6194_v28  ;;  %v7659_v46 = vld [vmem:[#allocation5 + $0x74] sm:$0xf]  ;;  %v5639_v52 = vor.u32 %v7743_v29, %v5636_v30 }
  0x4c   :  { %2496 = vmatpush.bf16.msrb.mxu3 %v5415_v62  ;;  %v5300_v47 = vld [vmem:[#allocation5 + $0x8c] sm:$0xf0]  ;;  %v7736_v48 = vld [vmem:[#allocation5 + $0x2dc] sm:$0xf]  ;;  %v5608_v49 = vld [vmem:[#allocation5 + $0x2f4] sm:$0xf0]  ;;  %v6419_v53 = vor.u32 %v7942_v33, %v6418_v32 }
  0x4d   :  { %2455 = vmatpush.bf16.msrb.mxu0 %v6279_v7  ;;  %v6166_v50 = vld [vmem:[#allocation5 + $0x738] sm:$0xf]  ;;  %v7879_v51 = vld [vmem:[#allocation5 + $0x750] sm:$0xf0]  ;;  %v5303_v57 = vor.u32 %v7659_v46, %v5300_v47  ;;  %v7652_v58 = vld [vmem:[#allocation5 + $0x3c] sm:$0xf] }
  0x4e   :  { %2469 = vmatpush.bf16.msrb.mxu1 %v6503_v10  ;;  %v6390_v54 = vld [vmem:[#allocation5 + $0x8f8] sm:$0xf]  ;;  %v7935_v55 = vld [vmem:[#allocation5 + $0x910] sm:$0xf0]  ;;  %v134_v60 = vld [vmem:[#allocation2 + $0x16] sm:$0x3f]  ;;  %v6167_v61 = vor.u32 %v7879_v51, %v6166_v50 }
  0x4f   :  { %v195_v34 = vld.sshfl [vmem:[#allocation1 + $0x10] sm:$0xff pattern:$0x73625140]  ;;  %v193_v36 = vld.sshfl [vmem:[#allocation1] sm:$0xff pattern:$0x73625140]  ;;  %v6391_v7 = vor.u32 %v7935_v55, %v6390_v54 }
  0x50   :  { %2497 = vmatpush.bf16.msrb.mxu3 %v5387_v11  ;;  %v8554_v38 = vpack.c.bf16 %v195_v34, %v180_v5  ;;  %v8556_v39 = vpack.c.bf16 %v193_v36, %v178_v3  ;;  %v194_v41 = vld.sshfl [vmem:[#allocation1 + $0x8] sm:$0xff pattern:$0x73625140]  ;;  %v196_v42 = vld.sshfl [vmem:[#allocation1 + $0x18] sm:$0xff pattern:$0x73625140] }
  0x51   :  { %2456 = vmatpush.bf16.msrb.mxu0 %v6251_v16  ;;  %v8558_v43 = vpack.c.bf16 %v194_v41, %v179_v4  ;;  %v8560_v44 = vpack.c.bf16 %v196_v42, %v181_v6  ;;  %v132_v56 = vld [vmem:[#allocation2 + $0x8] sm:$0x3f]  ;;  %v6138_v62 = vld [vmem:[#allocation5 + $0x700] sm:$0xf]  ;;  %v7729_v1 = vld [vmem:[#allocation5 + $0x2a4] sm:$0xf]  ;;  %v5611_v6 = vor.u32 %v7736_v48, %v5608_v49 }
  0x52   :  { %2470 = vmatpush.bf16.msrb.mxu1 %v6475_v17  ;;  %2433 = vmatmul.bf16.vlgmr.msra.gmra.mxu2 %v8554_v38  ;;  %v5272_v59 = vld [vmem:[#allocation5 + $0x54] sm:$0xf0]  ;;  %v7872_v63 = vld [vmem:[#allocation5 + $0x718] sm:$0xf0]  ;;  %v5580_v2 = vld [vmem:[#allocation5 + $0x2bc] sm:$0xf0] }
  0x53   :  { %2405 = vmatmul.bf16.vlgmr.msra.gmra.mxu0 %v8556_v39  ;;  %2509 = vmatpush.bf16.msra.mxu2 %v5667_v35  ;;  %v136_v0 = vld [vmem:[#allocation2 + $0x24] sm:$0x3f]  ;;  %v6362_v3 = vld [vmem:[#allocation5 + $0x8c0] sm:$0xf]  ;;  %v7928_v4 = vld [vmem:[#allocation5 + $0x8d8] sm:$0xf0]  ;;  %v5275_v10 = vor.u32 %v7652_v58, %v5272_v59  ;;  %v6139_v13 = vor.u32 %v7872_v63, %v6138_v62  ;;  %v5583_v19 = vor.u32 %v7729_v1, %v5580_v2 }
  0x54   :  { %2498 = vmatpush.bf16.msrb.mxu3 %v5359_v18  ;;  %2419 = vmatmul.bf16.vlgmr.msra.gmra.mxu1 %v8558_v43  ;;  %v138_v5 = vld [vmem:[#allocation2 + $0x32] sm:$0x3f]  ;;  %171 = vst [vmem:[#allocation1 + $0x20] ss:$4 sm:$0xff] %v132_v56  ;;  %v7806_v8 = vld [vmem:[#allocation5 + $0x50c] sm:$0xf]  ;;  %v6363_v20 = vor.u32 %v7928_v4, %v6362_v3 }
  0x55   :  { %2457 = vmatpush.bf16.msrb.mxu0 %v6223_v25  ;;  %2447 = vmatmul.bf16.vlgmr.msra.gmra.mxu3 %v8560_v44  ;;  %173 = vst [vmem:[#allocation1 + $0x21] ss:$4 sm:$0xff] %v134_v60  ;;  %v5888_v9 = vld [vmem:[#allocation5 + $0x524] sm:$0xf0]  ;;  %v7645_v11 = vld [vmem:[#allocation5 + $0x4] sm:$0xf] }
  0x56   :  { %2471 = vmatpush.bf16.msrb.mxu1 %v6447_v37  ;;  %v5244_v12 = vld [vmem:[#allocation5 + $0x1c] sm:$0xf0]  ;;  %175 = vst [vmem:[#allocation1 + $0x22] ss:$4 sm:$0xff] %v136_v0  ;;  %v7862_v14 = vld [vmem:[#allocation5 + $0x6cc] sm:$0xf]  ;;  %v5891_v16 = vor.u32 %v7806_v8, %v5888_v9 }
  0x57   :  { %2510 = vmatpush.bf16.msra.mxu2 %v5639_v52  ;;  %177 = vst [vmem:[#allocation1 + $0x23] ss:$4 sm:$0xff] %v138_v5  ;;  %v6112_v15 = vld [vmem:[#allocation5 + $0x6e4] sm:$0xf0]  ;;  %v7918_v17 = vld [vmem:[#allocation5 + $0x88c] sm:$0xf]  ;;  %v5247_v25 = vor.u32 %v7645_v11, %v5244_v12 }
  0x58   :  { %2499 = vmatpush.bf16.msrb.mxu3 %v5331_v40  ;;  %v6336_v18 = vld [vmem:[#allocation5 + $0x8a4] sm:$0xf0]  ;;  %v7799_v21 = vld [vmem:[#allocation5 + $0x4d4] sm:$0xf]  ;;  %v5860_v22 = vld [vmem:[#allocation5 + $0x4ec] sm:$0xf0]  ;;  %v6115_v26 = vor.u32 %v7862_v14, %v6112_v15 }
  0x59   :  { %2458 = vmatpush.bf16.msrb.mxu0 %v6195_v45  ;;  %v7722_v23 = vld [vmem:[#allocation5 + $0x26c] sm:$0xf]  ;;  %v5552_v24 = vld [vmem:[#allocation5 + $0x284] sm:$0xf0]  ;;  %v140_v27 = vld [vmem:[#allocation2 + $0x40] sm:$0x3f]  ;;  %v6339_v28 = vor.u32 %v7918_v17, %v6336_v18  ;;  %v5863_v34 = vor.u32 %v7799_v21, %v5860_v22 }
  0x5a   :  { %2472 = vmatpush.bf16.msrb.mxu1 %v6419_v53  ;;  %v7855_v29 = vld [vmem:[#allocation5 + $0x694] sm:$0xf]  ;;  %v6084_v30 = vld [vmem:[#allocation5 + $0x6ac] sm:$0xf0]  ;;  %v142_v33 = vld [vmem:[#allocation2 + $0x4e] sm:$0x3f]  ;;  %v5555_v37 = vor.u32 %v7722_v23, %v5552_v24 }
  0x5b   :  { %2511 = vmatpush.bf16.msra.mxu2 %v5611_v6  ;;  %v7715_v31 = vld [vmem:[#allocation5 + $0x234] sm:$0xf]  ;;  %v5524_v32 = vld [vmem:[#allocation5 + $0x24c] sm:$0xf0]  ;;  %v7792_v41 = vld [vmem:[#allocation5 + $0x49c] sm:$0xf]  ;;  %v6087_v49 = vor.u32 %v7855_v29, %v6084_v30 }
  0x5c   :  { %2500 = vmatpush.bf16.msrb.mxu3 %v5303_v57  ;;  %v7911_v35 = vld [vmem:[#allocation5 + $0x854] sm:$0xf]  ;;  %v6308_v36 = vld [vmem:[#allocation5 + $0x86c] sm:$0xf0]  ;;  %v5832_v42 = vld [vmem:[#allocation5 + $0x4b4] sm:$0xf0]  ;;  %v5527_v56 = vor.u32 %v7715_v31, %v5524_v32 }
  0x5d   :  { %2459 = vmatpush.bf16.msrb.mxu0 %v6167_v61  ;;  %v144_v40 = vld [vmem:[#allocation2 + $0x5c] sm:$0x3f]  ;;  %v7848_v45 = vld [vmem:[#allocation5 + $0x65c] sm:$0xf]  ;;  %v6311_v51 = vor.u32 %v7911_v35, %v6308_v36  ;;  %v6056_v52 = vld [vmem:[#allocation5 + $0x674] sm:$0xf0]  ;;  %v5835_v53 = vor.u32 %v7792_v41, %v5832_v42 }
  0x5e   :  { %2473 = vmatpush.bf16.msrb.mxu1 %v6391_v7  ;;  %v146_v46 = vld [vmem:[#allocation2 + $0x6a] sm:$0x3f]  ;;  %v182_v47 = vld.sshfl [vmem:[#allocation1 + $0x20] sm:$0xff pattern:$0x73625140]  ;;  %v6059_v61 = vor.u32 %v7848_v45, %v6056_v52 }
  0x5f   :  { %2512 = vmatpush.bf16.msra.mxu2 %v5583_v19  ;;  %v8566_v48 = vld.sshfl [vmem:[#allocation1 + $0x28] sm:$0xff pattern:$0x73625140]  ;;  %v184_v50 = vld.sshfl [vmem:[#allocation1 + $0x30] sm:$0xff pattern:$0x73625140] }
  0x60   :  { %2501 = vmatpush.bf16.msrb.mxu3 %v5275_v10  ;;  %189 = vst [vmem:[#allocation1 + $0x20] ss:$4 sm:$0xff] %v140_v27  ;;  %v7904_v54 = vld [vmem:[#allocation5 + $0x81c] sm:$0xf]  ;;  %v6280_v55 = vld [vmem:[#allocation5 + $0x834] sm:$0xf0] }
  0x61   :  { %2460 = vmatpush.bf16.msrb.mxu0 %v6139_v13  ;;  %190 = vst [vmem:[#allocation1 + $0x21] ss:$4 sm:$0xff] %v142_v33  ;;  %v7785_v57 = vld [vmem:[#allocation5 + $0x464] sm:$0xf]  ;;  %v5804_v58 = vld [vmem:[#allocation5 + $0x47c] sm:$0xf0]  ;;  %v6283_v62 = vor.u32 %v7904_v54, %v6280_v55 }
  0x62   :  { %2474 = vmatpush.bf16.msrb.mxu1 %v6363_v20  ;;  %v7708_v59 = vld [vmem:[#allocation5 + $0x1fc] sm:$0xf]  ;;  %v5496_v60 = vld [vmem:[#allocation5 + $0x214] sm:$0xf0]  ;;  %191 = vst [vmem:[#allocation1 + $0x22] ss:$4 sm:$0xff] %v144_v40  ;;  %v5807_v1 = vor.u32 %v7785_v57, %v5804_v58 }
  0x63   :  { %2513 = vmatpush.bf16.msra.mxu2 %v5555_v37  ;;  %192 = vst [vmem:[#allocation1 + $0x23] ss:$4 sm:$0xff] %v146_v46  ;;  %v7841_v63 = vld [vmem:[#allocation5 + $0x624] sm:$0xf]  ;;  %v6028_v0 = vld [vmem:[#allocation5 + $0x63c] sm:$0xf0]  ;;  %v5499_v4 = vor.u32 %v7708_v59, %v5496_v60 }
  0x64   :  { %2502 = vmatpush.bf16.msrb.mxu3 %v5247_v25  ;;  %v7897_v2 = vld [vmem:[#allocation5 + $0x7e4] sm:$0xf]  ;;  %v6252_v3 = vld [vmem:[#allocation5 + $0x7fc] sm:$0xf0]  ;;  %v7778_v5 = vld [vmem:[#allocation5 + $0x42c] sm:$0xf]  ;;  %v6031_v8 = vor.u32 %v7841_v63, %v6028_v0 }
  0x65   :  { %2523 = vmatpush.bf16.msra.mxu0 %v5891_v16  ;;  %v5776_v6 = vld [vmem:[#allocation5 + $0x444] sm:$0xf0]  ;;  %v7701_v7 = vld [vmem:[#allocation5 + $0x1c4] sm:$0xf]  ;;  %v5468_v9 = vld [vmem:[#allocation5 + $0x1dc] sm:$0xf0]  ;;  %v6255_v12 = vor.u32 %v7897_v2, %v6252_v3 }
  0x66   :  { %2537 = vmatpush.bf16.msra.mxu1 %v6115_v26  ;;  %v7974_v10 = vld [vmem:[#allocation5 + $0xa4c] sm:$0xf]  ;;  %v6560_v11 = vld [vmem:[#allocation5 + $0xa64] sm:$0xf0]  ;;  %v5779_v13 = vor.u32 %v7778_v5, %v5776_v6  ;;  %v7771_v18 = vld [vmem:[#allocation5 + $0x3f4] sm:$0xf]  ;;  %v5471_v22 = vor.u32 %v7701_v7, %v5468_v9 }
  0x67   :  { %2503 = vmatmul.bf16.vlgmr.msrb.gmra.mxu3 %v8556_v39  ;;  %2514 = vmatpush.bf16.msra.mxu2 %v5527_v56  ;;  %v7834_v14 = vld [vmem:[#allocation5 + $0x5ec] sm:$0xf]  ;;  %v6000_v15 = vld [vmem:[#allocation5 + $0x604] sm:$0xf0]  ;;  %v5748_v19 = vld [vmem:[#allocation5 + $0x40c] sm:$0xf0]  ;;  %v6563_v26 = vor.u32 %v7974_v10, %v6560_v11 }
  0x68   :  { %2551 = vmatpush.bf16.msra.mxu3 %v6339_v28  ;;  %v7890_v16 = vld [vmem:[#allocation5 + $0x7ac] sm:$0xf]  ;;  %v6224_v17 = vld [vmem:[#allocation5 + $0x7c4] sm:$0xf0]  ;;  %v7967_v23 = vld [vmem:[#allocation5 + $0xa14] sm:$0xf]  ;;  %v6003_v29 = vor.u32 %v7834_v14, %v6000_v15  ;;  %v5751_v32 = vor.u32 %v7771_v18, %v5748_v19 }
  0x69   :  { %2524 = vmatpush.bf16.msra.mxu0 %v5863_v34  ;;  %v6532_v28 = vld [vmem:[#allocation5 + $0xa2c] sm:$0xf0]  ;;  %v6227_v31 = vor.u32 %v7890_v16, %v6224_v17  ;;  %v7827_v33 = vld [vmem:[#allocation5 + $0x5b4] sm:$0xf]  ;;  %v7764_v37 = vld [vmem:[#allocation5 + $0x3bc] sm:$0xf] }
  0x6a   :  { %2538 = vmatpush.bf16.msra.mxu1 %v6087_v49  ;;  %v199_v20 = vld.sshfl [vmem:[#allocation1 + $0x30] sm:$0xff pattern:$0x73625140]  ;;  %v197_v21 = vld.sshfl [vmem:[#allocation1 + $0x20] sm:$0xff pattern:$0x73625140]  ;;  %v6535_v41 = vor.u32 %v7967_v23, %v6532_v28 }
  0x6b   :  { %2515 = vmatpush.bf16.msra.mxu2 %v5499_v4  ;;  %v8569_v24 = vpack.c.bf16 %v199_v20, %v184_v50  ;;  %v8571_v25 = vpack.c.bf16 %v197_v21, %v182_v47  ;;  %v198_v27 = vld.sshfl [vmem:[#allocation1 + $0x28] sm:$0xff pattern:$0x73625140]  ;;  %v5720_v40 = vld [vmem:[#allocation5 + $0x3d4] sm:$0xf0] }
  0x6c   :  { %2552 = vmatpush.bf16.msra.mxu3 %v6311_v51  ;;  %v8574_v30 = vpack.c.bf16 %v198_v27, %v8566_v48  ;;  %v5972_v34 = vld [vmem:[#allocation5 + $0x5cc] sm:$0xf0]  ;;  %v7883_v35 = vld [vmem:[#allocation5 + $0x774] sm:$0xf]  ;;  %v7960_v42 = vld [vmem:[#allocation5 + $0x9dc] sm:$0xf]  ;;  %v5723_v48 = vor.u32 %v7764_v37, %v5720_v40 }
  0x6d   :  { %2525 = vmatpush.bf16.msra.mxu0 %v5835_v53  ;;  %6612 = vmatmul.msk.bf16.vlgmr.msrb.gmra.mxu2 %vm2393_vm0, %v8569_v24  ;;  %v6196_v36 = vld [vmem:[#allocation5 + $0x78c] sm:$0xf0]  ;;  %v6504_v45 = vld [vmem:[#allocation5 + $0x9f4] sm:$0xf0]  ;;  %v5975_v46 = vor.u32 %v7827_v33, %v5972_v34  ;;  %v7820_v49 = vld [vmem:[#allocation5 + $0x57c] sm:$0xf] }
  0x6e   :  { %2539 = vmatpush.bf16.msra.mxu1 %v6059_v61  ;;  %2461 = vmatmul.bf16.vlgmr.msrb.gmra.mxu0 %v8571_v25  ;;  %v6199_v47 = vor.u32 %v7883_v35, %v6196_v36  ;;  %v5944_v50 = vld [vmem:[#allocation5 + $0x594] sm:$0xf0]  ;;  %v7876_v51 = vld [vmem:[#allocation5 + $0x73c] sm:$0xf]  ;;  %v7757_v53 = vld [vmem:[#allocation5 + $0x384] sm:$0xf]  ;;  %v6507_v57 = vor.u32 %v7960_v42, %v6504_v45 }
  0x6f   :  { %2516 = vmatpush.bf16.msra.mxu2 %v5471_v22  ;;  %2475 = vmatmul.bf16.vlgmr.msrb.gmra.mxu1 %v8574_v30  ;;  %v6168_v52 = vld [vmem:[#allocation5 + $0x754] sm:$0xf0]  ;;  %v5692_v54 = vld [vmem:[#allocation5 + $0x39c] sm:$0xf0]  ;;  %v7981_v55 = vld [vmem:[#allocation5 + $0xa84] sm:$0xf]  ;;  %v5947_v60 = vor.u32 %v7820_v49, %v5944_v50 }
  0x70   :  { %2553 = vmatpush.bf16.msra.mxu3 %v6283_v62  ;;  %v6588_v56 = vld [vmem:[#allocation5 + $0xa9c] sm:$0xf0]  ;;  %v7953_v58 = vld [vmem:[#allocation5 + $0x9a4] sm:$0xf]  ;;  %v6171_v61 = vor.u32 %v7876_v51, %v6168_v52  ;;  %v5695_v62 = vor.u32 %v7757_v53, %v5692_v54  ;;  %v5446_v3 = vld [vmem:[#allocation5 + $0x190] sm:$0xf] }
  0x71   :  { %2526 = vmatpush.bf16.msra.mxu0 %v5807_v1  ;;  %v6476_v59 = vld [vmem:[#allocation5 + $0x9bc] sm:$0xf0]  ;;  %v7813_v63 = vld [vmem:[#allocation5 + $0x544] sm:$0xf]  ;;  %v7698_v4 = vld [vmem:[#allocation5 + $0x1a8] sm:$0xf0]  ;;  %v6591_v5 = vor.u32 %v7981_v55, %v6588_v56 }
  0x72   :  { %2540 = vmatpush.bf16.msra.mxu1 %v6031_v8  ;;  %v5916_v0 = vld [vmem:[#allocation5 + $0x55c] sm:$0xf0]  ;;  %v7869_v1 = vld [vmem:[#allocation5 + $0x704] sm:$0xf]  ;;  %v5670_v6 = vld [vmem:[#allocation5 + $0x350] sm:$0xf]  ;;  %v6479_v8 = vor.u32 %v7953_v58, %v6476_v59 }
  0x73   :  { %2565 = vmatpush.bf16.msrb.mxu2 %v6563_v26  ;;  %v6140_v2 = vld [vmem:[#allocation5 + $0x71c] sm:$0xf0]  ;;  %v7754_v7 = vld [vmem:[#allocation5 + $0x368] sm:$0xf0]  ;;  %v5919_v9 = vor.u32 %v7813_v63, %v5916_v0  ;;  %v6448_v11 = vld [vmem:[#allocation5 + $0x984] sm:$0xf0] }
  0x74   :  { %2554 = vmatpush.bf16.msra.mxu3 %v6255_v12  ;;  %v7946_v10 = vld [vmem:[#allocation5 + $0x96c] sm:$0xf]  ;;  %v6143_v12 = vor.u32 %v7869_v1, %v6140_v2  ;;  %v5894_v14 = vld [vmem:[#allocation5 + $0x510] sm:$0xf]  ;;  %v5671_v15 = vor.u32 %v7754_v7, %v5670_v6  ;;  %v5418_v17 = vld [vmem:[#allocation5 + $0x158] sm:$0xf] }
  0x75   :  { %2527 = vmatpush.bf16.msra.mxu0 %v5779_v13  ;;  %v5447_v13 = vor.u32 %v7698_v4, %v5446_v3  ;;  %v7810_v16 = vld [vmem:[#allocation5 + $0x528] sm:$0xf0]  ;;  %v7691_v18 = vld [vmem:[#allocation5 + $0x170] sm:$0xf0]  ;;  %v5642_v19 = vld [vmem:[#allocation5 + $0x318] sm:$0xf]  ;;  %v6451_v21 = vor.u32 %v7946_v10, %v6448_v11 }
  0x76   :  { %2541 = vmatpush.bf16.msra.mxu1 %v6003_v29  ;;  %v7747_v20 = vld [vmem:[#allocation5 + $0x330] sm:$0xf0]  ;;  %v6420_v23 = vld [vmem:[#allocation5 + $0x94c] sm:$0xf0]  ;;  %v5895_v26 = vor.u32 %v7810_v16, %v5894_v14  ;;  %v5419_v27 = vor.u32 %v7691_v18, %v5418_v17  ;;  %v5866_v28 = vld [vmem:[#allocation5 + $0x4d8] sm:$0xf] }
  0x77   :  { %2566 = vmatpush.bf16.msrb.mxu2 %v6535_v41  ;;  %v7939_v22 = vld [vmem:[#allocation5 + $0x934] sm:$0xf]  ;;  %v5643_v29 = vor.u32 %v7747_v20, %v5642_v19  ;;  %v7684_v33 = vld [vmem:[#allocation5 + $0x138] sm:$0xf0]  ;;  %v5614_v34 = vld [vmem:[#allocation5 + $0x2e0] sm:$0xf] }
  0x78   :  { %2555 = vmatpush.bf16.msra.mxu3 %v6227_v31  ;;  %v7803_v31 = vld [vmem:[#allocation5 + $0x4f0] sm:$0xf0]  ;;  %v7740_v35 = vld [vmem:[#allocation5 + $0x2f8] sm:$0xf0]  ;;  %v6423_v36 = vor.u32 %v7939_v22, %v6420_v23  ;;  %v6392_v40 = vld [vmem:[#allocation5 + $0x914] sm:$0xf0] }
  0x79   :  { %2528 = vmatpush.bf16.msra.mxu0 %v5751_v32  ;;  %v5390_v32 = vld [vmem:[#allocation5 + $0x120] sm:$0xf]  ;;  %v7932_v37 = vld [vmem:[#allocation5 + $0x8fc] sm:$0xf]  ;;  %v5867_v41 = vor.u32 %v7803_v31, %v5866_v28  ;;  %v7677_v49 = vld [vmem:[#allocation5 + $0x100] sm:$0xf0] }
  0x7a   :  { %2542 = vmatpush.bf16.msra.mxu1 %v5975_v46  ;;  %v5391_v42 = vor.u32 %v7684_v33, %v5390_v32  ;;  %v5838_v45 = vld [vmem:[#allocation5 + $0x4a0] sm:$0xf]  ;;  %v5615_v46 = vor.u32 %v7740_v35, %v5614_v34  ;;  %v5586_v50 = vld [vmem:[#allocation5 + $0x2a8] sm:$0xf]  ;;  %v7733_v51 = vld [vmem:[#allocation5 + $0x2c0] sm:$0xf0]  ;;  %v6395_v52 = vor.u32 %v7932_v37, %v6392_v40 }
  0x7b   :  { %2567 = vmatpush.bf16.msrb.mxu2 %v6507_v57  ;;  %v7925_v53 = vld [vmem:[#allocation5 + $0x8c4] sm:$0xf]  ;;  %v6364_v54 = vld [vmem:[#allocation5 + $0x8dc] sm:$0xf0]  ;;  %v6118_v55 = vld [vmem:[#allocation5 + $0x6d0] sm:$0xf]  ;;  %v5587_v59 = vor.u32 %v7733_v51, %v5586_v50 }
  0x7c   :  { %2556 = vmatpush.bf16.msra.mxu3 %v6199_v47  ;;  %v7796_v47 = vld [vmem:[#allocation5 + $0x4b8] sm:$0xf0]  ;;  %v7866_v56 = vld [vmem:[#allocation5 + $0x6e8] sm:$0xf0]  ;;  %v5558_v0 = vld [vmem:[#allocation5 + $0x270] sm:$0xf]  ;;  %v6367_v2 = vor.u32 %v7925_v53, %v6364_v54 }
  0x7d   :  { %2529 = vmatpush.bf16.msra.mxu0 %v5723_v48  ;;  %2517 = vmatmul.bf16.vlgmr.msra.gmra.mxu2 %v8558_v43  ;;  %v5362_v48 = vld [vmem:[#allocation5 + $0xe8] sm:$0xf]  ;;  %v5839_v57 = vor.u32 %v7796_v47, %v5838_v45  ;;  %v7670_v63 = vld [vmem:[#allocation5 + $0xc8] sm:$0xf0]  ;;  %v6119_v3 = vor.u32 %v7866_v56, %v6118_v55  ;;  %v6090_v4 = vld [vmem:[#allocation5 + $0x698] sm:$0xf] }
  0x7e   :  { %2543 = vmatpush.bf16.msra.mxu1 %v5947_v60  ;;  %v5363_v58 = vor.u32 %v7677_v49, %v5362_v48  ;;  %v5810_v60 = vld [vmem:[#allocation5 + $0x468] sm:$0xf]  ;;  %v7726_v1 = vld [vmem:[#allocation5 + $0x288] sm:$0xf0]  ;;  %v5306_v11 = vld [vmem:[#allocation5 + $0x78] sm:$0xf] }
  0x7f   :  { %2568 = vmatpush.bf16.msrb.mxu2 %v6479_v8  ;;  %v5559_v8 = vor.u32 %v7726_v1, %v5558_v0  ;;  %v7782_v10 = vld [vmem:[#allocation5 + $0x448] sm:$0xf0]  ;;  %v7719_v14 = vld [vmem:[#allocation5 + $0x250] sm:$0xf0]  ;;  %v6062_v16 = vld [vmem:[#allocation5 + $0x660] sm:$0xf] }
  0x80   :  { %2557 = vmatpush.bf16.msra.mxu3 %v6171_v61  ;;  %v7789_v61 = vld [vmem:[#allocation5 + $0x480] sm:$0xf0]  ;;  %v7852_v17 = vld [vmem:[#allocation5 + $0x678] sm:$0xf0]  ;;  %v7775_v22 = vld [vmem:[#allocation5 + $0x410] sm:$0xf0] }
  0x81   :  { %2530 = vmatpush.bf16.msra.mxu0 %v5695_v62  ;;  %v5334_v62 = vld [vmem:[#allocation5 + $0xb0] sm:$0xf]  ;;  %v5811_v6 = vor.u32 %v7789_v61, %v5810_v60  ;;  %v5278_v23 = vld [vmem:[#allocation5 + $0x40] sm:$0xf]  ;;  %v7712_v28 = vld [vmem:[#allocation5 + $0x218] sm:$0xf0] }
  0x82   :  { %2544 = vmatpush.bf16.msra.mxu1 %v5919_v9  ;;  %v5335_v7 = vor.u32 %v7670_v63, %v5334_v62  ;;  %v5782_v9 = vld [vmem:[#allocation5 + $0x430] sm:$0xf]  ;;  %v6034_v31 = vld [vmem:[#allocation5 + $0x628] sm:$0xf]  ;;  %v7845_v32 = vld [vmem:[#allocation5 + $0x640] sm:$0xf0] }
  0x83   :  { %2569 = vmatpush.bf16.msrb.mxu2 %v6451_v21  ;;  %v5783_v18 = vor.u32 %v7782_v10, %v5782_v9  ;;  %v5754_v21 = vld [vmem:[#allocation5 + $0x3f8] sm:$0xf]  ;;  %v5726_v34 = vld [vmem:[#allocation5 + $0x3c0] sm:$0xf]  ;;  %v7768_v37 = vld [vmem:[#allocation5 + $0x3d8] sm:$0xf0]  ;;  %v6035_v50 = vor.u32 %v7845_v32, %v6034_v31 }
  0x84   :  { %2558 = vmatpush.bf16.msra.mxu3 %v6143_v12  ;;  %2531 = vmatmul.bf16.vlgmr.msra.gmra.mxu0 %v8554_v38  ;;  %v7663_v12 = vld [vmem:[#allocation5 + $0x90] sm:$0xf0]  ;;  %v5755_v33 = vor.u32 %v7775_v22, %v5754_v21  ;;  %v5250_v40 = vld [vmem:[#allocation5 + $0x8] sm:$0xf]  ;;  %v7705_v45 = vld [vmem:[#allocation5 + $0x1e0] sm:$0xf0] }
  0x85   :  { %2586 = vmatpush.bf16.msrb.mxu0 %v6591_v5  ;;  %2545 = vmatmul.bf16.vlgmr.msra.gmra.mxu1 %v8560_v44  ;;  %v7859_v5 = vld [vmem:[#allocation5 + $0x6b0] sm:$0xf0]  ;;  %v5307_v19 = vor.u32 %v7663_v12, %v5306_v11  ;;  %v7922_v47 = vld [vmem:[#allocation5 + $0x8a8] sm:$0xf0]  ;;  %v6566_v48 = vld [vmem:[#allocation5 + $0xa50] sm:$0xf] }
  0x86   :  { %2593 = vmatpush.bf16.msrb.mxu1 %v5447_v13  ;;  %v5530_v13 = vld [vmem:[#allocation5 + $0x238] sm:$0xf]  ;;  %v7978_v49 = vld [vmem:[#allocation5 + $0xa68] sm:$0xf0]  ;;  %v6006_v51 = vld [vmem:[#allocation5 + $0x5f0] sm:$0xf] }
  0x87   :  { %2559 = vmatmul.bf16.vlgmr.msra.gmra.mxu3 %v8571_v25  ;;  %2570 = vmatpush.bf16.msrb.mxu2 %v6423_v36  ;;  %v5531_v20 = vor.u32 %v7719_v14, %v5530_v13  ;;  %v7838_v53 = vld [vmem:[#allocation5 + $0x608] sm:$0xf0]  ;;  %v5698_v56 = vld [vmem:[#allocation5 + $0x388] sm:$0xf]  ;;  %v6314_v60 = vld [vmem:[#allocation5 + $0x858] sm:$0xf] }
  0x88   :  { %2607 = vmatpush.bf16.msrb.mxu3 %v5671_v15  ;;  %v6091_v15 = vor.u32 %v7859_v5, %v6090_v4  ;;  %v6594_v61 = vld [vmem:[#allocation5 + $0xa88] sm:$0xf]  ;;  %v7985_v62 = vld [vmem:[#allocation5 + $0xaa0] sm:$0xf0]  ;;  %v7915_v63 = vld [vmem:[#allocation5 + $0x870] sm:$0xf0] }
  0x89   :  { %2621 = vmatpush.bf16.msra.mxu0 %v5895_v26  ;;  %v7656_v26 = vld [vmem:[#allocation5 + $0x58] sm:$0xf0]  ;;  %v6538_v0 = vld [vmem:[#allocation5 + $0xa18] sm:$0xf]  ;;  %v7971_v1 = vld [vmem:[#allocation5 + $0xa30] sm:$0xf0]  ;;  %v6315_v9 = vor.u32 %v7915_v63, %v6314_v60 }
  0x8a   :  { %2594 = vmatpush.bf16.msrb.mxu1 %v5419_v27  ;;  %v5502_v27 = vld [vmem:[#allocation5 + $0x200] sm:$0xf]  ;;  %v5279_v35 = vor.u32 %v7656_v26, %v5278_v23  ;;  %v7831_v5 = vld [vmem:[#allocation5 + $0x5d0] sm:$0xf0]  ;;  %v6539_v10 = vor.u32 %v7971_v1, %v6538_v0  ;;  %v7908_v12 = vld [vmem:[#allocation5 + $0x838] sm:$0xf0] }
  0x8b   :  { %2571 = vmatpush.bf16.msrb.mxu2 %v6395_v52  ;;  %v5503_v36 = vor.u32 %v7712_v28, %v5502_v27  ;;  %v5727_v52 = vor.u32 %v7768_v37, %v5726_v34  ;;  %v6286_v11 = vld [vmem:[#allocation5 + $0x820] sm:$0xf]  ;;  %v7964_v14 = vld [vmem:[#allocation5 + $0x9f8] sm:$0xf0]  ;;  %v6258_v23 = vld [vmem:[#allocation5 + $0x7e8] sm:$0xf] }
  0x8c   :  { %2608 = vmatpush.bf16.msrb.mxu3 %v5643_v29  ;;  %v6063_v29 = vor.u32 %v7852_v17, %v6062_v16  ;;  %v6510_v13 = vld [vmem:[#allocation5 + $0x9e0] sm:$0xf]  ;;  %v6287_v21 = vor.u32 %v7908_v12, %v6286_v11  ;;  %v7901_v26 = vld [vmem:[#allocation5 + $0x800] sm:$0xf0]  ;;  %v6482_v27 = vld [vmem:[#allocation5 + $0x9a8] sm:$0xf] }
  0x8d   :  { %2622 = vmatpush.bf16.msra.mxu0 %v5867_v41  ;;  %v7649_v41 = vld [vmem:[#allocation5 + $0x20] sm:$0xf0]  ;;  %v5950_v16 = vld [vmem:[#allocation5 + $0x580] sm:$0xf]  ;;  %v6511_v22 = vor.u32 %v7964_v14, %v6510_v13  ;;  %v5922_v31 = vld [vmem:[#allocation5 + $0x548] sm:$0xf] }
  0x8e   :  { %2595 = vmatpush.bf16.msrb.mxu1 %v5391_v42  ;;  %v5474_v42 = vld [vmem:[#allocation5 + $0x1c8] sm:$0xf]  ;;  %v5251_v54 = vor.u32 %v7649_v41, %v5250_v40  ;;  %v7957_v28 = vld [vmem:[#allocation5 + $0x9c0] sm:$0xf0]  ;;  %v5448_v37 = vld [vmem:[#allocation5 + $0x1ac] sm:$0xf0]  ;;  %v6259_v40 = vor.u32 %v7901_v26, %v6258_v23 }
  0x8f   :  { %2572 = vmatpush.bf16.msrb.mxu2 %v6367_v2  ;;  %v5475_v55 = vor.u32 %v7705_v45, %v5474_v42  ;;  %v6007_v2 = vor.u32 %v7838_v53, %v6006_v51  ;;  %v7737_v34 = vld [vmem:[#allocation5 + $0x2e4] sm:$0xf]  ;;  %v6483_v41 = vor.u32 %v7957_v28, %v6482_v27  ;;  %v6230_v42 = vld [vmem:[#allocation5 + $0x7b0] sm:$0xf]  ;;  %v7894_v45 = vld [vmem:[#allocation5 + $0x7c8] sm:$0xf0] }
  0x90   :  { %2609 = vmatpush.bf16.msrb.mxu3 %v5615_v46  ;;  %v6342_v46 = vld [vmem:[#allocation5 + $0x890] sm:$0xf]  ;;  %v7730_v51 = vld [vmem:[#allocation5 + $0x2ac] sm:$0xf]  ;;  %v7688_v53 = vld [vmem:[#allocation5 + $0x15c] sm:$0xf] }
  0x91   :  { %2623 = vmatpush.bf16.msra.mxu0 %v5839_v57  ;;  %v7761_v57 = vld [vmem:[#allocation5 + $0x3a0] sm:$0xf0]  ;;  %v7943_v60 = vld [vmem:[#allocation5 + $0x950] sm:$0xf0]  ;;  %v5560_v0 = vld [vmem:[#allocation5 + $0x28c] sm:$0xf0] }
  0x92   :  { %2596 = vmatpush.bf16.msrb.mxu1 %v5363_v58  ;;  %2573 = vmatmul.bf16.vlgmr.msrb.gmra.mxu2 %v8574_v30  ;;  %v6343_v58 = vor.u32 %v7922_v47, %v6342_v46  ;;  %v5699_v4 = vor.u32 %v7761_v57, %v5698_v56  ;;  %v6454_v46 = vld [vmem:[#allocation5 + $0x970] sm:$0xf]  ;;  %v7950_v47 = vld [vmem:[#allocation5 + $0x988] sm:$0xf0]  ;;  %v6202_v57 = vld [vmem:[#allocation5 + $0x778] sm:$0xf] }
  0x93   :  { %2635 = vmatpush.bf16.msra.mxu2 %v6119_v3  ;;  %v5978_v3 = vld [vmem:[#allocation5 + $0x5b8] sm:$0xf]  ;;  %v6455_v56 = vor.u32 %v7950_v47, %v6454_v46  ;;  %v7723_v63 = vld [vmem:[#allocation5 + $0x274] sm:$0xf]  ;;  %v7681_v1 = vld [vmem:[#allocation5 + $0x124] sm:$0xf] }
  0x94   :  { %2610 = vmatpush.bf16.msrb.mxu3 %v5587_v59  ;;  %6613 = vmatmul.msk.bf16.vlgmr.msrb.gmra.mxu0 %vm2393_vm0, %v8569_v24  ;;  %v6567_v59 = vor.u32 %v7978_v49, %v6566_v48  ;;  %v7674_v11 = vld [vmem:[#allocation5 + $0xec] sm:$0xf]  ;;  %v7716_v12 = vld [vmem:[#allocation5 + $0x23c] sm:$0xf]  ;;  %v5532_v13 = vld [vmem:[#allocation5 + $0x254] sm:$0xf0] }
  0x95   :  { %2624 = vmatpush.bf16.msra.mxu0 %v5811_v6  ;;  %v6595_v6 = vor.u32 %v7985_v62, %v6594_v61  ;;  %v5364_v14 = vld [vmem:[#allocation5 + $0x104] sm:$0xf0]  ;;  %v5896_v23 = vld [vmem:[#allocation5 + $0x52c] sm:$0xf0]  ;;  %v7863_v26 = vld [vmem:[#allocation5 + $0x6d4] sm:$0xf] }
  0x96   :  { %2597 = vmatpush.bf16.msrb.mxu1 %v5335_v7  ;;  %v7751_v7 = vld [vmem:[#allocation5 + $0x354] sm:$0xf]  ;;  %v6120_v27 = vld [vmem:[#allocation5 + $0x6ec] sm:$0xf0]  ;;  %v5367_v28 = vor.u32 %v7674_v11, %v5364_v14  ;;  %v6092_v46 = vld [vmem:[#allocation5 + $0x6b4] sm:$0xf0] }
  0x97   :  { %2636 = vmatpush.bf16.msra.mxu2 %v6091_v15  ;;  %v5979_v15 = vor.u32 %v7831_v5, %v5978_v3  ;;  %v6174_v5 = vld [vmem:[#allocation5 + $0x740] sm:$0xf] }
  0x98   :  { %2611 = vmatpush.bf16.msrb.mxu3 %v5559_v8  ;;  %v5672_v8 = vld [vmem:[#allocation5 + $0x36c] sm:$0xf0]  ;;  %v6512_v14 = vld [vmem:[#allocation5 + $0x9fc] sm:$0xf0] }
  0x99   :  { %2625 = vmatpush.bf16.msra.mxu0 %v5783_v18  ;;  %v5675_v17 = vor.u32 %v7751_v7, %v5672_v8  ;;  %v7824_v18 = vld [vmem:[#allocation5 + $0x598] sm:$0xf0]  ;;  %v6398_v7 = vld [vmem:[#allocation5 + $0x900] sm:$0xf] }
  0x9a   :  { %2598 = vmatpush.bf16.msrb.mxu1 %v5307_v19  ;;  %v7744_v19 = vld [vmem:[#allocation5 + $0x31c] sm:$0xf] }
  0x9b   :  { %2637 = vmatpush.bf16.msra.mxu2 %v6063_v29  ;;  %v5951_v29 = vor.u32 %v7824_v18, %v5950_v16  ;;  %v7936_v8 = vld [vmem:[#allocation5 + $0x918] sm:$0xf0]  ;;  %v7873_v18 = vld [vmem:[#allocation5 + $0x720] sm:$0xf0] }
  0x9c   :  { %2612 = vmatpush.bf16.msrb.mxu3 %v5531_v20  ;;  %v5644_v20 = vld [vmem:[#allocation5 + $0x334] sm:$0xf0]  ;;  %v6399_v16 = vor.u32 %v7936_v8, %v6398_v7  ;;  %v7842_v7 = vld [vmem:[#allocation5 + $0x62c] sm:$0xf]  ;;  %v6036_v8 = vld [vmem:[#allocation5 + $0x644] sm:$0xf0] }
  0x9d   :  { %2626 = vmatpush.bf16.msra.mxu0 %v5755_v33  ;;  %v5647_v32 = vor.u32 %v7744_v19, %v5644_v20  ;;  %v7817_v33 = vld [vmem:[#allocation5 + $0x560] sm:$0xf0]  ;;  %v6370_v19 = vld [vmem:[#allocation5 + $0x8c8] sm:$0xf] }
  0x9e   :  { %2599 = vmatpush.bf16.msrb.mxu1 %v5279_v35  ;;  %v5616_v35 = vld [vmem:[#allocation5 + $0x2fc] sm:$0xf0]  ;;  %v5923_v48 = vor.u32 %v7817_v33, %v5922_v31  ;;  %v7929_v20 = vld [vmem:[#allocation5 + $0x8e0] sm:$0xf0]  ;;  %v5336_v33 = vld [vmem:[#allocation5 + $0xcc] sm:$0xf0] }
  0x9f   :  { %2638 = vmatpush.bf16.msra.mxu2 %v6035_v50  ;;  %v5619_v49 = vor.u32 %v7737_v34, %v5616_v35  ;;  %v5504_v31 = vld [vmem:[#allocation5 + $0x21c] sm:$0xf0]  ;;  %v6371_v35 = vor.u32 %v7929_v20, %v6370_v19  ;;  %v7779_v19 = vld [vmem:[#allocation5 + $0x434] sm:$0xf]  ;;  %v5784_v20 = vld [vmem:[#allocation5 + $0x44c] sm:$0xf0] }
  0xa0   :  { %2613 = vmatpush.bf16.msrb.mxu3 %v5503_v36  ;;  %v7695_v36 = vld [vmem:[#allocation5 + $0x194] sm:$0xf] }
  0xa1   :  { %2627 = vmatpush.bf16.msra.mxu0 %v5727_v52  ;;  %v5451_v50 = vor.u32 %v7695_v36, %v5448_v37  ;;  %v5588_v52 = vld [vmem:[#allocation5 + $0x2c4] sm:$0xf0]  ;;  %v6123_v37 = vor.u32 %v7863_v26, %v6120_v27 }
  0xa2   :  { %2600 = vmatpush.bf16.msrb.mxu1 %v5251_v54  ;;  %v5420_v54 = vld [vmem:[#allocation5 + $0x174] sm:$0xf0]  ;;  %v5591_v61 = vor.u32 %v7730_v51, %v5588_v52  ;;  %v7975_v52 = vld [vmem:[#allocation5 + $0xa54] sm:$0xf] }
  0xa3   :  { %2639 = vmatpush.bf16.msra.mxu2 %v6007_v2  ;;  %v5423_v62 = vor.u32 %v7688_v53, %v5420_v54  ;;  %v5392_v2 = vld [vmem:[#allocation5 + $0x13c] sm:$0xf0]  ;;  %v5308_v51 = vld [vmem:[#allocation5 + $0x94] sm:$0xf0]  ;;  %v6568_v53 = vld [vmem:[#allocation5 + $0xa6c] sm:$0xf0] }
  0xa4   :  { %2614 = vmatpush.bf16.msrb.mxu3 %v5475_v55  ;;  %v6231_v55 = vor.u32 %v7894_v45, %v6230_v42  ;;  %v5868_v42 = vld [vmem:[#allocation5 + $0x4f4] sm:$0xf0]  ;;  %v7856_v45 = vld [vmem:[#allocation5 + $0x69c] sm:$0xf] }
  0xa5   :  { %2628 = vmatpush.bf16.msra.mxu0 %v5699_v4  ;;  %2601 = vmatmul.bf16.vlgmr.msrb.gmra.mxu1 %v8556_v39 }
  0xa6   :  { %2649 = vmatpush.bf16.msra.mxu1 %v6343_v58  ;;  %v7887_v58 = vld [vmem:[#allocation5 + $0x790] sm:$0xf0] }
  0xa7   :  { %2615 = vmatmul.bf16.vlgmr.msrb.gmra.mxu3 %v8558_v43  ;;  %2640 = vmatpush.bf16.msra.mxu2 %v5979_v15  ;;  %v6203_v3 = vor.u32 %v7887_v58, %v6202_v57  ;;  %v5840_v58 = vld [vmem:[#allocation5 + $0x4bc] sm:$0xf0] }
  0xa8   :  { %2663 = vmatpush.bf16.msra.mxu3 %v6567_v59  ;;  %2629 = vmatmul.bf16.vlgmr.msra.gmra.mxu0 %v8554_v38  ;;  %v6426_v59 = vld [vmem:[#allocation5 + $0x938] sm:$0xf] }
  0xa9   :  { %2684 = vmatpush.bf16.msrb.mxu0 %v6595_v6  ;;  %v6427_v4 = vor.u32 %v7943_v60, %v6426_v59  ;;  %v7880_v6 = vld [vmem:[#allocation5 + $0x758] sm:$0xf0]  ;;  %v7849_v59 = vld [vmem:[#allocation5 + $0x664] sm:$0xf]  ;;  %v6064_v60 = vld [vmem:[#allocation5 + $0x67c] sm:$0xf0] }
  0xaa   :  { %2650 = vmatpush.bf16.msra.mxu1 %v6315_v9  ;;  %v5563_v9 = vor.u32 %v7723_v63, %v5560_v0  ;;  %v6175_v15 = vor.u32 %v7880_v6, %v6174_v5  ;;  %v6571_v63 = vor.u32 %v7975_v52, %v6568_v53  ;;  %v5280_v0 = vld [vmem:[#allocation5 + $0x5c] sm:$0xf0]  ;;  %v7786_v5 = vld [vmem:[#allocation5 + $0x46c] sm:$0xf]  ;;  %v5812_v6 = vld [vmem:[#allocation5 + $0x484] sm:$0xf0] }
  0xab   :  { %2641 = vmatpush.bf16.msra.mxu2 %v5951_v29  ;;  %v7709_v29 = vld [vmem:[#allocation5 + $0x204] sm:$0xf]  ;;  %v5728_v53 = vld [vmem:[#allocation5 + $0x3dc] sm:$0xf0] }
  0xac   :  { %2664 = vmatpush.bf16.msra.mxu3 %v6539_v10  ;;  %v5395_v10 = vor.u32 %v7681_v1, %v5392_v2  ;;  %v7968_v1 = vld [vmem:[#allocation5 + $0xa1c] sm:$0xf]  ;;  %v6540_v2 = vld [vmem:[#allocation5 + $0xa34] sm:$0xf0]  ;;  %v7765_v52 = vld [vmem:[#allocation5 + $0x3c4] sm:$0xf] }
  0xad   :  { %2705 = vmatpush.bf16.msra.mxu0 %v5675_v17  ;;  %v6146_v17 = vld [vmem:[#allocation5 + $0x708] sm:$0xf]  ;;  %v6543_v11 = vor.u32 %v7968_v1, %v6540_v2  ;;  %v7758_v1 = vld [vmem:[#allocation5 + $0x38c] sm:$0xf] }
  0xae   :  { %2651 = vmatpush.bf16.msra.mxu1 %v6287_v21  ;;  %v7807_v21 = vld [vmem:[#allocation5 + $0x514] sm:$0xf]  ;;  %v6147_v34 = vor.u32 %v7873_v18, %v6146_v17  ;;  %v5815_v17 = vor.u32 %v7786_v5, %v5812_v6  ;;  %v6039_v18 = vor.u32 %v7842_v7, %v6036_v8  ;;  %v5700_v2 = vld [vmem:[#allocation5 + $0x3a4] sm:$0xf0]  ;;  %v5454_v5 = vld [vmem:[#allocation5 + $0x198] sm:$0xf] }
  0xaf   :  { %2642 = vmatpush.bf16.msra.mxu2 %v5923_v48  ;;  %v5899_v36 = vor.u32 %v7807_v21, %v5896_v23  ;;  %v7660_v48 = vld [vmem:[#allocation5 + $0x7c] sm:$0xf]  ;;  %v7835_v21 = vld [vmem:[#allocation5 + $0x5f4] sm:$0xf] }
  0xb0   :  { %2665 = vmatpush.bf16.msra.mxu3 %v6511_v22  ;;  %v5535_v22 = vor.u32 %v7716_v12, %v5532_v13  ;;  %v5252_v12 = vld [vmem:[#allocation5 + $0x24] sm:$0xf0]  ;;  %v7961_v13 = vld [vmem:[#allocation5 + $0x9e4] sm:$0xf]  ;;  %v7699_v8 = vld [vmem:[#allocation5 + $0x1b0] sm:$0xf0] }
  0xb1   :  { %2706 = vmatpush.bf16.msra.mxu0 %v5647_v32  ;;  %v7667_v32 = vld [vmem:[#allocation5 + $0xb4] sm:$0xf]  ;;  %v6515_v26 = vor.u32 %v7961_v13, %v6512_v14  ;;  %v7933_v13 = vld [vmem:[#allocation5 + $0x904] sm:$0xf]  ;;  %v6400_v14 = vld [vmem:[#allocation5 + $0x91c] sm:$0xf0] }
  0xb2   :  { %2652 = vmatpush.bf16.msra.mxu1 %v6259_v40  ;;  %2643 = vmatmul.bf16.vlgmr.msra.gmra.mxu2 %v8560_v44  ;;  %v7800_v40 = vld [vmem:[#allocation5 + $0x4dc] sm:$0xf]  ;;  %v5339_v47 = vor.u32 %v7667_v32, %v5336_v33  ;;  %v6316_v32 = vld [vmem:[#allocation5 + $0x874] sm:$0xf0]  ;;  %v5787_v33 = vor.u32 %v7779_v19, %v5784_v20 }
  0xb3   :  { %2691 = vmatpush.bf16.msrb.mxu2 %v5451_v50  ;;  %v5476_v50 = vld [vmem:[#allocation5 + $0x1e4] sm:$0xf0]  ;;  %v5871_v54 = vor.u32 %v7800_v40, %v5868_v42  ;;  %v5980_v40 = vld [vmem:[#allocation5 + $0x5d4] sm:$0xf0] }
  0xb4   :  { %2666 = vmatpush.bf16.msra.mxu3 %v6483_v41  ;;  %v5507_v41 = vor.u32 %v7709_v29, %v5504_v31  ;;  %v6484_v29 = vld [vmem:[#allocation5 + $0x9c4] sm:$0xf0]  ;;  %v7912_v31 = vld [vmem:[#allocation5 + $0x85c] sm:$0xf] }
  0xb5   :  { %2707 = vmatpush.bf16.msra.mxu0 %v5619_v49  ;;  %v7702_v49 = vld [vmem:[#allocation5 + $0x1cc] sm:$0xf]  ;;  %v6319_v42 = vor.u32 %v7912_v31, %v6316_v32  ;;  %v7884_v32 = vld [vmem:[#allocation5 + $0x77c] sm:$0xf] }
  0xb6   :  { %2653 = vmatpush.bf16.msra.mxu1 %v6231_v55  ;;  %v6095_v55 = vor.u32 %v7856_v45, %v6092_v46  ;;  %v5479_v57 = vor.u32 %v7702_v49, %v5476_v50  ;;  %v7905_v45 = vld [vmem:[#allocation5 + $0x824] sm:$0xf]  ;;  %v7947_v46 = vld [vmem:[#allocation5 + $0x974] sm:$0xf] }
  0xb7   :  { %2692 = vmatpush.bf16.msrb.mxu2 %v5423_v62  ;;  %v7653_v62 = vld [vmem:[#allocation5 + $0x44] sm:$0xf] }
  0xb8   :  { %2667 = vmatpush.bf16.msra.mxu3 %v6455_v56  ;;  %6614 = vmatmul.msk.bf16.vlgmr.msrb.gmra.mxu0 %vm2393_vm0, %v8569_v24  ;;  %v7793_v56 = vld [vmem:[#allocation5 + $0x4a4] sm:$0xf] }
  0xb9   :  { %2708 = vmatpush.bf16.msra.mxu0 %v5591_v61  ;;  %v5311_v61 = vor.u32 %v7660_v48, %v5308_v51  ;;  %v6288_v48 = vld [vmem:[#allocation5 + $0x83c] sm:$0xf0]  ;;  %v8596_v51 = vld [vmem:[#allocation7] sm:$0xff] }
  0xba   :  { %2654 = vmatpush.bf16.msra.mxu1 %v6203_v3  ;;  %v5843_v3 = vor.u32 %v7793_v56, %v5840_v58  ;;  %v7898_v56 = vld [vmem:[#allocation5 + $0x7ec] sm:$0xf]  ;;  %v6291_v58 = vor.u32 %v7905_v45, %v6288_v48 }
  0xbb   :  { %2693 = vmatpush.bf16.msrb.mxu2 %v5395_v10  ;;  %v7646_v10 = vld [vmem:[#allocation5 + $0xc] sm:$0xf] }
  0xbc   :  { %2668 = vmatpush.bf16.msra.mxu3 %v6427_v4  ;;  %v6067_v4 = vor.u32 %v7849_v59, %v6064_v60  ;;  %v5255_v23 = vor.u32 %v7646_v10, %v5252_v12  ;;  %v8844_v59 = vperm.slane %v8596_v51, 0  ;;  %v7940_v60 = vld [vmem:[#allocation5 + $0x93c] sm:$0xf]  ;;  %v6596_v10 = vld [vmem:[#allocation5 + $0xaa4] sm:$0xf0] }
  0xbd   :  { %2709 = vmatpush.bf16.msra.mxu0 %v5563_v9  ;;  %v5283_v9 = vor.u32 %v7653_v62, %v5280_v0  ;;  %v6260_v62 = vld [vmem:[#allocation5 + $0x804] sm:$0xf0] }
  0xbe   :  { %2655 = vmatpush.bf16.msra.mxu1 %v6175_v15  ;;  %v7919_v15 = vld [vmem:[#allocation5 + $0x894] sm:$0xf] }
  0xbf   :  { %2694 = vmatpush.bf16.msrb.mxu2 %v5367_v28  ;;  %v7954_v28 = vld [vmem:[#allocation5 + $0x9ac] sm:$0xf] }
  0xc0   :  { %2669 = vmatpush.bf16.msra.mxu3 %v6399_v16  ;;  %v6344_v16 = vld [vmem:[#allocation5 + $0x8ac] sm:$0xf0] }
  0xc1   :  { %2710 = vmatpush.bf16.msra.mxu0 %v5535_v22  ;;  %v6008_v22 = vld [vmem:[#allocation5 + $0x60c] sm:$0xf0]  ;;  %v6347_v27 = vor.u32 %v7919_v15, %v6344_v16  ;;  %v7891_v15 = vld [vmem:[#allocation5 + $0x7b4] sm:$0xf] }
  0xc2   :  { %2656 = vmatpush.bf16.msra.mxu1 %v6147_v34  ;;  %v6011_v34 = vor.u32 %v7835_v21, %v6008_v22  ;;  %v6232_v16 = vld [vmem:[#allocation5 + $0x7cc] sm:$0xf0]  ;;  %v5455_v21 = vor.u32 %v7699_v8, %v5454_v5  ;;  %v6148_v5 = vld [vmem:[#allocation5 + $0x724] sm:$0xf0] }
  0xc3   :  { %2695 = vmatpush.bf16.msrb.mxu2 %v5339_v47  ;;  %v6456_v47 = vld [vmem:[#allocation5 + $0x98c] sm:$0xf0]  ;;  %v6235_v31 = vor.u32 %v7891_v15, %v6232_v16  ;;  %v5342_v15 = vld [vmem:[#allocation5 + $0xb8] sm:$0xf]  ;;  %v7671_v16 = vld [vmem:[#allocation5 + $0xd0] sm:$0xf0] }
  0xc4   :  { %2670 = vmatpush.bf16.msra.mxu3 %v6371_v35  ;;  %v7772_v35 = vld [vmem:[#allocation5 + $0x3fc] sm:$0xf] }
  0xc5   :  { %2711 = vmatpush.bf16.msra.mxu0 %v5507_v41  ;;  %2657 = vmatmul.bf16.vlgmr.msra.gmra.mxu1 %v8571_v25  ;;  %v6487_v41 = vor.u32 %v7954_v28, %v6484_v29  ;;  %v5426_v28 = vld [vmem:[#allocation5 + $0x160] sm:$0xf]  ;;  %v7692_v29 = vld [vmem:[#allocation5 + $0x178] sm:$0xf0] }
  0xc6   :  { %2719 = vmatpush.bf16.msrb.mxu1 %v5899_v36  ;;  %v5756_v36 = vld [vmem:[#allocation5 + $0x414] sm:$0xf0]  ;;  %v5427_v45 = vor.u32 %v7692_v29, %v5426_v28  ;;  %v5343_v28 = vor.u32 %v7671_v16, %v5342_v15  ;;  %v5482_v16 = vld [vmem:[#allocation5 + $0x1d0] sm:$0xf] }
  0xc7   :  { %2671 = vmatmul.bf16.vlgmr.msra.gmra.mxu3 %v8574_v30  ;;  %2696 = vmatpush.bf16.msrb.mxu2 %v5311_v61  ;;  %v5759_v49 = vor.u32 %v7772_v35, %v5756_v36  ;;  %v6428_v61 = vld [vmem:[#allocation5 + $0x954] sm:$0xf0] }
  0xc8   :  { %2733 = vmatpush.bf16.msrb.mxu3 %v6123_v37  ;;  %v7828_v37 = vld [vmem:[#allocation5 + $0x5bc] sm:$0xf]  ;;  %v6431_v7 = vor.u32 %v7940_v60, %v6428_v61  ;;  %v6204_v35 = vld [vmem:[#allocation5 + $0x794] sm:$0xf0]  ;;  %v6098_v60 = vld [vmem:[#allocation5 + $0x6a0] sm:$0xf] }
  0xc9   :  { %2712 = vmatpush.bf16.msra.mxu0 %v5479_v57  ;;  %v5983_v50 = vor.u32 %v7828_v37, %v5980_v40  ;;  %v6459_v57 = vor.u32 %v7947_v46, %v6456_v47  ;;  %v6126_v40 = vld [vmem:[#allocation5 + $0x6d8] sm:$0xf]  ;;  %v5650_v46 = vld [vmem:[#allocation5 + $0x320] sm:$0xf]  ;;  %v7748_v47 = vld [vmem:[#allocation5 + $0x338] sm:$0xf0] }
  0xca   :  { %2720 = vmatpush.bf16.msrb.mxu1 %v5871_v54  ;;  %v7821_v54 = vld [vmem:[#allocation5 + $0x584] sm:$0xf]  ;;  %v7860_v61 = vld [vmem:[#allocation5 + $0x6b8] sm:$0xf0]  ;;  %v5566_v29 = vld [vmem:[#allocation5 + $0x278] sm:$0xf] }
  0xcb   :  { %2697 = vmatpush.bf16.msrb.mxu2 %v5283_v9  ;;  %v7982_v9 = vld [vmem:[#allocation5 + $0xa8c] sm:$0xf] }
  0xcc   :  { %2734 = vmatpush.bf16.msrb.mxu3 %v6095_v55  ;;  %2713 = vmatmul.bf16.vlgmr.msra.gmra.mxu0 %v8558_v43  ;;  %v5952_v55 = vld [vmem:[#allocation5 + $0x59c] sm:$0xf0]  ;;  %v6599_v22 = vor.u32 %v7982_v9, %v6596_v10  ;;  %v6070_v9 = vld [vmem:[#allocation5 + $0x668] sm:$0xf]  ;;  %v7853_v10 = vld [vmem:[#allocation5 + $0x680] sm:$0xf0] }
  0xcd   :  { %2761 = vmatpush.bf16.msrb.mxu0 %v6571_v63  ;;  %v5731_v63 = vor.u32 %v7765_v52, %v5728_v53  ;;  %v5955_v0 = vor.u32 %v7821_v54, %v5952_v55  ;;  %v6207_v52 = vor.u32 %v7884_v32, %v6204_v35  ;;  %v7877_v53 = vld [vmem:[#allocation5 + $0x744] sm:$0xf]  ;;  %v5314_v32 = vld [vmem:[#allocation5 + $0x80] sm:$0xf] }
  0xce   :  { %2721 = vmatpush.bf16.msrb.mxu1 %v5843_v3  ;;  %v7814_v3 = vld [vmem:[#allocation5 + $0x54c] sm:$0xf] }
  0xcf   :  { %2698 = vmatpush.bf16.msrb.mxu2 %v5255_v23  ;;  %v5678_v23 = vld [vmem:[#allocation5 + $0x358] sm:$0xf] }
  0xd0   :  { %2735 = vmatpush.bf16.msrb.mxu3 %v6067_v4  ;;  %v5924_v4 = vld [vmem:[#allocation5 + $0x564] sm:$0xf0]  ;;  %v2406_v6 = vpop.f32.mrf.mxu0 }
  0xd1   :  { %2762 = vmatpush.bf16.msrb.mxu0 %v6543_v11  ;;  %v6263_v11 = vor.u32 %v7898_v56, %v6260_v62  ;;  %v2407_v12 = vadd.f32 %v2406_v6, %v8844_v59  ;;  %v5927_v19 = vor.u32 %v7814_v3, %v5924_v4  ;;  %v6176_v56 = vld [vmem:[#allocation5 + $0x75c] sm:$0xf0]  ;;  %v7870_v4 = vld [vmem:[#allocation5 + $0x70c] sm:$0xf]  ;;  %v6099_v6 = vor.u32 %v7860_v61, %v6098_v60  ;;  %v7832_v60 = vld [vmem:[#allocation5 + $0x5d8] sm:$0xf0] }
  0xd2   :  { %2722 = vmatpush.bf16.msrb.mxu1 %v5815_v17  ;;  %2699 = vmatmul.bf16.vlgmr.msrb.gmra.mxu2 %v8556_v39  ;;  %v2420_v17 = vpop.f32.mrf.mxu1  ;;  %v6179_v3 = vor.u32 %v7877_v53, %v6176_v56  ;;  %v7790_v61 = vld [vmem:[#allocation5 + $0x488] sm:$0xf0]  ;;  %v6330_v59 = vld [vmem:[#allocation5 + $0x868] sm:$0xf] }
  0xd3   :  { %2747 = vmatpush.bf16.msra.mxu2 %v6347_v27  ;;  %v2421_v20 = vadd.f32 %v2420_v17, %v2407_v12  ;;  %v6403_v27 = vor.u32 %v7933_v13, %v6400_v14  ;;  %v5594_v13 = vld [vmem:[#allocation5 + $0x2b0] sm:$0xf]  ;;  %v7734_v14 = vld [vmem:[#allocation5 + $0x2c8] sm:$0xf0]  ;;  %v6151_v17 = vor.u32 %v7870_v4, %v6148_v5  ;;  %v6350_v5 = vld [vmem:[#allocation5 + $0x898] sm:$0xf] }
  0xd4   :  { %2736 = vmatpush.bf16.msrb.mxu3 %v6039_v18  ;;  %v5703_v18 = vor.u32 %v7758_v1, %v5700_v2  ;;  %v5370_v1 = vld [vmem:[#allocation5 + $0xf0] sm:$0xf]  ;;  %v7678_v2 = vld [vmem:[#allocation5 + $0x108] sm:$0xf0] }
  0xd5   :  { %2763 = vmatpush.bf16.msrb.mxu0 %v6515_v26  ;;  %v7755_v26 = vld [vmem:[#allocation5 + $0x370] sm:$0xf0]  ;;  %v2434_v36 = vpop.f32.mrf.mxu2  ;;  %v5371_v12 = vor.u32 %v7678_v2, %v5370_v1  ;;  %v5258_v1 = vld [vmem:[#allocation5 + $0x10] sm:$0xf]  ;;  %v7650_v2 = vld [vmem:[#allocation5 + $0x28] sm:$0xf0] }
  0xd6   :  { %2723 = vmatpush.bf16.msrb.mxu1 %v5787_v33  ;;  %v7926_v33 = vld [vmem:[#allocation5 + $0x8cc] sm:$0xf]  ;;  %v5679_v37 = vor.u32 %v7755_v26, %v5678_v23  ;;  %v5259_v15 = vor.u32 %v7650_v2, %v5258_v1 }
  0xd7   :  { %2748 = vmatpush.bf16.msra.mxu2 %v6319_v42  ;;  %v2435_v42 = vadd.f32 %v2434_v36, %v2421_v20  ;;  %v5874_v20 = vld [vmem:[#allocation5 + $0x4e0] sm:$0xf]  ;;  %v7846_v23 = vld [vmem:[#allocation5 + $0x648] sm:$0xf0] }
  0xd8   :  { %2737 = vmatpush.bf16.msrb.mxu3 %v6011_v34  ;;  %v6372_v34 = vld [vmem:[#allocation5 + $0x8e4] sm:$0xf0]  ;;  %v2448_v54 = vpop.f32.mrf.mxu3  ;;  %v8607_v26 = vpop.f32.mrf.mxu0  ;;  %v7902_v1 = vld [vmem:[#allocation5 + $0x808] sm:$0xf0] }
  0xd9   :  { %2764 = vmatpush.bf16.msrb.mxu0 %v6487_v41  ;;  %v7867_v41 = vld [vmem:[#allocation5 + $0x6f0] sm:$0xf0]  ;;  %v6375_v48 = vor.u32 %v7926_v33, %v6372_v34  ;;  %v7664_v33 = vld [vmem:[#allocation5 + $0x98] sm:$0xf0] }
  0xda   :  { %2724 = vmatpush.bf16.msrb.mxu1 %v5759_v49  ;;  %v5398_v49 = vld [vmem:[#allocation5 + $0x128] sm:$0xf]  ;;  %v6127_v55 = vor.u32 %v7867_v41, %v6126_v40  ;;  %v8609_v34 = vpop.f32.mrf.mxu1  ;;  %v6014_v41 = vld [vmem:[#allocation5 + $0x5f8] sm:$0xf] }
  0xdb   :  { %2749 = vmatpush.bf16.msra.mxu2 %v6291_v58  ;;  %v5651_v58 = vor.u32 %v7748_v47, %v5650_v46  ;;  %v5315_v46 = vor.u32 %v7664_v33, %v5314_v32  ;;  %v5538_v47 = vld [vmem:[#allocation5 + $0x240] sm:$0xf]  ;;  %v7818_v32 = vld [vmem:[#allocation5 + $0x568] sm:$0xf0] }
  0xdc   :  { %2738 = vmatpush.bf16.msrb.mxu3 %v5983_v50  ;;  %v7685_v50 = vld [vmem:[#allocation5 + $0x140] sm:$0xf0] }
  0xdd   :  { %2765 = vmatpush.bf16.msrb.mxu0 %v6459_v57  ;;  %v8604_v57 = vadd.f32 %v2448_v54, %v2435_v42  ;;  %v5399_v62 = vor.u32 %v7685_v50, %v5398_v49  ;;  %v7839_v42 = vld [vmem:[#allocation5 + $0x610] sm:$0xf0]  ;;  %v5286_v49 = vld [vmem:[#allocation5 + $0x48] sm:$0xf]  ;;  %v7657_v50 = vld [vmem:[#allocation5 + $0x60] sm:$0xf0] }
  0xde   :  { %2725 = vmatpush.bf16.msrb.mxu1 %v5731_v63  ;;  %v5622_v63 = vld [vmem:[#allocation5 + $0x2e8] sm:$0xf]  ;;  %v6015_v53 = vor.u32 %v7839_v42, %v6014_v41 }
  0xdf   :  { %2750 = vmatpush.bf16.msra.mxu2 %v6263_v11  ;;  %v7811_v11 = vld [vmem:[#allocation5 + $0x530] sm:$0xf0] }
  0xe0   :  { %2739 = vmatpush.bf16.msrb.mxu3 %v5955_v0  ;;  %v7741_v0 = vld [vmem:[#allocation5 + $0x300] sm:$0xf0] }
  0xe1   :  { %2766 = vmatpush.bf16.msrb.mxu0 %v6431_v7  ;;  %v5902_v7 = vld [vmem:[#allocation5 + $0x518] sm:$0xf]  ;;  %v5623_v8 = vor.u32 %v7741_v0, %v5622_v63  ;;  %v5510_v63 = vld [vmem:[#allocation5 + $0x208] sm:$0xf]  ;;  %v7713_v0 = vld [vmem:[#allocation5 + $0x220] sm:$0xf0] }
  0xe2   :  { %2726 = vmatpush.bf16.msrb.mxu1 %v5703_v18  ;;  %v6071_v18 = vor.u32 %v7853_v10, %v6070_v9  ;;  %v5790_v9 = vld [vmem:[#allocation5 + $0x438] sm:$0xf]  ;;  %v5511_v10 = vor.u32 %v7713_v0, %v5510_v63  ;;  %v7965_v63 = vld [vmem:[#allocation5 + $0xa00] sm:$0xf0]  ;;  %v6266_v0 = vld [vmem:[#allocation5 + $0x7f0] sm:$0xf] }
  0xe3   :  { %2751 = vmatpush.bf16.msra.mxu2 %v6235_v31  ;;  %v7727_v31 = vld [vmem:[#allocation5 + $0x290] sm:$0xf0] }
  0xe4   :  { %2740 = vmatpush.bf16.msrb.mxu3 %v5927_v19  ;;  %v5903_v19 = vor.u32 %v7811_v11, %v5902_v7  ;;  %v5567_v40 = vor.u32 %v7727_v31, %v5566_v29  ;;  %v5958_v11 = vld [vmem:[#allocation5 + $0x588] sm:$0xf]  ;;  %v5930_v31 = vld [vmem:[#allocation5 + $0x550] sm:$0xf] }
  0xe5   :  { %2767 = vmatpush.bf16.msrb.mxu0 %v6403_v27  ;;  %2727 = vmatmul.bf16.vlgmr.msrb.gmra.mxu1 %v8554_v38  ;;  %v7804_v27 = vld [vmem:[#allocation5 + $0x4f8] sm:$0xf0] }
  0xe6   :  { %2782 = vmatpush.bf16.msra.mxu1 %v6599_v22  ;;  %v6042_v22 = vld [vmem:[#allocation5 + $0x630] sm:$0xf]  ;;  %v5875_v36 = vor.u32 %v7804_v27, %v5874_v20  ;;  %v6574_v20 = vld [vmem:[#allocation5 + $0xa58] sm:$0xf] }
  0xe7   :  { %2741 = vmatmul.bf16.vlgmr.msrb.gmra.mxu3 %v8560_v44  ;;  %2752 = vmatpush.bf16.msra.mxu2 %v6207_v52  ;;  %v6043_v35 = vor.u32 %v7846_v23, %v6042_v22  ;;  %v8612_v52 = vpop.f32.mrf.mxu2  ;;  %v7916_v23 = vld [vmem:[#allocation5 + $0x878] sm:$0xf0] }
  0xe8   :  { %2789 = vmatpush.bf16.msra.mxu3 %v5455_v21  ;;  %v5595_v21 = vor.u32 %v7734_v14, %v5594_v13  ;;  %v7783_v14 = vld [vmem:[#allocation5 + $0x450] sm:$0xf0] }
  0xe9   :  { %2768 = vmatpush.bf16.msrb.mxu0 %v6375_v48  ;;  %v7720_v48 = vld [vmem:[#allocation5 + $0x258] sm:$0xf0]  ;;  %v5791_v27 = vor.u32 %v7783_v14, %v5790_v9  ;;  %v5400_v9 = vld [vmem:[#allocation5 + $0x144] sm:$0xf0]  ;;  %v6238_v14 = vld [vmem:[#allocation5 + $0x7b8] sm:$0xf] }
  0xea   :  { %2803 = vmatpush.bf16.msrb.mxu1 %v5679_v37  ;;  %v5846_v37 = vld [vmem:[#allocation5 + $0x4a8] sm:$0xf]  ;;  %v5539_v56 = vor.u32 %v7720_v48, %v5538_v47  ;;  %v5931_v47 = vor.u32 %v7818_v32, %v5930_v31  ;;  %v7888_v31 = vld [vmem:[#allocation5 + $0x798] sm:$0xf0] }
  0xeb   :  { %2753 = vmatpush.bf16.msra.mxu2 %v6179_v3  ;;  %v2462_v3 = vpop.f32.mrf.mxu0  ;;  %v6294_v48 = vld [vmem:[#allocation5 + $0x828] sm:$0xf] }
  0xec   :  { %2790 = vmatpush.bf16.msra.mxu3 %v5427_v45  ;;  %2769 = vmatmul.bf16.vlgmr.msrb.gmra.mxu0 %v8574_v30  ;;  %v7797_v45 = vld [vmem:[#allocation5 + $0x4c0] sm:$0xf0]  ;;  %v2463_v7 = vadd.f32 %v2462_v3, %v8604_v57  ;;  %v2476_v13 = vpop.f32.mrf.mxu1  ;;  %v6322_v57 = vld [vmem:[#allocation5 + $0x860] sm:$0xf]  ;;  %v5706_v3 = vld [vmem:[#allocation5 + $0x390] sm:$0xf] }
  0xed   :  { %2831 = vmatpush.bf16.msra.mxu0 %v6127_v55  ;;  %v5847_v54 = vor.u32 %v7797_v45, %v5846_v37  ;;  %v5818_v55 = vld [vmem:[#allocation5 + $0x470] sm:$0xf]  ;;  %v7696_v37 = vld [vmem:[#allocation5 + $0x19c] sm:$0xf]  ;;  %v6323_v42 = vor.u32 %v7916_v23, %v6322_v57  ;;  %v6546_v45 = vld [vmem:[#allocation5 + $0xa20] sm:$0xf] }
  0xee   :  { %2804 = vmatpush.bf16.msrb.mxu1 %v5651_v58  ;;  %v5986_v58 = vld [vmem:[#allocation5 + $0x5c0] sm:$0xf]  ;;  %v5372_v57 = vld [vmem:[#allocation5 + $0x10c] sm:$0xf0] }
  0xef   :  { %2754 = vmatpush.bf16.msra.mxu2 %v6151_v17  ;;  %v5987_v4 = vor.u32 %v7832_v60, %v5986_v58  ;;  %v7706_v17 = vld [vmem:[#allocation5 + $0x1e8] sm:$0xf0]  ;;  %v7689_v58 = vld [vmem:[#allocation5 + $0x164] sm:$0xf]  ;;  %v5428_v60 = vld [vmem:[#allocation5 + $0x17c] sm:$0xf0] }
  0xf0   :  { %2791 = vmatpush.bf16.msra.mxu3 %v5399_v62  ;;  %v5287_v62 = vor.u32 %v7657_v50, %v5286_v49  ;;  %v5483_v29 = vor.u32 %v7706_v17, %v5482_v16  ;;  %v2490_v33 = vpop.f32.mrf.mxu2  ;;  %v7909_v49 = vld [vmem:[#allocation5 + $0x840] sm:$0xf0]  ;;  %v7752_v17 = vld [vmem:[#allocation5 + $0x35c] sm:$0xf] }
  0xf1   :  { %2832 = vmatpush.bf16.msra.mxu0 %v6099_v6  ;;  %v7923_v6 = vld [vmem:[#allocation5 + $0x8b0] sm:$0xf0] }
  0xf2   :  { %2805 = vmatpush.bf16.msrb.mxu1 %v5623_v8  ;;  %2755 = vmatmul.bf16.vlgmr.msra.gmra.mxu2 %v8571_v25  ;;  %v5819_v8 = vor.u32 %v7790_v61, %v5818_v55  ;;  %v7769_v55 = vld [vmem:[#allocation5 + $0x3e0] sm:$0xf0]  ;;  %v6295_v61 = vor.u32 %v7909_v49, %v6294_v48  ;;  %v6182_v48 = vld [vmem:[#allocation5 + $0x748] sm:$0xf] }
  0xf3   :  { %2817 = vmatpush.bf16.msrb.mxu2 %v5903_v19  ;;  %v6351_v19 = vor.u32 %v7923_v6, %v6350_v5  ;;  %v5431_v5 = vor.u32 %v7689_v58, %v5428_v60  ;;  %v6602_v6 = vld [vmem:[#allocation5 + $0xa90] sm:$0xf]  ;;  %v7881_v49 = vld [vmem:[#allocation5 + $0x760] sm:$0xf0]  ;;  %v5316_v60 = vld [vmem:[#allocation5 + $0x9c] sm:$0xf0] }
  0xf4   :  { %2792 = vmatpush.bf16.msra.mxu3 %v5371_v12  ;;  %v7825_v12 = vld [vmem:[#allocation5 + $0x5a0] sm:$0xf0] }
  0xf5   :  { %2833 = vmatpush.bf16.msra.mxu0 %v6071_v18  ;;  %6615 = vmatmul.msk.bf16.vlgmr.msra.gmra.mxu1 %vm2393_vm0, %v8569_v24  ;;  %v2477_v18 = vadd.f32 %v2476_v13, %v2463_v7  ;;  %v5959_v22 = vor.u32 %v7825_v12, %v5958_v11  ;;  %v6267_v11 = vor.u32 %v7902_v1, %v6266_v0  ;;  %v6490_v12 = vld [vmem:[#allocation5 + $0x9b0] sm:$0xf]  ;;  %v7958_v13 = vld [vmem:[#allocation5 + $0x9c8] sm:$0xf0]  ;;  %v7661_v58 = vld [vmem:[#allocation5 + $0x84] sm:$0xf] }
  0xf6   :  { %2806 = vmatpush.bf16.msrb.mxu1 %v5595_v21  ;;  %v7979_v21 = vld [vmem:[#allocation5 + $0xa70] sm:$0xf0]  ;;  %v6154_v0 = vld [vmem:[#allocation5 + $0x710] sm:$0xf]  ;;  %v7874_v1 = vld [vmem:[#allocation5 + $0x728] sm:$0xf0] }
  0xf7   :  { %2818 = vmatpush.bf16.msrb.mxu2 %v5875_v36  ;;  %v6575_v36 = vor.u32 %v7979_v21, %v6574_v20  ;;  %v8617_v41 = vadd.f32 %v2490_v33, %v2477_v18  ;;  %v5680_v20 = vld [vmem:[#allocation5 + $0x374] sm:$0xf0]  ;;  %v6491_v21 = vor.u32 %v7958_v13, %v6490_v12  ;;  %v7745_v33 = vld [vmem:[#allocation5 + $0x324] sm:$0xf]  ;;  %v6155_v12 = vor.u32 %v7874_v1, %v6154_v0  ;;  %v6378_v13 = vld [vmem:[#allocation5 + $0x8d0] sm:$0xf] }
  0xf8   :  { %2793 = vmatpush.bf16.msra.mxu3 %v5343_v28  ;;  %v5762_v28 = vld [vmem:[#allocation5 + $0x400] sm:$0xf]  ;;  %v5683_v32 = vor.u32 %v7752_v17, %v5680_v20  ;;  %v6128_v17 = vld [vmem:[#allocation5 + $0x6f4] sm:$0xf0]  ;;  %v5512_v0 = vld [vmem:[#allocation5 + $0x224] sm:$0xf0] }
  0xf9   :  { %2834 = vmatpush.bf16.msra.mxu0 %v6043_v35  ;;  %v7776_v35 = vld [vmem:[#allocation5 + $0x418] sm:$0xf0]  ;;  %8845 = vst [vmem:[#allocation20_spill] sm:$0xff] %v8617_v41  ;;  %v6554_v41 = vld [vmem:[#allocation5 + $0xa28] sm:$0xf] }
  0xfa   :  { %2807 = vmatpush.bf16.msrb.mxu1 %v5567_v40  ;;  %v5456_v40 = vld [vmem:[#allocation5 + $0x1b4] sm:$0xf0]  ;;  %v5763_v50 = vor.u32 %v7776_v35, %v5762_v28  ;;  %v7951_v28 = vld [vmem:[#allocation5 + $0x990] sm:$0xf0] }
  0xfb   :  { %2819 = vmatpush.bf16.msrb.mxu2 %v5847_v54  ;;  %v5459_v54 = vor.u32 %v7696_v37, %v5456_v40  ;;  %v7668_v40 = vld [vmem:[#allocation5 + $0xbc] sm:$0xf] }
  0xfc   :  { %2794 = vmatpush.bf16.msra.mxu3 %v5315_v46  ;;  %v7972_v46 = vld [vmem:[#allocation5 + $0xa38] sm:$0xf0] }
  0xfd   :  { %2835 = vmatpush.bf16.msra.mxu0 %v6015_v53  ;;  %v5734_v53 = vld [vmem:[#allocation5 + $0x3c8] sm:$0xf] }
  0xfe   :  { %2808 = vmatpush.bf16.msrb.mxu1 %v5539_v56  ;;  %v6547_v56 = vor.u32 %v7972_v46, %v6546_v45  ;;  %v5735_v2 = vor.u32 %v7769_v55, %v5734_v53  ;;  %v6434_v46 = vld [vmem:[#allocation5 + $0x940] sm:$0xf]  ;;  %v7738_v53 = vld [vmem:[#allocation5 + $0x2ec] sm:$0xf]  ;;  %v5624_v55 = vld [vmem:[#allocation5 + $0x304] sm:$0xf0] }
  0xff   :  { %2820 = vmatpush.bf16.msrb.mxu2 %v5819_v8  ;;  %v7682_v8 = vld [vmem:[#allocation5 + $0x12c] sm:$0xf] }
 0x100   :  { %2795 = vmatpush.bf16.msra.mxu3 %v5287_v62  ;;  %v6518_v62 = vld [vmem:[#allocation5 + $0x9e8] sm:$0xf]  ;;  %v5403_v18 = vor.u32 %v7682_v8, %v5400_v9  ;;  %v5596_v8 = vld [vmem:[#allocation5 + $0x2cc] sm:$0xf0] }
 0x101   :  { %2836 = vmatpush.bf16.msra.mxu0 %v5987_v4  ;;  %v7762_v4 = vld [vmem:[#allocation5 + $0x3a8] sm:$0xf0]  ;;  %v6519_v7 = vor.u32 %v7965_v63, %v6518_v62  ;;  %v6406_v62 = vld [vmem:[#allocation5 + $0x908] sm:$0xf]  ;;  %v7937_v63 = vld [vmem:[#allocation5 + $0x920] sm:$0xf0] }
 0x102   :  { %2809 = vmatpush.bf16.msrb.mxu1 %v5511_v10  ;;  %v7986_v10 = vld [vmem:[#allocation5 + $0xaa8] sm:$0xf0]  ;;  %v5707_v16 = vor.u32 %v7762_v4, %v5706_v3  ;;  %v5627_v3 = vor.u32 %v7738_v53, %v5624_v55  ;;  %v7731_v4 = vld [vmem:[#allocation5 + $0x2b4] sm:$0xf]  ;;  %v6407_v9 = vor.u32 %v7937_v63, %v6406_v62  ;;  %v7913_v53 = vld [vmem:[#allocation5 + $0x864] sm:$0xf] }
 0x103   :  { %2821 = vmatpush.bf16.msrb.mxu2 %v5791_v27  ;;  %v6462_v27 = vld [vmem:[#allocation5 + $0x978] sm:$0xf]  ;;  %v5820_v62 = vld [vmem:[#allocation5 + $0x48c] sm:$0xf0]  ;;  %v7710_v63 = vld [vmem:[#allocation5 + $0x20c] sm:$0xf] }
 0x104   :  { %2796 = vmatpush.bf16.msra.mxu3 %v5259_v15  ;;  %v7895_v15 = vld [vmem:[#allocation5 + $0x7d0] sm:$0xf0]  ;;  %v6463_v37 = vor.u32 %v7951_v28, %v6462_v27  ;;  %v5260_v28 = vld [vmem:[#allocation5 + $0x2c] sm:$0xf0] }
 0x105   :  { %2837 = vmatpush.bf16.msra.mxu0 %v5959_v22  ;;  %v7675_v22 = vld [vmem:[#allocation5 + $0xf4] sm:$0xf]  ;;  %v6239_v23 = vor.u32 %v7895_v15, %v6238_v14  ;;  %v7930_v14 = vld [vmem:[#allocation5 + $0x8e8] sm:$0xf0] }
 0x106   :  { %2810 = vmatpush.bf16.msrb.mxu1 %v5483_v29  ;;  %v6210_v29 = vld [vmem:[#allocation5 + $0x780] sm:$0xf]  ;;  %v5375_v35 = vor.u32 %v7675_v22, %v5372_v57  ;;  %v5568_v57 = vld [vmem:[#allocation5 + $0x294] sm:$0xf0]  ;;  %v7647_v27 = vld [vmem:[#allocation5 + $0x14] sm:$0xf] }
 0x107   :  { %2797 = vmatmul.bf16.vlgmr.msra.gmra.mxu3 %v8556_v39  ;;  %2822 = vmatpush.bf16.msrb.mxu2 %v5763_v50  ;;  %v6211_v45 = vor.u32 %v7888_v31, %v6210_v29  ;;  %v5876_v22 = vld [vmem:[#allocation5 + $0x4fc] sm:$0xf0]  ;;  %v7920_v31 = vld [vmem:[#allocation5 + $0x89c] sm:$0xf] }
 0x108   :  { %2845 = vmatpush.bf16.msrb.mxu3 %v6351_v19  ;;  %v6603_v19 = vor.u32 %v7986_v10, %v6602_v6  ;;  %v7808_v6 = vld [vmem:[#allocation5 + $0x51c] sm:$0xf]  ;;  %v7654_v10 = vld [vmem:[#allocation5 + $0x4c] sm:$0xf] }
 0x109   :  { %2838 = vmatpush.bf16.msra.mxu0 %v5931_v47  ;;  %2811 = vmatmul.bf16.vlgmr.msrb.gmra.mxu1 %v8558_v43  ;;  %v7944_v47 = vld [vmem:[#allocation5 + $0x958] sm:$0xf0] }
 0x10a   :  { %2859 = vmatpush.bf16.msra.mxu1 %v6575_v36  ;;  %v5652_v36 = vld [vmem:[#allocation5 + $0x33c] sm:$0xf0] }
 0x10b   :  { %2823 = vmatpush.bf16.msrb.mxu2 %v5735_v2  ;;  %v5655_v50 = vor.u32 %v7745_v33, %v5652_v36  ;;  %v8623_v2 = vpop.f32.mrf.mxu0  ;;  %v6100_v36 = vld [vmem:[#allocation5 + $0x6bc] sm:$0xf0] }
 0x10c   :  { %2846 = vmatpush.bf16.msrb.mxu3 %v6323_v42  ;;  %2839 = vmatmul.bf16.vlgmr.msra.gmra.mxu0 %v8560_v44  ;;  %v5344_v42 = vld [vmem:[#allocation5 + $0xd4] sm:$0xf0] }
 0x10d   :  { %2887 = vmatpush.bf16.msrb.mxu0 %v5459_v54  ;;  %v5347_v54 = vor.u32 %v7668_v40, %v5344_v42  ;;  %v5263_v42 = vor.u32 %v7647_v27, %v5260_v28  ;;  %v7836_v27 = vld [vmem:[#allocation5 + $0x5fc] sm:$0xf]  ;;  %v6016_v28 = vld [vmem:[#allocation5 + $0x614] sm:$0xf0] }
 0x10e   :  { %2860 = vmatpush.bf16.msra.mxu1 %v6547_v56  ;;  %v6435_v56 = vor.u32 %v7944_v47, %v6434_v46  ;;  %v5848_v46 = vld [vmem:[#allocation5 + $0x4c4] sm:$0xf0]  ;;  %v7717_v47 = vld [vmem:[#allocation5 + $0x244] sm:$0xf] }
 0x10f   :  { %2824 = vmatpush.bf16.msrb.mxu2 %v5707_v16  ;;  %v7864_v16 = vld [vmem:[#allocation5 + $0x6dc] sm:$0xf] }
 0x110   :  { %2847 = vmatpush.bf16.msrb.mxu3 %v6295_v61  ;;  %v6183_v61 = vor.u32 %v7881_v49, %v6182_v48  ;;  %v6131_v29 = vor.u32 %v7864_v16, %v6128_v17  ;;  %v5540_v48 = vld [vmem:[#allocation5 + $0x25c] sm:$0xf0]  ;;  %v7976_v16 = vld [vmem:[#allocation5 + $0xa5c] sm:$0xf] }
 0x111   :  { %2888 = vmatpush.bf16.msrb.mxu0 %v5431_v5  ;;  %v5319_v5 = vor.u32 %v7661_v58, %v5316_v60  ;;  %v6072_v58 = vld [vmem:[#allocation5 + $0x684] sm:$0xf0]  ;;  %v5543_v60 = vor.u32 %v7717_v47, %v5540_v48  ;;  %v6240_v47 = vld [vmem:[#allocation5 + $0x7d4] sm:$0xf0] }
 0x112   :  { %2861 = vmatpush.bf16.msra.mxu1 %v6519_v7  ;;  %2825 = vmatmul.bf16.vlgmr.msrb.gmra.mxu2 %v8554_v38  ;;  %v5904_v7 = vld [vmem:[#allocation5 + $0x534] sm:$0xf0] }
 0x113   :  { %2880 = vmatpush.bf16.msra.mxu2 %v6603_v19  ;;  %v5907_v15 = vor.u32 %v7808_v6, %v5904_v7  ;;  %v7724_v19 = vld [vmem:[#allocation5 + $0x27c] sm:$0xf]  ;;  %v6296_v6 = vld [vmem:[#allocation5 + $0x844] sm:$0xf0] }
 0x114   :  { %2848 = vmatpush.bf16.msrb.mxu3 %v6267_v11  ;;  %v5288_v11 = vld [vmem:[#allocation5 + $0x64] sm:$0xf0]  ;;  %v5571_v40 = vor.u32 %v7724_v19, %v5568_v57  ;;  %v6268_v57 = vld [vmem:[#allocation5 + $0x80c] sm:$0xf0] }
 0x115   :  { %2889 = vmatpush.bf16.msrb.mxu0 %v5403_v18  ;;  %v5599_v18 = vor.u32 %v7731_v4, %v5596_v8  ;;  %v5291_v20 = vor.u32 %v7654_v10, %v5288_v11  ;;  %v7843_v8 = vld [vmem:[#allocation5 + $0x634] sm:$0xf]  ;;  %v8634_v10 = vpop.f32.mrf.mxu2  ;;  %v5515_v11 = vor.u32 %v7710_v63, %v5512_v0  ;;  %v7885_v0 = vld [vmem:[#allocation5 + $0x784] sm:$0xf] }
 0x116   :  { %2862 = vmatpush.bf16.msra.mxu1 %v6491_v21  ;;  %v7801_v21 = vld [vmem:[#allocation5 + $0x4e4] sm:$0xf] }
 0x117   :  { %2901 = vmatpush.bf16.msrb.mxu2 %v5683_v32  ;;  %v6352_v32 = vld [vmem:[#allocation5 + $0x8b4] sm:$0xf0]  ;;  %v5879_v33 = vor.u32 %v7801_v21, %v5876_v22  ;;  %v7899_v22 = vld [vmem:[#allocation5 + $0x7f4] sm:$0xf] }
 0x118   :  { %2849 = vmatpush.bf16.msrb.mxu3 %v6239_v23  ;;  %v6379_v23 = vor.u32 %v7930_v14, %v6378_v13  ;;  %v6355_v49 = vor.u32 %v7920_v31, %v6352_v32  ;;  %v5792_v13 = vld [vmem:[#allocation5 + $0x454] sm:$0xf0]  ;;  %v7703_v14 = vld [vmem:[#allocation5 + $0x1d4] sm:$0xf]  ;;  %v7773_v31 = vld [vmem:[#allocation5 + $0x404] sm:$0xf] }
 0x119   :  { %2890 = vmatpush.bf16.msrb.mxu0 %v5375_v35  ;;  %v7857_v35 = vld [vmem:[#allocation5 + $0x6a4] sm:$0xf]  ;;  %v5764_v32 = vld [vmem:[#allocation5 + $0x41c] sm:$0xf0] }
 0x11a   :  { %2863 = vmatpush.bf16.msra.mxu1 %v6463_v37  ;;  %v8625_v37 = vpop.f32.mrf.mxu0  ;;  %v5767_v48 = vor.u32 %v7773_v31, %v5764_v32  ;;  %v7700_v31 = vld [vmem:[#allocation5 + $0x1b8] sm:$0xf0]  ;;  %v5686_v32 = vld [vmem:[#allocation5 + $0x360] sm:$0xf] }
 0x11b   :  { %2902 = vmatpush.bf16.msrb.mxu2 %v5655_v50  ;;  %v6103_v50 = vor.u32 %v7857_v35, %v6100_v36  ;;  %v7969_v35 = vld [vmem:[#allocation5 + $0xa24] sm:$0xf]  ;;  %v6271_v36 = vor.u32 %v7899_v22, %v6268_v57  ;;  %v7815_v57 = vld [vmem:[#allocation5 + $0x554] sm:$0xf] }
 0x11c   :  { %2850 = vmatpush.bf16.msrb.mxu3 %v6211_v45  ;;  %v7794_v45 = vld [vmem:[#allocation5 + $0x4ac] sm:$0xf] }
 0x11d   :  { %2891 = vmatpush.bf16.msrb.mxu0 %v5347_v54  ;;  %v6324_v54 = vld [vmem:[#allocation5 + $0x87c] sm:$0xf0]  ;;  %v5851_v55 = vor.u32 %v7794_v45, %v5848_v46  ;;  %v6019_v45 = vor.u32 %v7836_v27, %v6016_v28  ;;  %v7892_v46 = vld [vmem:[#allocation5 + $0x7bc] sm:$0xf] }
 0x11e   :  { %2864 = vmatpush.bf16.msra.mxu1 %v6435_v56  ;;  %v7850_v56 = vld [vmem:[#allocation5 + $0x66c] sm:$0xf]  ;;  %v6327_v1 = vor.u32 %v7913_v53, %v6324_v54  ;;  %v8642_v53 = vpop.f32.mrf.mxu2  ;;  %v5462_v27 = vld [vmem:[#allocation5 + $0x1a0] sm:$0xf] }
 0x11f   :  { %2903 = vmatpush.bf16.msrb.mxu2 %v5627_v3  ;;  %v8631_v3 = vpop.f32.mrf.mxu3  ;;  %v6075_v4 = vor.u32 %v7850_v56, %v6072_v58  ;;  %v7766_v54 = vld [vmem:[#allocation5 + $0x3cc] sm:$0xf] }
 0x120   :  { %2851 = vmatpush.bf16.msrb.mxu3 %v6183_v61  ;;  %v7787_v61 = vld [vmem:[#allocation5 + $0x474] sm:$0xf]  ;;  %v7962_v58 = vld [vmem:[#allocation5 + $0x9ec] sm:$0xf] }
 0x121   :  { %2892 = vmatpush.bf16.msrb.mxu0 %v5319_v5  ;;  %v7906_v5 = vld [vmem:[#allocation5 + $0x82c] sm:$0xf]  ;;  %v5823_v7 = vor.u32 %v7787_v61, %v5820_v62  ;;  %v6520_v62 = vld [vmem:[#allocation5 + $0xa04] sm:$0xf0] }
 0x122   :  { %2865 = vmatpush.bf16.msra.mxu1 %v6407_v9  ;;  %6616 = vmatmul.msk.bf16.vlgmr.msra.gmra.mxu2 %vm2393_vm0, %v8569_v24  ;;  %v6044_v9 = vld [vmem:[#allocation5 + $0x64c] sm:$0xf0]  ;;  %v6299_v17 = vor.u32 %v7906_v5, %v6296_v6  ;;  %v8638_v19 = vpop.f32.mrf.mxu0  ;;  %v7822_v5 = vld [vmem:[#allocation5 + $0x58c] sm:$0xf]  ;;  %v5960_v6 = vld [vmem:[#allocation5 + $0x5a4] sm:$0xf0] }
 0x123   :  { %2904 = vmatpush.bf16.msrb.mxu2 %v5599_v18  ;;  %v8636_v18 = vpop.f32.mrf.mxu1  ;;  %v6047_v21 = vor.u32 %v7843_v8, %v6044_v9  ;;  %v7759_v8 = vld [vmem:[#allocation5 + $0x394] sm:$0xf]  ;;  %v5708_v9 = vld [vmem:[#allocation5 + $0x3ac] sm:$0xf0] }
 0x124   :  { %2852 = vmatpush.bf16.msrb.mxu3 %v6155_v12  ;;  %v7780_v12 = vld [vmem:[#allocation5 + $0x43c] sm:$0xf]  ;;  %v5711_v22 = vor.u32 %v7759_v8, %v5708_v9  ;;  %v6436_v8 = vld [vmem:[#allocation5 + $0x95c] sm:$0xf0] }
 0x125   :  { %2893 = vmatpush.bf16.msrb.mxu0 %v5291_v20  ;;  %v6576_v20 = vld [vmem:[#allocation5 + $0xa74] sm:$0xf0] }
 0x126   :  { %2866 = vmatpush.bf16.msra.mxu1 %v6379_v23  ;;  %v5795_v23 = vor.u32 %v7780_v12, %v5792_v13  ;;  %v7955_v12 = vld [vmem:[#allocation5 + $0x9b4] sm:$0xf] }
 0x127   :  { %2853 = vmatmul.bf16.vlgmr.msrb.gmra.mxu3 %v8571_v25  ;;  %2905 = vmatpush.bf16.msrb.mxu2 %v5571_v40  ;;  %v8640_v40 = vpop.f32.mrf.mxu3 }
 0x128   :  { %2915 = vmatpush.bf16.msra.mxu3 %v5907_v15  ;;  %v5484_v15 = vld [vmem:[#allocation5 + $0x1ec] sm:$0xf0] }
 0x129   :  { %2894 = vmatpush.bf16.msrb.mxu0 %v5263_v42  ;;  %2867 = vmatmul.bf16.vlgmr.msra.gmra.mxu1 %v8574_v30  ;;  %v6548_v42 = vld [vmem:[#allocation5 + $0xa3c] sm:$0xf0] }
 0x12a   :  { %2929 = vmatpush.bf16.msrb.mxu1 %v6131_v29  ;;  %v5487_v29 = vor.u32 %v7703_v14, %v5484_v15  ;;  %v6551_v56 = vor.u32 %v7969_v35, %v6548_v42  ;;  %v7983_v14 = vld [vmem:[#allocation5 + $0xa94] sm:$0xf]  ;;  %v6604_v15 = vld [vmem:[#allocation5 + $0xaac] sm:$0xf0] }
 0x12b   :  { %2906 = vmatpush.bf16.msrb.mxu2 %v5543_v60  ;;  %v6243_v60 = vor.u32 %v7892_v46, %v6240_v47  ;;  %v8644_v61 = vpop.f32.mrf.mxu1  ;;  %v6464_v46 = vld [vmem:[#allocation5 + $0x994] sm:$0xf0] }
 0x12c   :  { %2916 = vmatpush.bf16.msra.mxu3 %v5879_v33  ;;  %2895 = vmatmul.bf16.vlgmr.msrb.gmra.mxu0 %v8556_v39  ;;  %v6579_v33 = vor.u32 %v7976_v16, %v6576_v20  ;;  %v6492_v16 = vld [vmem:[#allocation5 + $0x9cc] sm:$0xf0]  ;;  %v7878_v20 = vld [vmem:[#allocation5 + $0x74c] sm:$0xf] }
 0x12d   :  { %2943 = vmatpush.bf16.msra.mxu0 %v6355_v49  ;;  %v7829_v49 = vld [vmem:[#allocation5 + $0x5c4] sm:$0xf]  ;;  %v6495_v35 = vor.u32 %v7955_v12, %v6492_v16  ;;  %v7686_v16 = vld [vmem:[#allocation5 + $0x148] sm:$0xf0] }
 0x12e   :  { %2930 = vmatpush.bf16.msrb.mxu1 %v6103_v50  ;;  %v5988_v50 = vld [vmem:[#allocation5 + $0x5dc] sm:$0xf0] }
 0x12f   :  { %2907 = vmatpush.bf16.msrb.mxu2 %v5515_v11  ;;  %v5991_v63 = vor.u32 %v7829_v49, %v5988_v50  ;;  %v6523_v11 = vor.u32 %v7962_v58, %v6520_v62  ;;  %v8649_v28 = vpop.f32.mrf.mxu3  ;;  %v6156_v49 = vld [vmem:[#allocation5 + $0x72c] sm:$0xf0]  ;;  %v5463_v50 = vor.u32 %v7700_v31, %v5462_v27  ;;  %v5434_v58 = vld [vmem:[#allocation5 + $0x168] sm:$0xf]  ;;  %v7693_v62 = vld [vmem:[#allocation5 + $0x180] sm:$0xf0] }
 0x130   :  { %2917 = vmatpush.bf16.msra.mxu3 %v5851_v55  ;;  %v5736_v55 = vld [vmem:[#allocation5 + $0x3e4] sm:$0xf0] }
 0x131   :  { %2944 = vmatpush.bf16.msra.mxu0 %v6327_v1  ;;  %v6212_v1 = vld [vmem:[#allocation5 + $0x79c] sm:$0xf0] }
 0x132   :  { %2931 = vmatpush.bf16.msrb.mxu1 %v6075_v4  ;;  %v5739_v4 = vor.u32 %v7766_v54, %v5736_v55  ;;  %v6215_v13 = vor.u32 %v7885_v0, %v6212_v1  ;;  %v5910_v55 = vld [vmem:[#allocation5 + $0x520] sm:$0xf]  ;;  %v7749_v0 = vld [vmem:[#allocation5 + $0x340] sm:$0xf0] }
 0x133   :  { %2908 = vmatpush.bf16.msrb.mxu2 %v5487_v29  ;;  %v6607_v29 = vor.u32 %v7983_v14, %v6604_v15  ;;  %v7805_v14 = vld [vmem:[#allocation5 + $0x500] sm:$0xf0]  ;;  %v5406_v15 = vld [vmem:[#allocation5 + $0x130] sm:$0xf] }
 0x134   :  { %2918 = vmatpush.bf16.msra.mxu3 %v5823_v7  ;;  %v8647_v7 = vpop.f32.mrf.mxu0 }
 0x135   :  { %2945 = vmatpush.bf16.msra.mxu0 %v6299_v17  ;;  %v5963_v17 = vor.u32 %v7822_v5, %v5960_v6  ;;  %v7941_v6 = vld [vmem:[#allocation5 + $0x944] sm:$0xf] }
 0x136   :  { %2932 = vmatpush.bf16.msrb.mxu1 %v6047_v21  ;;  %2909 = vmatmul.bf16.vlgmr.msrb.gmra.mxu2 %v8558_v43  ;;  %v6184_v21 = vld [vmem:[#allocation5 + $0x764] sm:$0xf0] }
 0x137   :  { %2957 = vmatpush.bf16.msra.mxu2 %v6579_v33  ;;  %v7756_v33 = vld [vmem:[#allocation5 + $0x378] sm:$0xf0]  ;;  %v6187_v42 = vor.u32 %v7878_v20, %v6184_v21  ;;  %v7742_v20 = vld [vmem:[#allocation5 + $0x308] sm:$0xf0]  ;;  %v6439_v21 = vor.u32 %v7941_v6, %v6436_v8  ;;  %v5350_v6 = vld [vmem:[#allocation5 + $0xc0] sm:$0xf] }
 0x138   :  { %2919 = vmatpush.bf16.msra.mxu3 %v5795_v23  ;;  %v5932_v23 = vld [vmem:[#allocation5 + $0x56c] sm:$0xf0]  ;;  %v5687_v54 = vor.u32 %v7756_v33, %v5686_v32  ;;  %v7798_v33 = vld [vmem:[#allocation5 + $0x4c8] sm:$0xf0]  ;;  %v7672_v8 = vld [vmem:[#allocation5 + $0xd8] sm:$0xf0] }
 0x139   :  { %2946 = vmatpush.bf16.msra.mxu0 %v6271_v36  ;;  %v7948_v36 = vld [vmem:[#allocation5 + $0x97c] sm:$0xf]  ;;  %v5935_v47 = vor.u32 %v7815_v57, %v5932_v23  ;;  %v7934_v57 = vld [vmem:[#allocation5 + $0x90c] sm:$0xf]  ;;  %v6408_v23 = vld [vmem:[#allocation5 + $0x924] sm:$0xf0] }
 0x13a   :  { %2933 = vmatpush.bf16.msrb.mxu1 %v6019_v45  ;;  %v8651_v45 = vpop.f32.mrf.mxu2  ;;  %v6467_v1 = vor.u32 %v7948_v36, %v6464_v46  ;;  %v5854_v32 = vld [vmem:[#allocation5 + $0x4b0] sm:$0xf]  ;;  %v7679_v46 = vld [vmem:[#allocation5 + $0x110] sm:$0xf0] }
 0x13b   :  { %2958 = vmatpush.bf16.msra.mxu2 %v6551_v56  ;;  %v7812_v56 = vld [vmem:[#allocation5 + $0x538] sm:$0xf0] }
 0x13c   :  { %2920 = vmatpush.bf16.msra.mxu3 %v5767_v48  ;;  %v7871_v48 = vld [vmem:[#allocation5 + $0x714] sm:$0xf]  ;;  %v8655_v5 = vpop.f32.mrf.mxu0  ;;  %v5911_v9 = vor.u32 %v7812_v56, %v5910_v55  ;;  %v6380_v55 = vld [vmem:[#allocation5 + $0x8ec] sm:$0xf0]  ;;  %v5855_v56 = vor.u32 %v7798_v33, %v5854_v32  ;;  %v7721_v32 = vld [vmem:[#allocation5 + $0x260] sm:$0xf0] }
 0x13d   :  { %2947 = vmatpush.bf16.msra.mxu0 %v6243_v60  ;;  %v8653_v60 = vpop.f32.mrf.mxu1 }
 0x13e   :  { %2934 = vmatpush.bf16.msrb.mxu1 %v5991_v63  ;;  %v5658_v63 = vld [vmem:[#allocation5 + $0x328] sm:$0xf] }
 0x13f   :  { %2959 = vmatpush.bf16.msra.mxu2 %v6523_v11  ;;  %v5435_v11 = vor.u32 %v7693_v62, %v5434_v58  ;;  %v5659_v12 = vor.u32 %v7749_v0, %v5658_v63  ;;  %v6134_v58 = vld [vmem:[#allocation5 + $0x6e0] sm:$0xf]  ;;  %v7868_v62 = vld [vmem:[#allocation5 + $0x6f8] sm:$0xf0] }
 0x140   :  { %2921 = vmatpush.bf16.msra.mxu3 %v5739_v4  ;;  %v6159_v4 = vor.u32 %v7871_v48, %v6156_v49  ;;  %v7735_v48 = vld [vmem:[#allocation5 + $0x2d0] sm:$0xf0]  ;;  %v6411_v49 = vor.u32 %v7934_v57, %v6408_v23  ;;  %v7784_v23 = vld [vmem:[#allocation5 + $0x458] sm:$0xf0] }
 0x141   :  { %2948 = vmatpush.bf16.msra.mxu0 %v6215_v13  ;;  %v5882_v13 = vld [vmem:[#allocation5 + $0x4e8] sm:$0xf] }
 0x142   :  { %2935 = vmatpush.bf16.msrb.mxu1 %v5963_v17  ;;  %v5630_v17 = vld [vmem:[#allocation5 + $0x2f0] sm:$0xf]  ;;  %v5883_v27 = vor.u32 %v7805_v14, %v5882_v13  ;;  %v8661_v36 = vpop.f32.mrf.mxu2  ;;  %v6135_v13 = vor.u32 %v7868_v62, %v6134_v58  ;;  %v6106_v14 = vld [vmem:[#allocation5 + $0x6a8] sm:$0xf]  ;;  %v7777_v62 = vld [vmem:[#allocation5 + $0x420] sm:$0xf0] }
 0x143   :  { %2960 = vmatpush.bf16.msra.mxu2 %v6495_v35  ;;  %v5631_v31 = vor.u32 %v7742_v20, %v5630_v17  ;;  %v5378_v35 = vld [vmem:[#allocation5 + $0xf8] sm:$0xf]  ;;  %v5351_v17 = vor.u32 %v7672_v8, %v5350_v6  ;;  %v5798_v20 = vld [vmem:[#allocation5 + $0x440] sm:$0xf] }
 0x144   :  { %2922 = vmatpush.bf16.msra.mxu3 %v5711_v22  ;;  %v8658_v22 = vpop.f32.mrf.mxu3  ;;  %v5379_v63 = vor.u32 %v7679_v46, %v5378_v35  ;;  %v6050_v8 = vld [vmem:[#allocation5 + $0x638] sm:$0xf] }
 0x145   :  { %2949 = vmatpush.bf16.msra.mxu0 %v6187_v42  ;;  %v8663_v42 = vpop.f32.mrf.mxu1 }
 0x146   :  { %2936 = vmatpush.bf16.msrb.mxu1 %v5935_v47  ;;  %v5602_v47 = vld [vmem:[#allocation5 + $0x2b8] sm:$0xf] }
 0x147   :  { %2923 = vmatmul.bf16.vlgmr.msra.gmra.mxu3 %v8554_v38  ;;  %2961 = vmatpush.bf16.msra.mxu2 %v6467_v1  ;;  %v5603_v0 = vor.u32 %v7735_v48, %v5602_v47  ;;  %v5826_v1 = vld [vmem:[#allocation5 + $0x478] sm:$0xf]  ;;  %v6078_v47 = vld [vmem:[#allocation5 + $0x670] sm:$0xf]  ;;  %v7854_v48 = vld [vmem:[#allocation5 + $0x688] sm:$0xf0] }
 0x148   :  { %2978 = vmatpush.bf16.msrb.mxu3 %v6607_v29  ;;  %v5407_v29 = vor.u32 %v7686_v16, %v5406_v15  ;;  %v7861_v15 = vld [vmem:[#allocation5 + $0x6c0] sm:$0xf0]  ;;  %v6079_v6 = vor.u32 %v7854_v48, %v6078_v47  ;;  %v6582_v47 = vld [vmem:[#allocation5 + $0xa60] sm:$0xf]  ;;  %v7980_v48 = vld [vmem:[#allocation5 + $0xa78] sm:$0xf0] }
 0x149   :  { %2950 = vmatpush.bf16.msra.mxu0 %v6159_v4  ;;  %2937 = vmatmul.bf16.vlgmr.msrb.gmra.mxu1 %v8560_v44  ;;  %v7791_v4 = vld [vmem:[#allocation5 + $0x490] sm:$0xf0]  ;;  %v6107_v46 = vor.u32 %v7861_v15, %v6106_v14  ;;  %v7770_v14 = vld [vmem:[#allocation5 + $0x3e8] sm:$0xf0] }
 0x14a   :  { %2985 = vmatpush.bf16.msra.mxu1 %v5463_v50  ;;  %v8666_v50 = vpop.f32.mrf.mxu0  ;;  %v5827_v16 = vor.u32 %v7791_v4, %v5826_v1  ;;  %v8670_v33 = vpop.f32.mrf.mxu2  ;;  %v5518_v1 = vld [vmem:[#allocation5 + $0x210] sm:$0xf]  ;;  %v7714_v4 = vld [vmem:[#allocation5 + $0x228] sm:$0xf0] }
 0x14b   :  { %2962 = vmatpush.bf16.msra.mxu2 %v6439_v21  ;;  %8846 = vst [vmem:[#allocation21_spill] sm:$0xff] %v8666_v50  ;;  %v7973_v50 = vld [vmem:[#allocation5 + $0xa40] sm:$0xf0] }
 0x14c   :  { %2999 = vmatpush.bf16.msra.mxu3 %v5687_v54  ;;  %2951 = vmatmul.bf16.vlgmr.msra.gmra.mxu0 %v8571_v25  ;;  %v7927_v54 = vld [vmem:[#allocation5 + $0x8d4] sm:$0xf]  ;;  %v8668_v21 = vpop.f32.mrf.mxu3 }
 0x14d   :  { %3013 = vmatpush.bf16.msrb.mxu0 %v5911_v9  ;;  %v6383_v9 = vor.u32 %v7927_v54, %v6380_v55  ;;  %v8672_v35 = vpop.f32.mrf.mxu1  ;;  %v5770_v55 = vld [vmem:[#allocation5 + $0x408] sm:$0xf] }
 0x14e   :  { %2986 = vmatpush.bf16.msra.mxu1 %v5435_v11  ;;  %v5574_v11 = vld [vmem:[#allocation5 + $0x280] sm:$0xf] }
 0x14f   :  { %2963 = vmatpush.bf16.msra.mxu2 %v6411_v49  ;;  %v5799_v49 = vor.u32 %v7784_v23, %v5798_v20  ;;  %v7651_v20 = vld [vmem:[#allocation5 + $0x30] sm:$0xf0] }
 0x150   :  { %3000 = vmatpush.bf16.msra.mxu3 %v5659_v12  ;;  %v7728_v12 = vld [vmem:[#allocation5 + $0x298] sm:$0xf0]  ;;  %v7707_v23 = vld [vmem:[#allocation5 + $0x1f0] sm:$0xf0] }
 0x151   :  { %3014 = vmatpush.bf16.msrb.mxu0 %v5883_v27  ;;  %v5575_v57 = vor.u32 %v7728_v12, %v5574_v11  ;;  %v5322_v27 = vld [vmem:[#allocation5 + $0x88] sm:$0xf]  ;;  %v5771_v11 = vor.u32 %v7777_v62, %v5770_v55 }
 0x152   :  { %2987 = vmatpush.bf16.msra.mxu1 %v5407_v29  ;;  %v7665_v29 = vld [vmem:[#allocation5 + $0xa0] sm:$0xf0] }
 0x153   :  { %2964 = vmatpush.bf16.msra.mxu2 %v6383_v9  ;;  %v5323_v54 = vor.u32 %v7665_v29, %v5322_v27  ;;  %v7847_v9 = vld [vmem:[#allocation5 + $0x650] sm:$0xf0]  ;;  %v6358_v27 = vld [vmem:[#allocation5 + $0x8a0] sm:$0xf]  ;;  %v7924_v29 = vld [vmem:[#allocation5 + $0x8b8] sm:$0xf0] }
 0x154   :  { %3001 = vmatpush.bf16.msra.mxu3 %v5631_v31  ;;  %v5546_v31 = vld [vmem:[#allocation5 + $0x248] sm:$0xf]  ;;  %v8679_v15 = vpop.f32.mrf.mxu3 }
 0x155   :  { %3015 = vmatpush.bf16.msrb.mxu0 %v5855_v56  ;;  %v8676_v56 = vpop.f32.mrf.mxu0  ;;  %v5547_v58 = vor.u32 %v7721_v32, %v5546_v31  ;;  %v8681_v31 = vpop.f32.mrf.mxu2 }
 0x156   :  { %2988 = vmatpush.bf16.msra.mxu1 %v5379_v63  ;;  %2965 = vmatmul.bf16.vlgmr.msra.gmra.mxu2 %v8574_v30  ;;  %v5294_v63 = vld [vmem:[#allocation5 + $0x50] sm:$0xf]  ;;  %8847 = vst [vmem:[#allocation22_spill] sm:$0xff] %v8681_v31  ;;  %v8683_v32 = vpop.f32.mrf.mxu1  ;;  %v6583_v31 = vor.u32 %v7980_v48, %v6582_v47 }
 0x157   :  { %3027 = vmatpush.bf16.msrb.mxu2 %v6135_v13  ;;  %6617 = vmatmul.msk.bf16.vlgmr.msrb.gmra.mxu3 %vm2393_vm0, %v8569_v24  ;;  %v5742_v13 = vld [vmem:[#allocation5 + $0x3d0] sm:$0xf]  ;;  %8848 = vst [vmem:[#allocation23_spill] sm:$0xff] %v8683_v32  ;;  %v7917_v32 = vld [vmem:[#allocation5 + $0x880] sm:$0xf0] }
 0x158   :  { %3002 = vmatpush.bf16.msra.mxu3 %v5603_v0  ;;  %v7658_v0 = vld [vmem:[#allocation5 + $0x68] sm:$0xf0]  ;;  %v5743_v55 = vor.u32 %v7770_v14, %v5742_v13  ;;  %v6331_v14 = vor.u32 %v7917_v32, %v6330_v59  ;;  %v5966_v59 = vld [vmem:[#allocation5 + $0x590] sm:$0xf] }
 0x159   :  { %3016 = vmatpush.bf16.msrb.mxu0 %v5827_v16  ;;  %v5295_v12 = vor.u32 %v7658_v0, %v5294_v63  ;;  %v5519_v16 = vor.u32 %v7714_v4, %v5518_v1  ;;  %v6359_v0 = vor.u32 %v7924_v29, %v6358_v27  ;;  %v5714_v1 = vld [vmem:[#allocation5 + $0x398] sm:$0xf]  ;;  %v7763_v4 = vld [vmem:[#allocation5 + $0x3b0] sm:$0xf0]  ;;  %v6555_v27 = vor.u32 %v7973_v50, %v6554_v41  ;;  %v6302_v29 = vld [vmem:[#allocation5 + $0x830] sm:$0xf] }
 0x15a   :  { %2989 = vmatpush.bf16.msra.mxu1 %v5351_v17  ;;  %v5266_v17 = vld [vmem:[#allocation5 + $0x18] sm:$0xf]  ;;  %v5715_v13 = vor.u32 %v7763_v4, %v5714_v1  ;;  %v7826_v32 = vld [vmem:[#allocation5 + $0x5a8] sm:$0xf0]  ;;  %v6845_v50 = vld [vmem:[#allocation8 + $0x1c0] sm:$0xf] }
 0x15b   :  { %3028 = vmatpush.bf16.msrb.mxu2 %v6107_v46  ;;  %v6051_v46 = vor.u32 %v7847_v9, %v6050_v8  ;;  %v7987_v8 = vld [vmem:[#allocation5 + $0xab0] sm:$0xf0] }
 0x15c   :  { %3003 = vmatpush.bf16.msra.mxu3 %v5575_v57  ;;  %v5490_v57 = vld [vmem:[#allocation5 + $0x1d8] sm:$0xf]  ;;  %v8690_v47 = vpop.f32.mrf.mxu3  ;;  %v7903_v4 = vld [vmem:[#allocation5 + $0x810] sm:$0xf0] }
 0x15d   :  { %3017 = vmatpush.bf16.msrb.mxu0 %v5799_v49  ;;  %v6022_v49 = vld [vmem:[#allocation5 + $0x600] sm:$0xf]  ;;  %v8685_v62 = vpop.f32.mrf.mxu0  ;;  %v5491_v63 = vor.u32 %v7707_v23, %v5490_v57  ;;  %v8687_v57 = vld [vmem:[#allocation7] sm:$0xff] }
 0x15e   :  { %2990 = vmatpush.bf16.msra.mxu1 %v5323_v54  ;;  %v7840_v54 = vld [vmem:[#allocation5 + $0x618] sm:$0xf0]  ;;  %v616_v23 = vperm.slane %v8687_v57, 1 }
 0x15f   :  { %3029 = vmatpush.bf16.msrb.mxu2 %v6079_v6  ;;  %v6610_v6 = vld [vmem:[#allocation5 + $0xa98] sm:$0xf]  ;;  %v6023_v9 = vor.u32 %v7840_v54, %v6022_v49  ;;  %v6526_v49 = vld [vmem:[#allocation5 + $0x9f0] sm:$0xf]  ;;  %v7966_v54 = vld [vmem:[#allocation5 + $0xa08] sm:$0xf0] }
 0x160   :  { %3004 = vmatpush.bf16.msra.mxu3 %v5547_v58  ;;  %v5267_v58 = vor.u32 %v7651_v20, %v5266_v17  ;;  %v6861_v17 = vld [vmem:[#allocation8 + $0x1e0] sm:$0xf]  ;;  %v8050_v20 = vld [vmem:[#allocation8 + $0x1ec] sm:$0xf0]  ;;  %v6527_v1 = vor.u32 %v7966_v54, %v6526_v49 }
 0x161   :  { %3018 = vmatpush.bf16.msrb.mxu0 %v5771_v11  ;;  %v5994_v11 = vld [vmem:[#allocation5 + $0x5c8] sm:$0xf] }
 0x162   :  { %2991 = vmatpush.bf16.msra.mxu1 %v5295_v12  ;;  %v7833_v12 = vld [vmem:[#allocation5 + $0x5e0] sm:$0xf0] }
 0x163   :  { %3030 = vmatpush.bf16.msrb.mxu2 %v6051_v46  ;;  %v7910_v46 = vld [vmem:[#allocation5 + $0x848] sm:$0xf0]  ;;  %v5995_v48 = vor.u32 %v7833_v12, %v5994_v11  ;;  %v5938_v11 = vld [vmem:[#allocation5 + $0x558] sm:$0xf]  ;;  %v7819_v12 = vld [vmem:[#allocation5 + $0x570] sm:$0xf0] }
 0x164   :  { %3005 = vmatpush.bf16.msra.mxu3 %v5519_v16  ;;  %v6611_v16 = vor.u32 %v7987_v8, %v6610_v6  ;;  %v6303_v41 = vor.u32 %v7910_v46, %v6302_v29  ;;  %v5967_v8 = vor.u32 %v7826_v32, %v5966_v59  ;;  %v8704_v49 = vpop.f32.mrf.mxu3  ;;  %v5939_v54 = vor.u32 %v7819_v12, %v5938_v11  ;;  %v6470_v59 = vld [vmem:[#allocation5 + $0x980] sm:$0xf]  ;;  %v7952_v32 = vld [vmem:[#allocation5 + $0x998] sm:$0xf0]  ;;  %v6218_v11 = vld [vmem:[#allocation5 + $0x788] sm:$0xf] }
 0x165   :  { %3019 = vmatpush.bf16.msrb.mxu0 %v5743_v55  ;;  %v6862_v55 = vor.u32 %v8050_v20, %v6861_v17  ;;  %v8699_v6 = vpop.f32.mrf.mxu0  ;;  %v6829_v20 = vld [vmem:[#allocation8 + $0x1a0] sm:$0xf]  ;;  %v7889_v12 = vld [vmem:[#allocation5 + $0x7a0] sm:$0xf0] }
 0x166   :  { %2992 = vmatpush.bf16.msra.mxu1 %v5267_v58  ;;  %v8694_v58 = vpop.f32.mrf.mxu2 }
 0x167   :  { %3031 = vmatpush.bf16.msrb.mxu2 %v6023_v9  ;;  %v7959_v9 = vld [vmem:[#allocation5 + $0x9d0] sm:$0xf0] }
 0x168   :  { %3006 = vmatpush.bf16.msra.mxu3 %v5491_v63  ;;  %v8046_v63 = vld [vmem:[#allocation8 + $0x1cc] sm:$0xf0] }
 0x169   :  { %2993 = vmatmul.bf16.vlgmr.msra.gmra.mxu1 %v8556_v39  ;;  %3020 = vmatpush.bf16.msrb.mxu0 %v5715_v13  ;;  %v6274_v39 = vld [vmem:[#allocation5 + $0x7f8] sm:$0xf]  ;;  %v6733_v13 = vld [vmem:[#allocation8 + $0xe0] sm:$0xf] }
 0x16a   :  { %3041 = vmatpush.bf16.msrb.mxu1 %v6359_v0  ;;  %v2505_v0 = vadd.f32 %v8640_v40, %v616_v23  ;;  %v8018_v40 = vld [vmem:[#allocation8 + $0xec] sm:$0xf0]  ;;  %v6275_v17 = vor.u32 %v7903_v4, %v6274_v39  ;;  %v8849_v4 = vperm.slane %v8596_v51, 0 }
 0x16b   :  { %3007 = vmatmul.bf16.vlgmr.msra.gmra.mxu3 %v8558_v43  ;;  %3032 = vmatpush.bf16.msrb.mxu2 %v5995_v48  ;;  %v6498_v43 = vld [vmem:[#allocation5 + $0x9b8] sm:$0xf]  ;;  %v6246_v48 = vld [vmem:[#allocation5 + $0x7c0] sm:$0xf]  ;;  %v8038_v39 = vld [vmem:[#allocation8 + $0x18c] sm:$0xf0] }
 0x16c   :  { %3055 = vmatpush.bf16.msrb.mxu3 %v6583_v31  ;;  %v8696_v31 = vpop.f32.mrf.mxu1  ;;  %3021 = vmatmul.bf16.vlgmr.msrb.gmra.mxu0 %v8554_v38  ;;  %v2519_v29 = vadd.f32 %v8642_v53, %v2505_v0  ;;  %v6499_v46 = vor.u32 %v7959_v9, %v6498_v43  ;;  %v7896_v38 = vld [vmem:[#allocation5 + $0x7d8] sm:$0xf0]  ;;  %v6471_v9 = vor.u32 %v7952_v32, %v6470_v59  ;;  %v8010_v51 = vld [vmem:[#allocation8 + $0xac] sm:$0xf0]  ;;  %v7938_v32 = vld [vmem:[#allocation5 + $0x928] sm:$0xf0] }
 0x16d   :  { %3076 = vmatpush.bf16.msra.mxu0 %v6611_v16  ;;  %v2507_v16 = vadd.f32 %v8649_v28, %v616_v23  ;;  %v6247_v0 = vor.u32 %v7896_v38, %v6246_v48  ;;  %v6190_v38 = vld [vmem:[#allocation5 + $0x750] sm:$0xf] }
 0x16e   :  { %3042 = vmatpush.bf16.msrb.mxu1 %v6331_v14  ;;  %v6846_v14 = vor.u32 %v8046_v63, %v6845_v50  ;;  %v6717_v50 = vld [vmem:[#allocation8 + $0xc0] sm:$0xf]  ;;  %v8014_v63 = vld [vmem:[#allocation8 + $0xcc] sm:$0xf0]  ;;  %v2533_v43 = vadd.f32 %v8625_v37, %v2519_v29 }
 0x16f   :  { %3033 = vmatpush.bf16.msrb.mxu2 %v5967_v8  ;;  %v2521_v23 = vadd.f32 %v8651_v45, %v2507_v16  ;;  %v2409_v8 = vadd.f32 %v8607_v26, %v8849_v4  ;;  %v6442_v45 = vld [vmem:[#allocation5 + $0x948] sm:$0xf]  ;;  %v6701_v16 = vld [vmem:[#allocation8 + $0xa0] sm:$0xf]  ;;  %v6219_v26 = vor.u32 %v7889_v12, %v6218_v11  ;;  %v6414_v59 = vld [vmem:[#allocation5 + $0x910] sm:$0xf] }
 0x170   :  { %3056 = vmatpush.bf16.msrb.mxu3 %v6555_v27  ;;  %v8042_v27 = vld [vmem:[#allocation8 + $0x1ac] sm:$0xf0]  ;;  %v6797_v37 = vld [vmem:[#allocation8 + $0x160] sm:$0xf]  ;;  %v6162_v4 = vld [vmem:[#allocation5 + $0x718] sm:$0xf] }
 0x171   :  { %4472 = vmatpush.bf16.msrb.mxu0 %v6862_v55  ;;  %v6734_v55 = vor.u32 %v8018_v40, %v6733_v13  ;;  %v6830_v28 = vor.u32 %v8042_v27, %v6829_v20  ;;  %v7945_v13 = vld [vmem:[#allocation5 + $0x960] sm:$0xf0]  ;;  %v8716_v20 = vpop.f32.mrf.mxu0  ;;  %v8034_v27 = vld [vmem:[#allocation8 + $0x16c] sm:$0xf0]  ;;  %v2423_v29 = vadd.f32 %v8609_v34, %v2409_v8  ;;  %v7875_v8 = vld [vmem:[#allocation5 + $0x730] sm:$0xf0] }
 0x172   :  { %3043 = vmatpush.bf16.msrb.mxu1 %v6303_v41  ;;  %v8707_v41 = vpop.f32.mrf.mxu2  ;;  %v6443_v48 = vor.u32 %v7945_v13, %v6442_v45  ;;  %v8006_v34 = vld [vmem:[#allocation8 + $0x8c] sm:$0xf0]  ;;  %v7931_v12 = vld [vmem:[#allocation5 + $0x8f0] sm:$0xf0]  ;;  %v6989_v45 = vld [vmem:[#allocation8 + $0x2e0] sm:$0xf] }
 0x173   :  { %3034 = vmatpush.bf16.msrb.mxu2 %v5939_v54  ;;  %v7882_v54 = vld [vmem:[#allocation5 + $0x768] sm:$0xf0]  ;;  %v8082_v13 = vld [vmem:[#allocation8 + $0x2ec] sm:$0xf0] }
 0x174   :  { %3057 = vmatpush.bf16.msrb.mxu3 %v6527_v1  ;;  %v8709_v53 = vpop.f32.mrf.mxu1  ;;  %v6813_v1 = vld [vmem:[#allocation8 + $0x180] sm:$0xf] }
 0x175   :  { %4473 = vmatpush.bf16.msrb.mxu0 %v6846_v14  ;;  %v6718_v14 = vor.u32 %v8014_v63, %v6717_v50  ;;  %v6814_v40 = vor.u32 %v8038_v39, %v6813_v1  ;;  %v6798_v50 = vor.u32 %v8034_v27, %v6797_v37  ;;  %v6781_v63 = vld [vmem:[#allocation8 + $0x140] sm:$0xf]  ;;  %v6415_v39 = vor.u32 %v7938_v32, %v6414_v59 }
 0x176   :  { %3044 = vmatpush.bf16.msrb.mxu1 %v6275_v17  ;;  %v2535_v17 = vadd.f32 %v8638_v19, %v2521_v23  ;;  %3035 = vmatmul.bf16.vlgmr.msrb.gmra.mxu2 %v8560_v44  ;;  %v6702_v19 = vor.u32 %v8010_v51, %v6701_v16  ;;  %v8722_v23 = vpop.f32.mrf.mxu3  ;;  %v8030_v44 = vld [vmem:[#allocation8 + $0x14c] sm:$0xf0]  ;;  %v7117_v16 = vld [vmem:[#allocation8 + $0x3e0] sm:$0xf]  ;;  %v6163_v51 = vor.u32 %v7875_v8, %v6162_v4 }
 0x177   :  { %4458 = vmatpush.bf16.msra.mxu2 %v6734_v55  ;;  %v6685_v55 = vld [vmem:[#allocation8 + $0x80] sm:$0xf] }
 0x178   :  { %3058 = vmatpush.bf16.msrb.mxu3 %v6499_v46  ;;  %v2547_v46 = vadd.f32 %v8644_v61, %v2533_v43  ;;  %v6191_v61 = vor.u32 %v7882_v54, %v6190_v38  ;;  %v6386_v43 = vld [vmem:[#allocation5 + $0x8d8] sm:$0xf]  ;;  %v618_v38 = vperm.slane %v8687_v57, 3  ;;  %v6973_v32 = vld [vmem:[#allocation8 + $0x2c0] sm:$0xf] }
 0x179   :  { %4474 = vmatpush.bf16.msrb.mxu0 %v6830_v28  ;;  %v2549_v28 = vadd.f32 %v8653_v60, %v2535_v17  ;;  %v8002_v17 = vld [vmem:[#allocation8 + $0x6c] sm:$0xf0]  ;;  %v2716_v54 = vpop.f32.mrf.mxu0 }
 0x17a   :  { %3045 = vmatpush.bf16.msrb.mxu1 %v6247_v0  ;;  %v2437_v0 = vadd.f32 %v8612_v52, %v2423_v29  ;;  %v2561_v1 = vadd.f32 %v8658_v22, %v2547_v46  ;;  %v2702_v11 = vpop.f32.mrf.mxu2  ;;  %v6686_v52 = vor.u32 %v8006_v34, %v6685_v55  ;;  %v6782_v22 = vor.u32 %v8030_v44, %v6781_v63  ;;  %v7998_v63 = vld [vmem:[#allocation8 + $0x4c] sm:$0xf0]  ;;  %v6749_v44 = vld [vmem:[#allocation8 + $0x100] sm:$0xf] }
 0x17b   :  { %4459 = vmatpush.bf16.msra.mxu2 %v6718_v14  ;;  %v6669_v14 = vld [vmem:[#allocation8 + $0x60] sm:$0xf]  ;;  %v6990_v29 = vor.u32 %v8082_v13, %v6989_v45 }
 0x17c   :  { %3059 = vmatpush.bf16.msrb.mxu3 %v6471_v9  ;;  %v2563_v9 = vadd.f32 %v8668_v21, %v2549_v28  ;;  %v8727_v60 = vpop.f32.mrf.mxu1  ;;  %6618 = vmatmul.msk.bf16.vlgmr.msra.gmra.mxu0 %vm2393_vm0, %v8569_v24  ;;  %v6765_v21 = vld [vmem:[#allocation8 + $0x120] sm:$0xf]  ;;  %v2451_v37 = vadd.f32 %v8631_v3, %v2437_v0  ;;  %v2575_v27 = vadd.f32 %v8661_v36, %v2561_v1  ;;  %v8110_v36 = vld [vmem:[#allocation8 + $0x3cc] sm:$0xf0] }
 0x17d   :  { %4475 = vmatpush.bf16.msrb.mxu0 %v6814_v40  ;;  %v8114_v40 = vld [vmem:[#allocation8 + $0x3ec] sm:$0xf0]  ;;  %v6387_v24 = vor.u32 %v7931_v12, %v6386_v43  ;;  %v6670_v55 = vor.u32 %v8002_v17, %v6669_v14  ;;  %v7101_v28 = vld [vmem:[#allocation8 + $0x3c0] sm:$0xf]  ;;  %v2701_v43 = vadd.f32 %v8707_v41, %v618_v38  ;;  %v2703_v12 = vadd.f32 %v2702_v11, %v618_v38 }
 0x17e   :  { %3046 = vmatpush.bf16.msrb.mxu1 %v6219_v26  ;;  %v8026_v26 = vld [vmem:[#allocation8 + $0x12c] sm:$0xf0]  ;;  %v2577_v46 = vadd.f32 %v8670_v33, %v2563_v9  ;;  %v7118_v59 = vor.u32 %v8114_v40, %v7117_v16  ;;  %v2465_v34 = vadd.f32 %v8623_v2, %v2451_v37  ;;  %v8738_v33 = vpop.f32.mrf.mxu3  ;;  %v2589_v1 = vadd.f32 %v8647_v7, %v2575_v27  ;;  %v7245_v38 = vld [vmem:[#allocation8 + $0x4e0] sm:$0xf] }
 0x17f   :  { %4460 = vmatpush.bf16.msra.mxu2 %v6702_v19  ;;  %v8078_v19 = vld [vmem:[#allocation8 + $0x2cc] sm:$0xf0]  ;;  %v6766_v3 = vor.u32 %v8026_v26, %v6765_v21  ;;  %v7102_v2 = vor.u32 %v8110_v36, %v7101_v28  ;;  %v6941_v21 = vld [vmem:[#allocation8 + $0x280] sm:$0xf]  ;;  %v2715_v37 = vadd.f32 %v8716_v20, %v2701_v43  ;;  %v2717_v27 = vadd.f32 %v2716_v54, %v2703_v12 }
 0x180   :  { %3060 = vmatpush.bf16.msrb.mxu3 %v6443_v48  ;;  %v617_v48 = vperm.slane %v8687_v57, 2  ;;  %v8022_v0 = vld [vmem:[#allocation8 + $0x10c] sm:$0xf0]  ;;  %v2479_v14 = vadd.f32 %v8636_v18, %v2465_v34  ;;  %v3084_v40 = vmax.f32 %v2589_v1, 0.0  ;;  %v7229_v1 = vld [vmem:[#allocation8 + $0x4c0] sm:$0xf] }
 0x181   :  { %4476 = vmatpush.bf16.msrb.mxu0 %v6798_v50  ;;  %v6653_v50 = vld [vmem:[#allocation8 + $0x40] sm:$0xf]  ;;  %v8074_v9 = vld [vmem:[#allocation8 + $0x2ac] sm:$0xf0]  ;;  %v6750_v13 = vor.u32 %v8022_v0, %v6749_v44  ;;  %v2729_v28 = vadd.f32 %v8709_v53, %v2715_v37  ;;  %v2731_v36 = vadd.f32 %v8727_v60, %v2717_v27 }
 0x182   :  { %3047 = vmatpush.bf16.msrb.mxu1 %v6191_v61  ;;  %v2591_v61 = vadd.f32 %v8655_v5, %v2577_v46  ;;  %v2603_v4 = vadd.f32 %v8663_v42, %v617_v48  ;;  %v2605_v8 = vadd.f32 %v8672_v35, %v617_v48  ;;  %v6957_v5 = vld [vmem:[#allocation8 + $0x2a0] sm:$0xf]  ;;  %v6654_v45 = vor.u32 %v7998_v63, %v6653_v50  ;;  %v8106_v7 = vld [vmem:[#allocation8 + $0x3ac] sm:$0xf0]  ;;  %v8745_v16 = vpop.f32.mrf.mxu2  ;;  %v8757_v48 = vpop.f32.mrf.mxu0 }
 0x183   :  { %4461 = vmatpush.bf16.msra.mxu2 %v6686_v52  ;;  %v7085_v52 = vld [vmem:[#allocation8 + $0x3a0] sm:$0xf]  ;;  %v7994_v41 = vld [vmem:[#allocation8 + $0x2c] sm:$0xf0]  ;;  %v6958_v11 = vor.u32 %v8074_v9, %v6957_v5 }
 0x184   :  { %3061 = vmatpush.bf16.msrb.mxu3 %v6415_v39  ;;  %v6974_v39 = vor.u32 %v8078_v19, %v6973_v32  ;;  %v8747_v42 = vpop.f32.mrf.mxu1  ;;  %v6637_v35 = vld [vmem:[#allocation8 + $0x20] sm:$0xf]  ;;  %v2617_v17 = vadd.f32 %v8679_v15, %v2603_v4  ;;  %v7086_v18 = vor.u32 %v8106_v7, %v7085_v52  ;;  %v8070_v26 = vld [vmem:[#allocation8 + $0x28c] sm:$0xf0]  ;;  %v2743_v52 = vadd.f32 %v8738_v33, %v2729_v28 }
 0x185   :  { %4477 = vmatpush.bf16.msrb.mxu0 %v6782_v22  ;;  %v3091_v22 = vmax.f32 %v2591_v61, 0.0  ;;  %v6621_v15 = vld [vmem:[#allocation8] sm:$0xf]  ;;  %v6942_v32 = vor.u32 %v8070_v26, %v6941_v21  ;;  %v8066_v50 = vld [vmem:[#allocation8 + $0x26c] sm:$0xf0] }
 0x186   :  { %3048 = vmatpush.bf16.msrb.mxu1 %v6163_v51  ;;  %v2619_v51 = vadd.f32 %v8690_v47, %v2605_v8  ;;  %v7990_v47 = vld [vmem:[#allocation8 + $0xc] sm:$0xf0]  ;;  %v2744_v54 = vpop.f32.mrf.mxu3  ;;  %v7053_v61 = vld [vmem:[#allocation8 + $0x360] sm:$0xf]  ;;  %v8851_v8 = vld [vmem:[#allocation20_spill] sm:$0xff] }
 0x187   :  { %4462 = vmatpush.bf16.msra.mxu2 %v6670_v55  ;;  %v8755_v46 = vpack.c.bf16 %v3091_v22, %v3084_v40  ;;  %v6925_v55 = vld [vmem:[#allocation8 + $0x260] sm:$0xf]  ;;  %v6622_v34 = vor.u32 %v7990_v47, %v6621_v15  ;;  %v8098_v63 = vld [vmem:[#allocation8 + $0x36c] sm:$0xf0]  ;;  %v3083_v43 = vmax.f32 %v8851_v8, 0.0 }
 0x188   :  { %3062 = vmatpush.bf16.msrb.mxu3 %v6387_v24  ;;  %v6638_v24 = vor.u32 %v7994_v41, %v6637_v35  ;;  %v2633_v20 = vadd.f32 %v8676_v56, %v2619_v51  ;;  %v2745_v56 = vadd.f32 %v2744_v54, %v2731_v36  ;;  %v6926_v4 = vor.u32 %v8066_v50, %v6925_v55  ;;  %v6909_v60 = vld [vmem:[#allocation8 + $0x240] sm:$0xf]  ;;  %v8062_v12 = vld [vmem:[#allocation8 + $0x24c] sm:$0xf0] }
 0x189   :  { %4478 = vmatpush.bf16.msrb.mxu0 %v6766_v3  ;;  %3049 = vmatmul.bf16.vlgmr.msrb.gmra.mxu1 %v8571_v25  ;;  %v7069_v25 = vld [vmem:[#allocation8 + $0x380] sm:$0xf]  ;;  %v7054_v53 = vor.u32 %v8098_v63, %v7053_v61  ;;  %v8138_v51 = vld [vmem:[#allocation8 + $0x4ac] sm:$0xf0] }
 0x18a   :  { %4486 = vmatpush.bf16.msra.mxu1 %v6990_v29  ;;  %v8102_v29 = vld [vmem:[#allocation8 + $0x38c] sm:$0xf0]  ;;  %v2758_v5 = vpop.f32.mrf.mxu2  ;;  %v7037_v7 = vld [vmem:[#allocation8 + $0x340] sm:$0xf]  ;;  %v2772_v26 = vpop.f32.mrf.mxu0 }
 0x18b   :  { %3063 = vmatmul.bf16.vlgmr.msrb.gmra.mxu3 %v8574_v30  ;;  %4463 = vmatpush.bf16.msra.mxu2 %v6654_v45  ;;  %v2493_v30 = vadd.f32 %v8634_v10, %v2479_v14  ;;  %v7070_v19 = vor.u32 %v8102_v29, %v7069_v25  ;;  %v8850_v10 = vld [vmem:[#allocation21_spill] sm:$0xff]  ;;  %v8852_v45 = vld [vmem:[#allocation22_spill] sm:$0xff]  ;;  %v8094_v14 = vld [vmem:[#allocation8 + $0x34c] sm:$0xf0]  ;;  %v2759_v40 = vadd.f32 %v2758_v5, %v2745_v56 }
 0x18c   :  { %4500 = vmatpush.bf16.msra.mxu3 %v7118_v59  ;;  %v8146_v59 = vld [vmem:[#allocation8 + $0x4ec] sm:$0xf0]  ;;  %v2631_v3 = vadd.f32 %v8850_v10, %v2617_v17  ;;  %v2786_v9 = vpop.f32.mrf.mxu1  ;;  %v7213_v17 = vld [vmem:[#allocation8 + $0x4a0] sm:$0xf]  ;;  %v7038_v33 = vor.u32 %v8094_v14, %v7037_v7 }
 0x18d   :  { %4479 = vmatpush.bf16.msrb.mxu0 %v6750_v13  ;;  %v3090_v44 = vmax.f32 %v2493_v30, 0.0  ;;  %v7246_v0 = vor.u32 %v8146_v59, %v7245_v38  ;;  %v6893_v37 = vld [vmem:[#allocation8 + $0x220] sm:$0xf]  ;;  %v8058_v27 = vld [vmem:[#allocation8 + $0x22c] sm:$0xf0]  ;;  %v7214_v30 = vor.u32 %v8138_v51, %v7213_v17  ;;  %v2773_v47 = vadd.f32 %v2772_v26, %v2759_v40 }
 0x18e   :  { %4487 = vmatpush.bf16.msra.mxu1 %v6974_v39  ;;  %v8142_v39 = vld [vmem:[#allocation8 + $0x4cc] sm:$0xf0]  ;;  %v2645_v13 = vadd.f32 %v8852_v45, %v2631_v3  ;;  %v7021_v25 = vld [vmem:[#allocation8 + $0x320] sm:$0xf]  ;;  %v2798_v63 = vpop.f32.mrf.mxu3  ;;  %v8012_v45 = vld [vmem:[#allocation8 + $0xc4] sm:$0xf] }
 0x18f   :  { %4464 = vmatpush.bf16.msra.mxu2 %v6638_v24  ;;  %v8768_v22 = vpack.c.bf16 %v3090_v44, %v3083_v43  ;;  %v7230_v41 = vor.u32 %v8142_v39, %v7229_v1  ;;  %v2757_v24 = vadd.f32 %v8745_v16, %v2743_v52  ;;  %v8090_v29 = vld [vmem:[#allocation8 + $0x32c] sm:$0xf0]  ;;  %v7197_v15 = vld [vmem:[#allocation8 + $0x480] sm:$0xf]  ;;  %v2787_v3 = vadd.f32 %v2786_v9, %v2773_v47  ;;  %v8016_v44 = vld [vmem:[#allocation8 + $0xe4] sm:$0xf] }
 0x190   :  { %4501 = vmatpush.bf16.msra.mxu3 %v7102_v2  ;;  %4480 = vmatmul.bf16.vlgmr.msrb.gmra.mxu0 %v8755_v46  ;;  %v2647_v2 = vadd.f32 %v8694_v58, %v2633_v20  ;;  %v8853_v58 = vld [vmem:[#allocation23_spill] sm:$0xff]  ;;  %v7373_v59 = vld [vmem:[#allocation8 + $0x5e0] sm:$0xf]  ;;  %v7022_v54 = vor.u32 %v8090_v29, %v7021_v25  ;;  %v619_v9 = vperm.slane %v8687_v57, 4 }
 0x191   :  { %v8134_v38 = vld [vmem:[#allocation8 + $0x48c] sm:$0xf0]  ;;  %v2771_v10 = vadd.f32 %v8757_v48, %v2757_v24  ;;  %v7005_v28 = vld [vmem:[#allocation8 + $0x300] sm:$0xf]  ;;  %v6703_v26 = vld [vmem:[#allocation8 + $0xb0] sm:$0xf0] }
 0x192   :  { %4488 = vmatpush.bf16.msra.mxu1 %v6958_v11  ;;  %v2661_v35 = vadd.f32 %v8696_v31, %v2647_v2  ;;  %v2659_v11 = vadd.f32 %v8853_v58, %v2645_v13  ;;  %v8054_v55 = vld [vmem:[#allocation8 + $0x20c] sm:$0xf0]  ;;  %v7181_v61 = vld [vmem:[#allocation8 + $0x460] sm:$0xf]  ;;  %v3093_v2 = vmax.f32 %v2787_v3, 0.0 }
 0x193   :  { %4465 = vmatpush.bf16.msra.mxu2 %v6622_v34  ;;  %v8086_v36 = vld [vmem:[#allocation8 + $0x30c] sm:$0xf0]  ;;  %v7198_v34 = vor.u32 %v8134_v38, %v7197_v15  ;;  %v7357_v39 = vld [vmem:[#allocation8 + $0x5c0] sm:$0xf]  ;;  %v8004_v15 = vld [vmem:[#allocation8 + $0x84] sm:$0xf] }
 0x194   :  { %4502 = vmatpush.bf16.msra.mxu3 %v7086_v18  ;;  %v6910_v18 = vor.u32 %v8062_v12, %v6909_v60  ;;  %v2675_v21 = vadd.f32 %v8722_v23, %v2661_v35  ;;  %v2673_v31 = vadd.f32 %v8704_v49, %v2659_v11  ;;  %v6894_v23 = vor.u32 %v8058_v27, %v6893_v37  ;;  %v2812_v49 = vpop.f32.mrf.mxu1  ;;  %v8130_v56 = vld [vmem:[#allocation8 + $0x46c] sm:$0xf0]  ;;  %v7165_v5 = vld [vmem:[#allocation8 + $0x440] sm:$0xf]  ;;  %v6687_v47 = vld [vmem:[#allocation8 + $0x90] sm:$0xf0] }
 0x195   :  { %v7006_v48 = vor.u32 %v8086_v36, %v7005_v28  ;;  %v7182_v60 = vor.u32 %v8130_v56, %v7181_v61  ;;  %v8126_v12 = vld [vmem:[#allocation8 + $0x44c] sm:$0xf0]  ;;  %v7341_v52 = vld [vmem:[#allocation8 + $0x5a0] sm:$0xf]  ;;  %v2826_v35 = vpop.f32.mrf.mxu2  ;;  %v2799_v11 = vadd.f32 %v2798_v63, %v619_v9  ;;  %v8000_v28 = vld [vmem:[#allocation8 + $0x64] sm:$0xf] }
 0x196   :  { %4489 = vmatpush.bf16.msra.mxu1 %v6942_v32  ;;  %4466 = vmatmul.bf16.vlgmr.msra.gmra.mxu2 %v8768_v22  ;;  %v8178_v32 = vld [vmem:[#allocation8 + $0x5ec] sm:$0xf0]  ;;  %v2689_v20 = vadd.f32 %v8699_v6, %v2675_v21  ;;  %v2687_v16 = vadd.f32 %v8685_v62, %v2673_v31  ;;  %v2785_v6 = vadd.f32 %v8747_v42, %v2771_v10  ;;  %v6719_v42 = vld [vmem:[#allocation8 + $0xd0] sm:$0xf0]  ;;  %v7149_v51 = vld [vmem:[#allocation8 + $0x420] sm:$0xf]  ;;  %v2800_v31 = vpop.f32.mrf.mxu3 }
 0x197   :  { %4514 = vmatpush.bf16.msrb.mxu2 %v7246_v0  ;;  %v7374_v50 = vor.u32 %v8178_v32, %v7373_v59  ;;  %v6735_v0 = vld [vmem:[#allocation8 + $0xf0] sm:$0xf0]  ;;  %v8170_v7 = vld [vmem:[#allocation8 + $0x5ac] sm:$0xf0]  ;;  %v6722_v40 = vor.u32 %v8012_v45, %v6719_v42  ;;  %v7166_v17 = vor.u32 %v8126_v12, %v7165_v5  ;;  %v8008_v21 = vld [vmem:[#allocation8 + $0xa4] sm:$0xf]  ;;  %v2813_v25 = vadd.f32 %v2812_v49, %v2799_v11 }
 0x198   :  { %4503 = vmatpush.bf16.msra.mxu3 %v7070_v19  ;;  %v6877_v19 = vld [vmem:[#allocation8 + $0x200] sm:$0xf]  ;;  %v3092_v62 = vmax.f32 %v2689_v20, 0.0  ;;  %v3085_v43 = vmax.f32 %v2687_v16, 0.0  ;;  %v3086_v13 = vmax.f32 %v2785_v6, 0.0  ;;  %v6706_v29 = vor.u32 %v8008_v21, %v6703_v26  ;;  %v2840_v20 = vpop.f32.mrf.mxu0 }
 0x199   :  { %4528 = vmatpush.bf16.msra.mxu0 %v7374_v50  ;;  %v6878_v1 = vor.u32 %v8054_v55, %v6877_v19  ;;  %v7325_v37 = vld [vmem:[#allocation8 + $0x580] sm:$0xf]  ;;  %v8166_v27 = vld [vmem:[#allocation8 + $0x58c] sm:$0xf0]  ;;  %v8048_v59 = vld [vmem:[#allocation8 + $0x1e4] sm:$0xf]  ;;  %v2827_v50 = vadd.f32 %v2826_v35, %v2813_v25  ;;  %v2801_v16 = vadd.f32 %v2800_v31, %v619_v9  ;;  %v6690_v10 = vor.u32 %v8004_v15, %v6687_v47 }
 0x19a   :  { %4490 = vmatpush.bf16.msra.mxu1 %v6926_v4  ;;  %v8174_v4 = vld [vmem:[#allocation8 + $0x5cc] sm:$0xf0]  ;;  %v8781_v14 = vpack.c.bf16 %v3092_v62, %v3085_v43  ;;  %v8783_v58 = vpack.c.bf16 %v3093_v2, %v3086_v13  ;;  %v7326_v24 = vor.u32 %v8166_v27, %v7325_v37  ;;  %v7133_v38 = vld [vmem:[#allocation8 + $0x400] sm:$0xf]  ;;  %v6863_v32 = vld [vmem:[#allocation8 + $0x1f0] sm:$0xf0] }
 0x19b   :  { %4515 = vmatpush.bf16.msrb.mxu2 %v7230_v41  ;;  %v7358_v8 = vor.u32 %v8174_v4, %v7357_v39  ;;  %v7342_v41 = vor.u32 %v8170_v7, %v7341_v52  ;;  %v7309_v19 = vld [vmem:[#allocation8 + $0x560] sm:$0xf]  ;;  %v8162_v55 = vld [vmem:[#allocation8 + $0x56c] sm:$0xf0]  ;;  %v6671_v36 = vld [vmem:[#allocation8 + $0x70] sm:$0xf0]  ;;  %v2841_v56 = vadd.f32 %v2840_v20, %v2827_v50 }
 0x19c   :  { %4504 = vmatpush.bf16.msra.mxu3 %v7054_v53  ;;  %v6738_v53 = vor.u32 %v8016_v44, %v6735_v0  ;;  %v7310_v49 = vor.u32 %v8162_v55, %v7309_v19  ;;  %v8044_v61 = vld [vmem:[#allocation8 + $0x1c4] sm:$0xf]  ;;  %v6847_v63 = vld [vmem:[#allocation8 + $0x1d0] sm:$0xf0]  ;;  %v7293_v0 = vld [vmem:[#allocation8 + $0x540] sm:$0xf]  ;;  %v6674_v39 = vor.u32 %v8000_v28, %v6671_v36 }
 0x19d   :  { %4529 = vmatpush.bf16.msra.mxu0 %v7358_v8  ;;  %v8158_v6 = vld [vmem:[#allocation8 + $0x54c] sm:$0xf0]  ;;  %v6655_v8 = vld [vmem:[#allocation8 + $0x50] sm:$0xf0]  ;;  %v6850_v43 = vor.u32 %v8044_v61, %v6847_v63  ;;  %v8040_v2 = vld [vmem:[#allocation8 + $0x1a4] sm:$0xf] }
 0x19e   :  { %4491 = vmatpush.bf16.msra.mxu1 %v6910_v18  ;;  %v2814_v18 = vpop.f32.mrf.mxu1  ;;  %v7294_v4 = vor.u32 %v8158_v6, %v7293_v0  ;;  %v6831_v5 = vld [vmem:[#allocation8 + $0x1b0] sm:$0xf0]  ;;  %v7992_v7 = vld [vmem:[#allocation8 + $0x24] sm:$0xf] }
 0x19f   :  { %4516 = vmatpush.bf16.msrb.mxu2 %v7214_v30  ;;  %v6639_v35 = vld [vmem:[#allocation8 + $0x30] sm:$0xf0]  ;;  %v8036_v11 = vld [vmem:[#allocation8 + $0x184] sm:$0xf] }
 0x1a0   :  { %4505 = vmatpush.bf16.msra.mxu3 %v7038_v33  ;;  %v8122_v33 = vld [vmem:[#allocation8 + $0x42c] sm:$0xf0]  ;;  %v2842_v52 = vpop.f32.mrf.mxu0  ;;  %v6991_v27 = vld [vmem:[#allocation8 + $0x2f0] sm:$0xf0]  ;;  %v7988_v25 = vld [vmem:[#allocation8 + $0x4] sm:$0xf] }
 0x1a1   :  { %4530 = vmatpush.bf16.msra.mxu0 %v7342_v41  ;;  %v7150_v30 = vor.u32 %v8122_v33, %v7149_v51  ;;  %v6834_v41 = vor.u32 %v8040_v2, %v6831_v5  ;;  %v8150_v51 = vld [vmem:[#allocation8 + $0x50c] sm:$0xf0]  ;;  %v6642_v33 = vor.u32 %v7992_v7, %v6639_v35  ;;  %v8076_v28 = vld [vmem:[#allocation8 + $0x2c4] sm:$0xf]  ;;  %v6975_v36 = vld [vmem:[#allocation8 + $0x2d0] sm:$0xf0] }
 0x1a2   :  { %4492 = vmatpush.bf16.msra.mxu1 %v6894_v23  ;;  %v8118_v23 = vld [vmem:[#allocation8 + $0x40c] sm:$0xf0]  ;;  %v6783_v61 = vld [vmem:[#allocation8 + $0x150] sm:$0xf0]  ;;  %v6978_v63 = vor.u32 %v8076_v28, %v6975_v36  ;;  %v8176_v35 = vld [vmem:[#allocation8 + $0x5e4] sm:$0xf] }
 0x1a3   :  { %4517 = vmatpush.bf16.msrb.mxu2 %v7198_v34  ;;  %v7134_v3 = vor.u32 %v8118_v23, %v7133_v38  ;;  %v6866_v34 = vor.u32 %v8048_v59, %v6863_v32  ;;  %v8144_v38 = vld [vmem:[#allocation8 + $0x4e4] sm:$0xf]  ;;  %v7247_v23 = vld [vmem:[#allocation8 + $0x4f0] sm:$0xf0] }
 0x1a4   :  { %4506 = vmatpush.bf16.msra.mxu3 %v7022_v54  ;;  %v2828_v54 = vpop.f32.mrf.mxu2  ;;  %v8032_v59 = vld [vmem:[#allocation8 + $0x164] sm:$0xf]  ;;  %v6799_v32 = vld [vmem:[#allocation8 + $0x170] sm:$0xf0]  ;;  %v7250_v50 = vor.u32 %v8144_v38, %v7247_v23 }
 0x1a5   :  { %4531 = vmatpush.bf16.msra.mxu0 %v7326_v24  ;;  %v6767_v2 = vld [vmem:[#allocation8 + $0x130] sm:$0xf0] }
 0x1a6   :  { %4493 = vmatpush.bf16.msra.mxu1 %v6878_v1  ;;  %v2868_v44 = vpop.f32.mrf.mxu1  ;;  %v2815_v1 = vadd.f32 %v2814_v18, %v2801_v16  ;;  %v8080_v18 = vld [vmem:[#allocation8 + $0x2e4] sm:$0xf]  ;;  %v6895_v36 = vld [vmem:[#allocation8 + $0x230] sm:$0xf0] }
 0x1a7   :  { %4518 = vmatpush.bf16.msrb.mxu2 %v7182_v60  ;;  %v8154_v60 = vld [vmem:[#allocation8 + $0x52c] sm:$0xf0]  ;;  %v8140_v16 = vld [vmem:[#allocation8 + $0x4c4] sm:$0xf] }
 0x1a8   :  { %4507 = vmatpush.bf16.msra.mxu3 %v7006_v48  ;;  %v7996_v48 = vld [vmem:[#allocation8 + $0x44] sm:$0xf]  ;;  %v2829_v12 = vadd.f32 %v2828_v54, %v2815_v1  ;;  %v6959_v1 = vld [vmem:[#allocation8 + $0x2b0] sm:$0xf0] }
 0x1a9   :  { %4494 = vmatmul.bf16.vlgmr.msra.gmra.mxu1 %v8781_v14  ;;  %4532 = vmatpush.bf16.msra.mxu0 %v7310_v49  ;;  %v6658_v42 = vor.u32 %v7996_v48, %v6655_v8  ;;  %v7215_v48 = vld [vmem:[#allocation8 + $0x4b0] sm:$0xf0]  ;;  %v2896_v5 = vpop.f32.mrf.mxu0 }
 0x1aa   :  { %v2854_v62 = vpop.f32.mrf.mxu3  ;;  %v2843_v21 = vadd.f32 %v2842_v52, %v2829_v12  ;;  %v7199_v12 = vld [vmem:[#allocation8 + $0x490] sm:$0xf0] }
 0x1ab   :  { %4508 = vmatmul.bf16.vlgmr.msra.gmra.mxu3 %v8783_v58  ;;  %4519 = vmatpush.bf16.msrb.mxu2 %v7166_v17  ;;  %v2855_v45 = vadd.f32 %v2854_v62, %v2841_v56  ;;  %v7261_v17 = vld [vmem:[#allocation8 + $0x500] sm:$0xf]  ;;  %v8072_v56 = vld [vmem:[#allocation8 + $0x2a4] sm:$0xf]  ;;  %v6751_v52 = vld [vmem:[#allocation8 + $0x110] sm:$0xf0] }
 0x1ac   :  { %4556 = vmatpush.bf16.msrb.mxu3 %v6738_v53  ;;  %v2882_v9 = vpop.f32.mrf.mxu2  ;;  %v7277_v53 = vld [vmem:[#allocation8 + $0x520] sm:$0xf]  ;;  %v7262_v37 = vor.u32 %v8150_v51, %v7261_v17  ;;  %v8136_v62 = vld [vmem:[#allocation8 + $0x4a4] sm:$0xf]  ;;  %v6962_v8 = vor.u32 %v8072_v56, %v6959_v1  ;;  %v6927_v17 = vld [vmem:[#allocation8 + $0x270] sm:$0xf0] }
 0x1ad   :  { %4533 = vmatpush.bf16.msra.mxu0 %v7294_v4  ;;  %v7278_v13 = vor.u32 %v8154_v60, %v7277_v53  ;;  %v2869_v26 = vadd.f32 %v2868_v44, %v2855_v45  ;;  %v8132_v53 = vld [vmem:[#allocation8 + $0x484] sm:$0xf]  ;;  %v7469_v1 = vld [vmem:[#allocation8 + $0x6a0] sm:$0xf] }
 0x1ae   :  { %v2870_v24 = vpop.f32.mrf.mxu1  ;;  %v8068_v45 = vld [vmem:[#allocation8 + $0x284] sm:$0xf] }
 0x1af   :  { %4520 = vmatpush.bf16.msrb.mxu2 %v7150_v30  ;;  %v6994_v30 = vor.u32 %v8080_v18, %v6991_v27  ;;  %v2883_v54 = vadd.f32 %v2882_v9, %v2869_v26  ;;  %v7218_v9 = vor.u32 %v8136_v62, %v7215_v48  ;;  %v8128_v18 = vld [vmem:[#allocation8 + $0x464] sm:$0xf] }
 0x1b0   :  { %4557 = vmatpush.bf16.msrb.mxu3 %v6722_v40  ;;  %v6815_v40 = vld [vmem:[#allocation8 + $0x190] sm:$0xf0]  ;;  %v8052_v62 = vld [vmem:[#allocation8 + $0x204] sm:$0xf] }
 0x1b1   :  { %4534 = vmatpush.bf16.msra.mxu0 %v7278_v13  ;;  %v6818_v15 = vor.u32 %v8036_v11, %v6815_v40  ;;  %v3087_v44 = vmax.f32 %v2883_v54, 0.0  ;;  %v8020_v13 = vld [vmem:[#allocation8 + $0x104] sm:$0xf]  ;;  %v7202_v11 = vor.u32 %v8132_v53, %v7199_v12  ;;  %v2898_v38 = vpop.f32.mrf.mxu0  ;;  %v620_v54 = vperm.slane %v8687_v57, 5 }
 0x1b2   :  { %v2856_v31 = vpop.f32.mrf.mxu3  ;;  %v8064_v40 = vld [vmem:[#allocation8 + $0x264] sm:$0xf]  ;;  %v6754_v51 = vor.u32 %v8020_v13, %v6751_v52  ;;  %v6869_v52 = vld [vmem:[#allocation8 + $0x1e8] sm:$0xf] }
 0x1b3   :  { %4521 = vmatpush.bf16.msrb.mxu2 %v7134_v3  ;;  %v2857_v47 = vadd.f32 %v2856_v31, %v2843_v21  ;;  %v7231_v3 = vld [vmem:[#allocation8 + $0x4d0] sm:$0xf0]  ;;  %v6930_v26 = vor.u32 %v8064_v40, %v6927_v17  ;;  %v8164_v57 = vld [vmem:[#allocation8 + $0x584] sm:$0xf]  ;;  %v2899_v48 = vadd.f32 %v2898_v38, %v620_v54  ;;  %v8198_v40 = vld [vmem:[#allocation8 + $0x68c] sm:$0xf0] }
 0x1b4   :  { %4558 = vmatpush.bf16.msrb.mxu3 %v6706_v29  ;;  %v6623_v29 = vld [vmem:[#allocation8 + $0x10] sm:$0xf0]  ;;  %v2884_v20 = vpop.f32.mrf.mxu2  ;;  %v7234_v6 = vor.u32 %v8140_v16, %v7231_v3  ;;  %v7485_v16 = vld [vmem:[#allocation8 + $0x6c0] sm:$0xf]  ;;  %v8160_v13 = vld [vmem:[#allocation8 + $0x564] sm:$0xf] }
 0x1b5   :  { %4535 = vmatpush.bf16.msra.mxu0 %v7262_v37  ;;  %v2871_v19 = vadd.f32 %v2870_v24, %v2857_v47  ;;  %v6626_v55 = vor.u32 %v7988_v25, %v6623_v29  ;;  %v7183_v21 = vld [vmem:[#allocation8 + $0x470] sm:$0xf0]  ;;  %v8172_v37 = vld [vmem:[#allocation8 + $0x5c4] sm:$0xf]  ;;  %v7501_v24 = vld [vmem:[#allocation8 + $0x6e0] sm:$0xf] }
 0x1b6   :  { %v7359_v31 = vld [vmem:[#allocation8 + $0x5d0] sm:$0xf0]  ;;  %v8210_v25 = vld [vmem:[#allocation8 + $0x6ec] sm:$0xf0]  ;;  %v7186_v29 = vor.u32 %v8128_v18, %v7183_v21 }
 0x1b7   :  { %4570 = vmatpush.bf16.msra.mxu2 %v6866_v34  ;;  %v2885_v49 = vadd.f32 %v2884_v20, %v2871_v19  ;;  %v8028_v34 = vld [vmem:[#allocation8 + $0x144] sm:$0xf]  ;;  %v6911_v47 = vld [vmem:[#allocation8 + $0x250] sm:$0xf0]  ;;  %v7362_v19 = vor.u32 %v8172_v37, %v7359_v31  ;;  %v8047_v31 = vld [vmem:[#allocation8 + $0x1d4] sm:$0xf0] }
 0x1b8   :  { %4559 = vmatpush.bf16.msrb.mxu3 %v6690_v10  ;;  %v6802_v10 = vor.u32 %v8032_v59, %v6799_v32  ;;  %v8124_v59 = vld [vmem:[#allocation8 + $0x444] sm:$0xf]  ;;  %v7167_v32 = vld [vmem:[#allocation8 + $0x450] sm:$0xf0] }
 0x1b9   :  { %4584 = vmatpush.bf16.msrb.mxu0 %v6994_v30  ;;  %v3094_v0 = vmax.f32 %v2885_v49, 0.0  ;;  %v7502_v30 = vor.u32 %v8210_v25, %v7501_v24  ;;  %v8056_v49 = vld [vmem:[#allocation8 + $0x224] sm:$0xf]  ;;  %v7170_v3 = vor.u32 %v8124_v59, %v7167_v32  ;;  %v7295_v24 = vld [vmem:[#allocation8 + $0x550] sm:$0xf0] }
 0x1ba   :  { %v8156_v37 = vld [vmem:[#allocation8 + $0x544] sm:$0xf]  ;;  %v7437_v25 = vld [vmem:[#allocation8 + $0x660] sm:$0xf] }
 0x1bb   :  { %4571 = vmatpush.bf16.msra.mxu2 %v6850_v43  ;;  %v8787_v4 = vpack.c.bf16 %v3094_v0, %v3087_v44  ;;  %v8024_v43 = vld [vmem:[#allocation8 + $0x124] sm:$0xf]  ;;  %4542 = vmatpush.bf16.msrb.mxu1 %v7502_v30  ;;  %v2897_v44 = vadd.f32 %v2896_v5, %v620_v54  ;;  %v6837_v54 = vld [vmem:[#allocation8 + $0x1a8] sm:$0xf] }
 0x1bc   :  { %4560 = vmatpush.bf16.msrb.mxu3 %v6674_v39  ;;  %v6786_v39 = vor.u32 %v8028_v34, %v6783_v61  ;;  %v6770_v60 = vor.u32 %v8024_v43, %v6767_v2  ;;  %v2910_v27 = vpop.f32.mrf.mxu2  ;;  %v8120_v34 = vld [vmem:[#allocation8 + $0x424] sm:$0xf]  ;;  %v7151_v61 = vld [vmem:[#allocation8 + $0x430] sm:$0xf0] }
 0x1bd   :  { %4585 = vmatpush.bf16.msrb.mxu0 %v6978_v63  ;;  %4522 = vmatmul.bf16.vlgmr.msrb.gmra.mxu2 %v8787_v4  ;;  %v6898_v63 = vor.u32 %v8056_v49, %v6895_v36  ;;  %v6879_v2 = vld [vmem:[#allocation8 + $0x210] sm:$0xf0]  ;;  %v8116_v5 = vld [vmem:[#allocation8 + $0x404] sm:$0xf] }
 0x1be   :  { %v6882_v12 = vor.u32 %v8052_v62, %v6879_v2  ;;  %v8083_v62 = vld [vmem:[#allocation8 + $0x2f4] sm:$0xf0] }
 0x1bf   :  { %4572 = vmatpush.bf16.msra.mxu2 %v6834_v41  ;;  %v7375_v41 = vld [vmem:[#allocation8 + $0x5f0] sm:$0xf0] }
 0x1c0   :  { %4561 = vmatpush.bf16.msrb.mxu3 %v6658_v42  ;;  %v6943_v42 = vld [vmem:[#allocation8 + $0x290] sm:$0xf0] }
 0x1c1   :  { %4586 = vmatpush.bf16.msrb.mxu0 %v6962_v8  ;;  %v6946_v7 = vor.u32 %v8068_v45, %v6943_v42  ;;  %v7154_v8 = vor.u32 %v8120_v34, %v7151_v61  ;;  %v2911_v45 = vadd.f32 %v2910_v27, %v2897_v44  ;;  %v6853_v27 = vld [vmem:[#allocation8 + $0x1c8] sm:$0xf] }
 0x1c2   :  { %v6854_v59 = vor.u32 %v8047_v31, %v6853_v27  ;;  %v6821_v44 = vld [vmem:[#allocation8 + $0x188] sm:$0xf] }
 0x1c3   :  { %4573 = vmatpush.bf16.msra.mxu2 %v6818_v15  ;;  %v8060_v15 = vld [vmem:[#allocation8 + $0x244] sm:$0xf]  ;;  %v6965_v31 = vld [vmem:[#allocation8 + $0x2a8] sm:$0xf] }
 0x1c4   :  { %4562 = vmatpush.bf16.msrb.mxu3 %v6642_v33  ;;  %v7378_v33 = vor.u32 %v8176_v35, %v7375_v41  ;;  %v6914_v20 = vor.u32 %v8060_v15, %v6911_v47  ;;  %v7311_v41 = vld [vmem:[#allocation8 + $0x570] sm:$0xf0] }
 0x1c5   :  { %4587 = vmatpush.bf16.msrb.mxu0 %v6946_v7  ;;  %v8051_v7 = vld [vmem:[#allocation8 + $0x1f4] sm:$0xf0] }
 0x1c6   :  { %v2938_v56 = vpop.f32.mrf.mxu1  ;;  %v6870_v21 = vor.u32 %v8051_v7, %v6869_v52  ;;  %v6981_v7 = vld [vmem:[#allocation8 + $0x2c8] sm:$0xf] }
 0x1c7   :  { %4574 = vmatpush.bf16.msra.mxu2 %v6802_v10  ;;  %v8206_v10 = vld [vmem:[#allocation8 + $0x6cc] sm:$0xf0] }
 0x1c8   :  { %4563 = vmatpush.bf16.msrb.mxu3 %v6626_v55  ;;  %v8168_v55 = vld [vmem:[#allocation8 + $0x5a4] sm:$0xf]  ;;  %v7486_v28 = vor.u32 %v8206_v10, %v7485_v16  ;;  %v7421_v16 = vld [vmem:[#allocation8 + $0x640] sm:$0xf]  ;;  %v8190_v10 = vld [vmem:[#allocation8 + $0x64c] sm:$0xf0] }
 0x1c9   :  { %4588 = vmatpush.bf16.msrb.mxu0 %v6930_v26  ;;  %v2952_v35 = vpop.f32.mrf.mxu0 }
 0x1ca   :  { %v2924_v23 = vpop.f32.mrf.mxu3  ;;  %4543 = vmatpush.bf16.msrb.mxu1 %v7486_v28 }
 0x1cb   :  { %4564 = vmatmul.bf16.vlgmr.msrb.gmra.mxu3 %v8768_v22  ;;  %4575 = vmatpush.bf16.msra.mxu2 %v6786_v39  ;;  %v8202_v39 = vld [vmem:[#allocation8 + $0x6ac] sm:$0xf0]  ;;  %v2925_v26 = vadd.f32 %v2924_v23, %v2911_v45  ;;  %v8152_v23 = vld [vmem:[#allocation8 + $0x524] sm:$0xf]  ;;  %v7389_v45 = vld [vmem:[#allocation8 + $0x600] sm:$0xf] }
 0x1cc   :  { %4612 = vmatpush.bf16.msra.mxu3 %v7250_v50  ;;  %v7343_v50 = vld [vmem:[#allocation8 + $0x5b0] sm:$0xf0]  ;;  %v7470_v43 = vor.u32 %v8202_v39, %v7469_v1  ;;  %v6997_v39 = vld [vmem:[#allocation8 + $0x2e8] sm:$0xf] }
 0x1cd   :  { %4589 = vmatpush.bf16.msrb.mxu0 %v6914_v20  ;;  %v7346_v0 = vor.u32 %v8168_v55, %v7343_v50  ;;  %v2939_v32 = vadd.f32 %v2938_v56, %v2925_v26  ;;  %v7298_v20 = vor.u32 %v8156_v37, %v7295_v24  ;;  %v7279_v50 = vld [vmem:[#allocation8 + $0x530] sm:$0xf0]  ;;  %v8186_v56 = vld [vmem:[#allocation8 + $0x62c] sm:$0xf0]  ;;  %v6789_v26 = vld [vmem:[#allocation8 + $0x148] sm:$0xf] }
 0x1ce   :  { %4544 = vmatpush.bf16.msrb.mxu1 %v7470_v43  ;;  %v2940_v47 = vpop.f32.mrf.mxu1  ;;  %v7282_v61 = vor.u32 %v8152_v23, %v7279_v50  ;;  %v8075_v24 = vld [vmem:[#allocation8 + $0x2b4] sm:$0xf0]  ;;  %v6773_v23 = vld [vmem:[#allocation8 + $0x128] sm:$0xf] }
 0x1cf   :  { %4576 = vmatpush.bf16.msra.mxu2 %v6770_v60  ;;  %v7135_v60 = vld [vmem:[#allocation8 + $0x410] sm:$0xf0]  ;;  %v2953_v34 = vadd.f32 %v2952_v35, %v2939_v32  ;;  %v8079_v35 = vld [vmem:[#allocation8 + $0x2d4] sm:$0xf0]  ;;  %v6949_v50 = vld [vmem:[#allocation8 + $0x288] sm:$0xf] }
 0x1d0   :  { %4613 = vmatpush.bf16.msra.mxu3 %v7234_v6  ;;  %v7327_v6 = vld [vmem:[#allocation8 + $0x590] sm:$0xf0]  ;;  %v6982_v27 = vor.u32 %v8079_v35, %v6981_v7 }
 0x1d1   :  { %4590 = vmatpush.bf16.msrb.mxu0 %v6898_v63  ;;  %v7330_v42 = vor.u32 %v8164_v57, %v7327_v6  ;;  %v2954_v28 = vpop.f32.mrf.mxu0  ;;  %v8148_v63 = vld [vmem:[#allocation8 + $0x504] sm:$0xf]  ;;  %v7263_v57 = vld [vmem:[#allocation8 + $0x510] sm:$0xf0]  ;;  %v7405_v6 = vld [vmem:[#allocation8 + $0x620] sm:$0xf] }
 0x1d2   :  { %v2926_v53 = vpop.f32.mrf.mxu3  ;;  %v7266_v2 = vor.u32 %v8148_v63, %v7263_v57  ;;  %v8023_v63 = vld [vmem:[#allocation8 + $0x114] sm:$0xf0] }
 0x1d3   :  { %4577 = vmatpush.bf16.msra.mxu2 %v6754_v51  ;;  %v7138_v51 = vor.u32 %v8116_v5, %v7135_v60  ;;  %v6998_v60 = vor.u32 %v8083_v62, %v6997_v39  ;;  %v8067_v39 = vld [vmem:[#allocation8 + $0x274] sm:$0xf0]  ;;  %v8100_v62 = vld [vmem:[#allocation8 + $0x384] sm:$0xf] }
 0x1d4   :  { %4614 = vmatpush.bf16.msra.mxu3 %v7218_v9  ;;  %v2912_v9 = vpop.f32.mrf.mxu2 }
 0x1d5   :  { %v2913_v17 = vadd.f32 %v2912_v9, %v2899_v48  ;;  %4591 = vmatpush.bf16.msrb.mxu0 %v6882_v12  ;;  %v7406_v48 = vor.u32 %v8186_v56, %v7405_v6  ;;  %v6805_v9 = vld [vmem:[#allocation8 + $0x168] sm:$0xf] }
 0x1d6   :  { %4578 = vmatmul.bf16.vlgmr.msra.gmra.mxu2 %v8755_v46  ;;  %v6933_v6 = vld [vmem:[#allocation8 + $0x268] sm:$0xf] }
 0x1d7   :  { %4626 = vmatpush.bf16.msrb.mxu2 %v7378_v33  ;;  %v7314_v33 = vor.u32 %v8160_v13, %v7311_v41  ;;  %v2927_v30 = vadd.f32 %v2926_v53, %v2913_v17  ;;  %v8035_v53 = vld [vmem:[#allocation8 + $0x174] sm:$0xf0]  ;;  %v8112_v17 = vld [vmem:[#allocation8 + $0x3e4] sm:$0xf]  ;;  %v7381_v56 = vld [vmem:[#allocation8 + $0x5e8] sm:$0xf] }
 0x1d8   :  { %4615 = vmatpush.bf16.msra.mxu3 %v7202_v11  ;;  %v7453_v11 = vld [vmem:[#allocation8 + $0x680] sm:$0xf] }
 0x1d9   :  { %v7454_v18 = vor.u32 %v8198_v40, %v7453_v11  ;;  %v2941_v49 = vadd.f32 %v2940_v47, %v2927_v30  ;;  %v8208_v11 = vld [vmem:[#allocation8 + $0x6e4] sm:$0xf]  ;;  %v6806_v40 = vor.u32 %v8035_v53, %v6805_v9  ;;  %v7455_v9 = vld [vmem:[#allocation8 + $0x690] sm:$0xf0] }
 0x1da   :  { %v2980_v38 = vpop.f32.mrf.mxu3  ;;  %v8108_v30 = vld [vmem:[#allocation8 + $0x3c4] sm:$0xf] }
 0x1db   :  { %4627 = vmatpush.bf16.msrb.mxu2 %v7362_v19  ;;  %4545 = vmatpush.bf16.msrb.mxu1 %v7454_v18  ;;  %v8043_v19 = vld [vmem:[#allocation8 + $0x1b4] sm:$0xf0]  ;;  %v2955_v1 = vadd.f32 %v2954_v28, %v2941_v49  ;;  %v7087_v49 = vld [vmem:[#allocation8 + $0x3b0] sm:$0xf0]  ;;  %v8200_v28 = vld [vmem:[#allocation8 + $0x6a4] sm:$0xf] }
 0x1dc   :  { %4616 = vmatpush.bf16.msra.mxu3 %v7186_v29  ;;  %v8194_v29 = vld [vmem:[#allocation8 + $0x66c] sm:$0xf0]  ;;  %v2966_v55 = vpop.f32.mrf.mxu2  ;;  %v6838_v36 = vor.u32 %v8043_v19, %v6837_v54  ;;  %v8027_v54 = vld [vmem:[#allocation8 + $0x134] sm:$0xf0] }
 0x1dd   :  { %v7438_v15 = vor.u32 %v8194_v29, %v7437_v25  ;;  %v2967_v43 = vadd.f32 %v2966_v55, %v2953_v34  ;;  %v6966_v55 = vor.u32 %v8075_v24, %v6965_v31  ;;  %v7471_v34 = vld [vmem:[#allocation8 + $0x6b0] sm:$0xf0]  ;;  %v8171_v31 = vld [vmem:[#allocation8 + $0x5b4] sm:$0xf0] }
 0x1de   :  { %v8059_v24 = vld [vmem:[#allocation8 + $0x234] sm:$0xf0] }
 0x1df   :  { %4628 = vmatpush.bf16.msrb.mxu2 %v7346_v0  ;;  %4546 = vmatpush.bf16.msrb.mxu1 %v7438_v15  ;;  %v8039_v0 = vld [vmem:[#allocation8 + $0x194] sm:$0xf0]  ;;  %v2981_v52 = vadd.f32 %v2980_v38, %v2967_v43  ;;  %v7103_v15 = vld [vmem:[#allocation8 + $0x3d0] sm:$0xf0]  ;;  %v8204_v38 = vld [vmem:[#allocation8 + $0x6c4] sm:$0xf] }
 0x1e0   :  { %4617 = vmatpush.bf16.msra.mxu3 %v7170_v3  ;;  %v7422_v3 = vor.u32 %v8190_v10, %v7421_v16  ;;  %v7106_v19 = vor.u32 %v8108_v30, %v7103_v15  ;;  %v8071_v16 = vld [vmem:[#allocation8 + $0x294] sm:$0xf0]  ;;  %v8104_v10 = vld [vmem:[#allocation8 + $0x3a4] sm:$0xf] }
 0x1e1   :  { %v3088_v25 = vmax.f32 %v2981_v52, 0.0  ;;  %v8063_v52 = vld [vmem:[#allocation8 + $0x254] sm:$0xf0] }
 0x1e2   :  { %v2982_v12 = vpop.f32.mrf.mxu3 }
 0x1e3   :  { %4629 = vmatpush.bf16.msrb.mxu2 %v7330_v42  ;;  %4547 = vmatpush.bf16.msrb.mxu1 %v7422_v3  ;;  %v8182_v42 = vld [vmem:[#allocation8 + $0x60c] sm:$0xf0] }
 0x1e4   :  { %4618 = vmatpush.bf16.msra.mxu3 %v7154_v8  ;;  %v6822_v8 = vor.u32 %v8039_v0, %v6821_v44  ;;  %v2968_v5 = vpop.f32.mrf.mxu2  ;;  %v7390_v41 = vor.u32 %v8182_v42, %v7389_v45  ;;  %v7090_v44 = vor.u32 %v8104_v10, %v7087_v49  ;;  %v6950_v0 = vor.u32 %v8071_v16, %v6949_v50  ;;  %v7365_v45 = vld [vmem:[#allocation8 + $0x5c8] sm:$0xf]  ;;  %v8175_v42 = vld [vmem:[#allocation8 + $0x5d4] sm:$0xf0] }
 0x1e5   :  { %v2969_v13 = vadd.f32 %v2968_v5, %v2955_v1  ;;  %v8179_v1 = vld [vmem:[#allocation8 + $0x5f4] sm:$0xf0]  ;;  %v6885_v50 = vld [vmem:[#allocation8 + $0x208] sm:$0xf] }
 0x1e6   :  { %v2994_v57 = vpop.f32.mrf.mxu1  ;;  %v7382_v53 = vor.u32 %v8179_v1, %v7381_v56  ;;  %v8055_v16 = vld [vmem:[#allocation8 + $0x214] sm:$0xf0]  ;;  %v7509_v10 = vld [vmem:[#allocation8 + $0x6e8] sm:$0xf] }
 0x1e7   :  { %4630 = vmatpush.bf16.msrb.mxu2 %v7314_v33  ;;  %4548 = vmatpush.bf16.msrb.mxu1 %v7406_v48  ;;  %v2983_v18 = vadd.f32 %v2982_v12, %v2969_v13  ;;  %v8031_v33 = vld [vmem:[#allocation8 + $0x154] sm:$0xf0]  ;;  %v7071_v48 = vld [vmem:[#allocation8 + $0x390] sm:$0xf0]  ;;  %v6934_v12 = vor.u32 %v8067_v39, %v6933_v6  ;;  %v6917_v13 = vld [vmem:[#allocation8 + $0x248] sm:$0xf]  ;;  %v6886_v56 = vor.u32 %v8055_v16, %v6885_v50 }
 0x1e8   :  { %4619 = vmatpush.bf16.msra.mxu3 %v7138_v51  ;;  %v7119_v51 = vld [vmem:[#allocation8 + $0x3f0] sm:$0xf0]  ;;  %v7074_v5 = vor.u32 %v8100_v62, %v7071_v48  ;;  %v7317_v1 = vld [vmem:[#allocation8 + $0x568] sm:$0xf]  ;;  %v8163_v39 = vld [vmem:[#allocation8 + $0x574] sm:$0xf0] }
 0x1e9   :  { %v7122_v37 = vor.u32 %v8112_v17, %v7119_v51  ;;  %v3095_v29 = vmax.f32 %v2983_v18, 0.0  ;;  %v8192_v51 = vld [vmem:[#allocation8 + $0x664] sm:$0xf]  ;;  %v7439_v18 = vld [vmem:[#allocation8 + $0x670] sm:$0xf0] }
 0x1ea   :  { %v7442_v15 = vor.u32 %v8192_v51, %v7439_v18  ;;  %v7477_v18 = vld [vmem:[#allocation8 + $0x6a8] sm:$0xf]  ;;  %v8107_v16 = vld [vmem:[#allocation8 + $0x3b4] sm:$0xf0] }
 0x1eb   :  { %4620 = vmatmul.bf16.vlgmr.msra.gmra.mxu3 %v8787_v4  ;;  %4631 = vmatpush.bf16.msrb.mxu2 %v7298_v20  ;;  %v8794_v32 = vpack.c.bf16 %v3095_v29, %v3088_v25  ;;  %v7487_v20 = vld [vmem:[#allocation8 + $0x6d0] sm:$0xf0]  ;;  %v8092_v25 = vld [vmem:[#allocation8 + $0x344] sm:$0xf] }
 0x1ec   :  { %4668 = vmatpush.bf16.msrb.mxu3 %v6870_v21  ;;  %v7503_v21 = vld [vmem:[#allocation8 + $0x6f0] sm:$0xf0]  ;;  %4549 = vmatpush.bf16.msrb.mxu1 %v7390_v41  ;;  %v7490_v3 = vor.u32 %v8204_v38, %v7487_v20  ;;  %v8096_v41 = vld [vmem:[#allocation8 + $0x364] sm:$0xf] }
 0x1ed   :  { %v7506_v47 = vor.u32 %v8208_v11, %v7503_v21  ;;  %4536 = vmatmul.bf16.vlgmr.msra.gmra.mxu0 %v8794_v32  ;;  %v7055_v11 = vld [vmem:[#allocation8 + $0x370] sm:$0xf0]  ;;  %v7366_v21 = vor.u32 %v8175_v42, %v7365_v45  ;;  %v8180_v45 = vld [vmem:[#allocation8 + $0x604] sm:$0xf] }
 0x1ee   :  { %v3008_v7 = vpop.f32.mrf.mxu3  ;;  %v7039_v29 = vld [vmem:[#allocation8 + $0x350] sm:$0xf0]  ;;  %v2996_v30 = vpop.f32.mrf.mxu1 }
 0x1ef   :  { %4632 = vmatpush.bf16.msrb.mxu2 %v7282_v61  ;;  %4640 = vmatpush.bf16.msra.mxu0 %v7506_v47  ;;  %v6757_v61 = vld [vmem:[#allocation8 + $0x108] sm:$0xf]  ;;  %v8188_v47 = vld [vmem:[#allocation8 + $0x644] sm:$0xf]  ;;  %v7423_v38 = vld [vmem:[#allocation8 + $0x650] sm:$0xf0]  ;;  %v7042_v20 = vor.u32 %v8092_v25, %v7039_v29 }
 0x1f0   :  { %4669 = vmatpush.bf16.msrb.mxu3 %v6854_v59  ;;  %4598 = vmatpush.bf16.msra.mxu1 %v7122_v37  ;;  %v6790_v59 = vor.u32 %v8031_v33, %v6789_v26  ;;  %v6758_v43 = vor.u32 %v8023_v63, %v6757_v61  ;;  %v7058_v26 = vor.u32 %v8096_v41, %v7055_v11  ;;  %v6901_v37 = vld [vmem:[#allocation8 + $0x228] sm:$0xf]  ;;  %v8184_v61 = vld [vmem:[#allocation8 + $0x624] sm:$0xf]  ;;  %v7407_v63 = vld [vmem:[#allocation8 + $0x630] sm:$0xf0] }
 0x1f1   :  { %v6918_v33 = vor.u32 %v8063_v52, %v6917_v13  ;;  %v7391_v42 = vld [vmem:[#allocation8 + $0x610] sm:$0xf0]  ;;  %v7125_v13 = vld [vmem:[#allocation8 + $0x3e8] sm:$0xf]  ;;  %v7318_v52 = vor.u32 %v8163_v39, %v7317_v1  ;;  %v8159_v11 = vld [vmem:[#allocation8 + $0x554] sm:$0xf0] }
 0x1f2   :  { %v7301_v41 = vld [vmem:[#allocation8 + $0x548] sm:$0xf]  ;;  %v8111_v25 = vld [vmem:[#allocation8 + $0x3d4] sm:$0xf0] }
 0x1f3   :  { %4633 = vmatpush.bf16.msrb.mxu2 %v7266_v2  ;;  %4641 = vmatpush.bf16.msra.mxu0 %v7490_v3  ;;  %v8196_v2 = vld [vmem:[#allocation8 + $0x684] sm:$0xf]  ;;  %v8211_v3 = vld [vmem:[#allocation8 + $0x6f4] sm:$0xf0]  ;;  %v7285_v29 = vld [vmem:[#allocation8 + $0x528] sm:$0xf] }
 0x1f4   :  { %4670 = vmatpush.bf16.msrb.mxu3 %v6838_v36  ;;  %v6774_v36 = vor.u32 %v8027_v54, %v6773_v23  ;;  %4599 = vmatpush.bf16.msra.mxu1 %v7106_v19  ;;  %v7458_v35 = vor.u32 %v8196_v2, %v7455_v9  ;;  %v6902_v23 = vor.u32 %v8059_v24, %v6901_v37  ;;  %v7333_v54 = vld [vmem:[#allocation8 + $0x588] sm:$0xf]  ;;  %v8167_v19 = vld [vmem:[#allocation8 + $0x594] sm:$0xf0]  ;;  %v7007_v2 = vld [vmem:[#allocation8 + $0x310] sm:$0xf0] }
 0x1f5   :  { %v7493_v9 = vld [vmem:[#allocation8 + $0x6c8] sm:$0xf]  ;;  %v8103_v39 = vld [vmem:[#allocation8 + $0x394] sm:$0xf0] }
 0x1f6   :  { %4634 = vmatmul.bf16.vlgmr.msrb.gmra.mxu2 %v8794_v32  ;;  %v7109_v37 = vld [vmem:[#allocation8 + $0x3c8] sm:$0xf] }
 0x1f7   :  { %4682 = vmatpush.bf16.msra.mxu2 %v6998_v60  ;;  %v8798_v60 = vpop.f32.mrf.mxu0  ;;  %v7077_v1 = vld [vmem:[#allocation8 + $0x388] sm:$0xf] }
 0x1f8   :  { %4671 = vmatpush.bf16.msrb.mxu3 %v6822_v8  ;;  %v7474_v8 = vor.u32 %v8200_v28, %v7471_v34  ;;  %4600 = vmatpush.bf16.msra.mxu1 %v7090_v44  ;;  %v7426_v28 = vor.u32 %v8188_v47, %v7423_v38  ;;  %v7023_v34 = vld [vmem:[#allocation8 + $0x330] sm:$0xf0]  ;;  %v7334_v44 = vor.u32 %v8167_v19, %v7333_v54  ;;  %v7093_v19 = vld [vmem:[#allocation8 + $0x3a8] sm:$0xf] }
 0x1f9   :  { %v3036_v6 = vpop.f32.mrf.mxu2  ;;  %v7110_v54 = vor.u32 %v8111_v25, %v7109_v37  ;;  %v7045_v25 = vld [vmem:[#allocation8 + $0x348] sm:$0xf] }
 0x1fa   :  { %4642 = vmatpush.bf16.msra.mxu0 %v7474_v8  ;;  %v7510_v8 = vor.u32 %v8211_v3, %v7509_v10  ;;  %v7269_v10 = vld [vmem:[#allocation8 + $0x508] sm:$0xf]  ;;  %v8151_v3 = vld [vmem:[#allocation8 + $0x514] sm:$0xf0] }
 0x1fb   :  { %4683 = vmatpush.bf16.msra.mxu2 %v6982_v27  ;;  %v7349_v27 = vld [vmem:[#allocation8 + $0x5a8] sm:$0xf] }
 0x1fc   :  { %4672 = vmatpush.bf16.msrb.mxu3 %v6806_v40  ;;  %v8272_v40 = vld [vmem:[#allocation7] sm:$0xff]  ;;  %4601 = vmatpush.bf16.msra.mxu1 %v7074_v5 }
 0x1fd   :  { %v621_v17 = vperm.slane %v8272_v40, 6  ;;  %4592 = vmatmul.bf16.vlgmr.msrb.gmra.mxu0 %v8781_v14 }
 0x1fe   :  { %4643 = vmatpush.bf16.msra.mxu0 %v7458_v35  ;;  %v8115_v35 = vld [vmem:[#allocation8 + $0x3f4] sm:$0xf0] }
 0x1ff   :  { %4684 = vmatpush.bf16.msra.mxu2 %v6966_v55  ;;  %v2995_v55 = vadd.f32 %v2994_v57, %v621_v17  ;;  %v3024_v49 = vpop.f32.mrf.mxu0  ;;  %v3010_v57 = vpop.f32.mrf.mxu3  ;;  %v2997_v48 = vadd.f32 %v2996_v30, %v621_v17  ;;  %v8155_v30 = vld [vmem:[#allocation8 + $0x534] sm:$0xf0] }
 0x200   :  { %4673 = vmatpush.bf16.msrb.mxu3 %v6790_v59  ;;  %v7350_v59 = vor.u32 %v8171_v31, %v7349_v27  ;;  %4602 = vmatpush.bf16.msra.mxu1 %v7058_v26  ;;  %v7394_v26 = vor.u32 %v8180_v45, %v7391_v42  ;;  %v7302_v27 = vor.u32 %v8159_v11, %v7301_v41  ;;  %v8099_v41 = vld [vmem:[#allocation8 + $0x374] sm:$0xf0] }
 0x201   :  { %v3009_v62 = vadd.f32 %v3008_v7, %v2995_v55  ;;  %v3011_v17 = vadd.f32 %v3010_v57, %v2997_v48  ;;  %v3038_v38 = vpop.f32.mrf.mxu2  ;;  %v7286_v55 = vor.u32 %v8155_v30, %v7285_v29  ;;  %v7270_v57 = vor.u32 %v8151_v3, %v7269_v10  ;;  %v8095_v29 = vld [vmem:[#allocation8 + $0x354] sm:$0xf0] }
 0x202   :  { %4644 = vmatpush.bf16.msra.mxu0 %v7442_v15  ;;  %v7078_v42 = vor.u32 %v8103_v39, %v7077_v1  ;;  %v8091_v10 = vld [vmem:[#allocation8 + $0x334] sm:$0xf0]  ;;  %v8017_v39 = vld [vmem:[#allocation8 + $0xec] sm:$0xf] }
 0x203   :  { %4685 = vmatpush.bf16.msra.mxu2 %v6950_v0  ;;  %v3023_v40 = vadd.f32 %v8798_v60, %v3009_v62  ;;  %v3025_v15 = vadd.f32 %v3024_v49, %v3011_v17  ;;  %v8087_v1 = vld [vmem:[#allocation8 + $0x314] sm:$0xf0] }
 0x204   :  { %4674 = vmatpush.bf16.msrb.mxu3 %v6774_v36  ;;  %v8088_v36 = vld [vmem:[#allocation8 + $0x324] sm:$0xf]  ;;  %4603 = vmatpush.bf16.msra.mxu1 %v7042_v20  ;;  %v8199_v20 = vld [vmem:[#allocation8 + $0x694] sm:$0xf0] }
 0x205   :  { %v7026_v0 = vor.u32 %v8088_v36, %v7023_v34  ;;  %v3037_v60 = vadd.f32 %v3036_v6, %v3023_v40  ;;  %v8081_v34 = vld [vmem:[#allocation8 + $0x2ec] sm:$0xf]  ;;  %v7094_v6 = vor.u32 %v8107_v16, %v7093_v19  ;;  %v7046_v19 = vor.u32 %v8095_v29, %v7045_v25  ;;  %v7029_v16 = vld [vmem:[#allocation8 + $0x328] sm:$0xf]  ;;  %v6887_v29 = vld [vmem:[#allocation8 + $0x218] sm:$0xf0] }
 0x206   :  { %4645 = vmatpush.bf16.msra.mxu0 %v7426_v28  ;;  %v3050_v5 = vpop.f32.mrf.mxu1  ;;  %v3039_v28 = vadd.f32 %v3038_v38, %v3025_v15  ;;  %v8069_v15 = vld [vmem:[#allocation8 + $0x28c] sm:$0xf]  ;;  %v7397_v38 = vld [vmem:[#allocation8 + $0x608] sm:$0xf] }
 0x207   :  { %4686 = vmatpush.bf16.msra.mxu2 %v6934_v12  ;;  %v7410_v12 = vor.u32 %v8184_v61, %v7407_v63  ;;  %v3078_v31 = vpop.f32.mrf.mxu0  ;;  %v6999_v61 = vld [vmem:[#allocation8 + $0x2f8] sm:$0xf0]  ;;  %v7445_v63 = vld [vmem:[#allocation8 + $0x668] sm:$0xf]  ;;  %v8053_v25 = vld [vmem:[#allocation8 + $0x20c] sm:$0xf] }
 0x208   :  { %4675 = vmatpush.bf16.msrb.mxu3 %v6758_v43  ;;  %v8084_v43 = vld [vmem:[#allocation8 + $0x304] sm:$0xf]  ;;  %4604 = vmatpush.bf16.msra.mxu1 %v7026_v0  ;;  %v7002_v62 = vor.u32 %v8081_v34, %v6999_v61  ;;  %v8109_v61 = vld [vmem:[#allocation8 + $0x3cc] sm:$0xf] }
 0x209   :  { %v7010_v7 = vor.u32 %v8084_v43, %v7007_v2  ;;  %v8077_v2 = vld [vmem:[#allocation8 + $0x2cc] sm:$0xf] }
 0x20a   :  { %4646 = vmatpush.bf16.msra.mxu0 %v7410_v12  ;;  %v8191_v12 = vld [vmem:[#allocation8 + $0x654] sm:$0xf0] }
 0x20b   :  { %4676 = vmatmul.bf16.vlgmr.msrb.gmra.mxu3 %v8755_v46  ;;  %4687 = vmatpush.bf16.msra.mxu2 %v6918_v33  ;;  %v7126_v33 = vor.u32 %v8115_v35, %v7125_v13  ;;  %v6741_v13 = vld [vmem:[#allocation8 + $0xe8] sm:$0xf] }
 0x20c   :  { %4724 = vmatpush.bf16.msra.mxu3 %v7382_v53  ;;  %v8207_v53 = vld [vmem:[#allocation8 + $0x6d4] sm:$0xf0]  ;;  %4605 = vmatpush.bf16.msra.mxu1 %v7010_v7  ;;  %v7061_v35 = vld [vmem:[#allocation8 + $0x368] sm:$0xf] }
 0x20d   :  { %v7494_v51 = vor.u32 %v8207_v53, %v7493_v9  ;;  %v6983_v9 = vld [vmem:[#allocation8 + $0x2d8] sm:$0xf0] }
 0x20e   :  { %v3064_v24 = vpop.f32.mrf.mxu3  ;;  %4647 = vmatpush.bf16.msra.mxu0 %v7394_v26  ;;  %v3052_v50 = vpop.f32.mrf.mxu1  ;;  %v6986_v11 = vor.u32 %v8077_v2, %v6983_v9  ;;  %v8187_v26 = vld [vmem:[#allocation8 + $0x634] sm:$0xf0]  ;;  %v8105_v9 = vld [vmem:[#allocation8 + $0x3ac] sm:$0xf] }
 0x20f   :  { %4688 = vmatpush.bf16.msra.mxu2 %v6902_v23  ;;  %v3051_v23 = vadd.f32 %v3050_v5, %v3037_v60  ;;  %v3053_v0 = vadd.f32 %v3052_v50, %v3039_v28  ;;  %v3080_v53 = vpop.f32.mrf.mxu0  ;;  %v7429_v5 = vld [vmem:[#allocation8 + $0x648] sm:$0xf]  ;;  %v8011_v50 = vld [vmem:[#allocation8 + $0xb4] sm:$0xf0] }
 0x210   :  { %4725 = vmatpush.bf16.msra.mxu3 %v7366_v21  ;;  %v8203_v21 = vld [vmem:[#allocation8 + $0x6b4] sm:$0xf0]  ;;  %v7430_v40 = vor.u32 %v8191_v12, %v7429_v5  ;;  %v7095_v5 = vld [vmem:[#allocation8 + $0x3b8] sm:$0xf0] }
 0x211   :  { %v7478_v47 = vor.u32 %v8203_v21, %v7477_v18  ;;  %v3065_v49 = vadd.f32 %v3064_v24, %v3051_v23  ;;  %v6967_v18 = vld [vmem:[#allocation8 + $0x2b8] sm:$0xf0]  ;;  %v7413_v21 = vld [vmem:[#allocation8 + $0x628] sm:$0xf]  ;;  %v8015_v24 = vld [vmem:[#allocation8 + $0xd4] sm:$0xf0] }
 0x212   :  { %4696 = vmatpush.bf16.msrb.mxu0 %v7126_v33  ;;  %v7414_v60 = vor.u32 %v8187_v26, %v7413_v21  ;;  %v6661_v21 = vld [vmem:[#allocation8 + $0x48] sm:$0xf]  ;;  %v7999_v26 = vld [vmem:[#allocation8 + $0x54] sm:$0xf0] }
 0x213   :  { %4689 = vmatpush.bf16.msra.mxu2 %v6886_v56  ;;  %v3079_v48 = vadd.f32 %v3078_v31, %v3065_v49  ;;  %v6725_v31 = vld [vmem:[#allocation8 + $0xc8] sm:$0xf]  ;;  %v6935_v49 = vld [vmem:[#allocation8 + $0x278] sm:$0xf0] }
 0x214   :  { %4726 = vmatpush.bf16.msra.mxu3 %v7350_v59  ;;  %v7461_v59 = vld [vmem:[#allocation8 + $0x688] sm:$0xf]  ;;  %v6726_v23 = vor.u32 %v8015_v24, %v6725_v31  ;;  %v6711_v24 = vld [vmem:[#allocation8 + $0xb8] sm:$0xf0] }
 0x215   :  { %v7462_v36 = vor.u32 %v8199_v20, %v7461_v59  ;;  %v3089_v7 = vmax.f32 %v3079_v48, 0.0  ;;  %v8183_v59 = vld [vmem:[#allocation8 + $0x614] sm:$0xf0]  ;;  %v8113_v20 = vld [vmem:[#allocation8 + $0x3ec] sm:$0xf] }
 0x216   :  { %4690 = vmatmul.bf16.vlgmr.msra.gmra.mxu2 %v8781_v14  ;;  %4697 = vmatpush.bf16.msrb.mxu0 %v7110_v54  ;;  %v3066_v56 = vpop.f32.mrf.mxu3  ;;  %v7127_v54 = vld [vmem:[#allocation8 + $0x3f8] sm:$0xf0]  ;;  %v7398_v28 = vor.u32 %v8183_v59, %v7397_v38 }
 0x217   :  { %4738 = vmatpush.bf16.msrb.mxu2 %v7510_v8  ;;  %v3067_v43 = vadd.f32 %v3066_v56, %v3053_v0  ;;  %v7130_v34 = vor.u32 %v8113_v20, %v7127_v54  ;;  %v7030_v0 = vor.u32 %v8091_v10, %v7029_v16  ;;  %v7013_v56 = vld [vmem:[#allocation8 + $0x308] sm:$0xf]  ;;  %v6743_v48 = vld [vmem:[#allocation8 + $0xf8] sm:$0xf0] }
 0x218   :  { %4727 = vmatpush.bf16.msra.mxu3 %v7334_v44  ;;  %v8195_v44 = vld [vmem:[#allocation8 + $0x674] sm:$0xf0]  ;;  %v7014_v12 = vor.u32 %v8087_v1, %v7013_v56  ;;  %v7511_v38 = vld [vmem:[#allocation8 + $0x6f8] sm:$0xf0]  ;;  %v6645_v20 = vld [vmem:[#allocation8 + $0x28] sm:$0xf] }
 0x219   :  { %v7446_v8 = vor.u32 %v8195_v44, %v7445_v63  ;;  %v3081_v45 = vadd.f32 %v3080_v53, %v3067_v43  ;;  %v7111_v44 = vld [vmem:[#allocation8 + $0x3d8] sm:$0xf0] }
 0x21a   :  { %4698 = vmatpush.bf16.msrb.mxu0 %v7094_v6  ;;  %v6693_v6 = vld [vmem:[#allocation8 + $0x88] sm:$0xf]  ;;  %v6919_v43 = vld [vmem:[#allocation8 + $0x258] sm:$0xf0]  ;;  %v7114_v2 = vor.u32 %v8109_v61, %v7111_v44 }
 0x21b   :  { %4739 = vmatpush.bf16.msrb.mxu2 %v7494_v51  ;;  %v3096_v17 = vmax.f32 %v3081_v45, 0.0  ;;  %v8073_v51 = vld [vmem:[#allocation8 + $0x2ac] sm:$0xf]  ;;  %v6677_v45 = vld [vmem:[#allocation8 + $0x68] sm:$0xf] }
 0x21c   :  { %4728 = vmatpush.bf16.msra.mxu3 %v7318_v52  ;;  %v8019_v52 = vld [vmem:[#allocation8 + $0xf4] sm:$0xf0]  ;;  %v6970_v30 = vor.u32 %v8073_v51, %v6967_v18  ;;  %v7079_v18 = vld [vmem:[#allocation8 + $0x398] sm:$0xf0]  ;;  %v6629_v61 = vld [vmem:[#allocation8 + $0x8] sm:$0xf] }
 0x21d   :  { %v6742_v33 = vor.u32 %v8019_v52, %v6741_v13  ;;  %v8805_v37 = vpack.c.bf16 %v3096_v17, %v3089_v7  ;;  %v6746_v13 = vor.u32 %v8017_v39, %v6743_v48  ;;  %v8013_v52 = vld [vmem:[#allocation8 + $0xcc] sm:$0xf]  ;;  %v6903_v7 = vld [vmem:[#allocation8 + $0x238] sm:$0xf0] }
 0x21e   :  { %4699 = vmatpush.bf16.msrb.mxu0 %v7078_v42  ;;  %v8003_v42 = vld [vmem:[#allocation8 + $0x74] sm:$0xf0]  ;;  %v8101_v17 = vld [vmem:[#allocation8 + $0x38c] sm:$0xf]  ;;  %v7063_v59 = vld [vmem:[#allocation8 + $0x378] sm:$0xf0] }
 0x21f   :  { %4740 = vmatpush.bf16.msrb.mxu2 %v7478_v47  ;;  %4550 = vmatmul.bf16.vlgmr.msrb.gmra.mxu1 %v8805_v37  ;;  %v6951_v47 = vld [vmem:[#allocation8 + $0x298] sm:$0xf0]  ;;  %v6678_v51 = vor.u32 %v8003_v42, %v6677_v45  ;;  %v8201_v48 = vld [vmem:[#allocation8 + $0x6ac] sm:$0xf] }
 0x220   :  { %4729 = vmatpush.bf16.msra.mxu3 %v7302_v27  ;;  %v7062_v27 = vor.u32 %v8099_v41, %v7061_v35  ;;  %4648 = vmatmul.bf16.vlgmr.msra.gmra.mxu0 %v8805_v37  ;;  %v6954_v3 = vor.u32 %v8069_v15, %v6951_v47  ;;  %v6727_v41 = vld [vmem:[#allocation8 + $0xd8] sm:$0xf0]  ;;  %v6662_v15 = vor.u32 %v7999_v26, %v6661_v21  ;;  %v8209_v47 = vld [vmem:[#allocation8 + $0x6ec] sm:$0xf] }
 0x221   :  { %4654 = vmatpush.bf16.msrb.mxu1 %v6742_v33  ;;  %v6730_v33 = vor.u32 %v8013_v52, %v6727_v41  ;;  %v7514_v16 = vor.u32 %v8209_v47, %v7511_v38  ;;  %v6679_v56 = vld [vmem:[#allocation8 + $0x78] sm:$0xf0]  ;;  %v7997_v45 = vld [vmem:[#allocation8 + $0x4c] sm:$0xf] }
 0x222   :  { %4700 = vmatpush.bf16.msrb.mxu0 %v7062_v27  ;;  %v8009_v27 = vld [vmem:[#allocation8 + $0xac] sm:$0xf]  ;;  %v6663_v42 = vld [vmem:[#allocation8 + $0x58] sm:$0xf0] }
 0x223   :  { %4741 = vmatpush.bf16.msrb.mxu2 %v7462_v36  ;;  %v8065_v36 = vld [vmem:[#allocation8 + $0x26c] sm:$0xf]  ;;  %v6714_v54 = vor.u32 %v8009_v27, %v6711_v24  ;;  %v7463_v41 = vld [vmem:[#allocation8 + $0x698] sm:$0xf0] }
 0x224   :  { %4730 = vmatpush.bf16.msra.mxu3 %v7286_v55  ;;  %v6709_v55 = vld [vmem:[#allocation8 + $0xa8] sm:$0xf]  ;;  %v6647_v21 = vld [vmem:[#allocation8 + $0x38] sm:$0xf0]  ;;  %v8193_v27 = vld [vmem:[#allocation8 + $0x66c] sm:$0xf] }
 0x225   :  { %4655 = vmatpush.bf16.msrb.mxu1 %v6726_v23  ;;  %v6710_v63 = vor.u32 %v8011_v50, %v6709_v55  ;;  %v7995_v23 = vld [vmem:[#allocation8 + $0x34] sm:$0xf0]  ;;  %v8005_v55 = vld [vmem:[#allocation8 + $0x8c] sm:$0xf]  ;;  %v6695_v50 = vld [vmem:[#allocation8 + $0x98] sm:$0xf0] }
 0x226   :  { %4701 = vmatpush.bf16.msrb.mxu0 %v7046_v19  ;;  %v6890_v19 = vor.u32 %v8053_v25, %v6887_v29  ;;  %v6698_v44 = vor.u32 %v8005_v55, %v6695_v50  ;;  %v7205_v29 = vld [vmem:[#allocation8 + $0x488] sm:$0xf]  ;;  %v8145_v47 = vld [vmem:[#allocation8 + $0x4ec] sm:$0xf]  ;;  %v8131_v50 = vld [vmem:[#allocation8 + $0x474] sm:$0xf0] }
 0x227   :  { %4742 = vmatpush.bf16.msrb.mxu2 %v7446_v8  ;;  %v8061_v8 = vld [vmem:[#allocation8 + $0x24c] sm:$0xf]  ;;  %v7189_v55 = vld [vmem:[#allocation8 + $0x468] sm:$0xf] }
 0x228   :  { %4731 = vmatpush.bf16.msra.mxu3 %v7270_v57  ;;  %v8007_v57 = vld [vmem:[#allocation8 + $0x94] sm:$0xf0]  ;;  %v6922_v35 = vor.u32 %v8061_v8, %v6919_v43  ;;  %v7479_v8 = vld [vmem:[#allocation8 + $0x6b8] sm:$0xf0]  ;;  %v8089_v43 = vld [vmem:[#allocation8 + $0x32c] sm:$0xf] }
 0x229   :  { %4656 = vmatpush.bf16.msrb.mxu1 %v6710_v63  ;;  %v6694_v53 = vor.u32 %v8007_v57, %v6693_v6  ;;  %v7991_v63 = vld [vmem:[#allocation8 + $0x14] sm:$0xf0]  ;;  %v8001_v57 = vld [vmem:[#allocation8 + $0x6c] sm:$0xf] }
 0x22a   :  { %4702 = vmatpush.bf16.msrb.mxu0 %v7030_v0  ;;  %v7253_v0 = vld [vmem:[#allocation8 + $0x4e8] sm:$0xf]  ;;  %v8147_v6 = vld [vmem:[#allocation8 + $0x4f4] sm:$0xf0] }
 0x22b   :  { %4732 = vmatmul.bf16.vlgmr.msra.gmra.mxu3 %v8794_v32  ;;  %4743 = vmatpush.bf16.msrb.mxu2 %v7430_v40  ;;  %v7098_v40 = vor.u32 %v8105_v9, %v7095_v5  ;;  %v7254_v9 = vor.u32 %v8147_v6, %v7253_v0  ;;  %v7237_v5 = vld [vmem:[#allocation8 + $0x4c8] sm:$0xf]  ;;  %v8137_v0 = vld [vmem:[#allocation8 + $0x4ac] sm:$0xf] }
 0x22c   :  { %4780 = vmatpush.bf16.msrb.mxu3 %v7002_v62  ;;  %v6938_v62 = vor.u32 %v8065_v36, %v6935_v49  ;;  %v8205_v36 = vld [vmem:[#allocation8 + $0x6cc] sm:$0xf]  ;;  %v7495_v49 = vld [vmem:[#allocation8 + $0x6d8] sm:$0xf0] }
 0x22d   :  { %4657 = vmatpush.bf16.msrb.mxu1 %v6694_v53  ;;  %v7498_v1 = vor.u32 %v8205_v36, %v7495_v49  ;;  %v6682_v53 = vor.u32 %v8001_v57, %v6679_v56  ;;  %v8185_v36 = vld [vmem:[#allocation8 + $0x62c] sm:$0xf]  ;;  %v7415_v49 = vld [vmem:[#allocation8 + $0x638] sm:$0xf0] }
 0x22e   :  { %4703 = vmatpush.bf16.msrb.mxu0 %v7014_v12  ;;  %v8143_v12 = vld [vmem:[#allocation8 + $0x4d4] sm:$0xf0]  ;;  %v7418_v6 = vor.u32 %v8185_v36, %v7415_v49  ;;  %v7223_v57 = vld [vmem:[#allocation8 + $0x4b8] sm:$0xf0]  ;;  %v8181_v56 = vld [vmem:[#allocation8 + $0x60c] sm:$0xf] }
 0x22f   :  { %4744 = vmatpush.bf16.msrb.mxu2 %v7414_v60  ;;  %4606 = vmatmul.bf16.vlgmr.msra.gmra.mxu1 %v8783_v58  ;;  %v8097_v60 = vld [vmem:[#allocation8 + $0x36c] sm:$0xf] }
 0x230   :  { %4781 = vmatpush.bf16.msrb.mxu3 %v6986_v11  ;;  %v8057_v11 = vld [vmem:[#allocation8 + $0x22c] sm:$0xf]  ;;  %v7066_v10 = vor.u32 %v8097_v60, %v7063_v59  ;;  %v7255_v59 = vld [vmem:[#allocation8 + $0x4f8] sm:$0xf0] }
 0x231   :  { %v6906_v31 = vor.u32 %v8057_v11, %v6903_v7  ;;  %4658 = vmatpush.bf16.msrb.mxu1 %v6678_v51  ;;  %4704 = vmatmul.bf16.vlgmr.msrb.gmra.mxu0 %v8783_v58  ;;  %v8085_v11 = vld [vmem:[#allocation8 + $0x30c] sm:$0xf]  ;;  %v7015_v7 = vld [vmem:[#allocation8 + $0x318] sm:$0xf0]  ;;  %v8139_v51 = vld [vmem:[#allocation8 + $0x4b4] sm:$0xf0] }
 0x232   :  { %4752 = vmatpush.bf16.msra.mxu0 %v6746_v13  ;;  %v7482_v13 = vor.u32 %v8201_v48, %v7479_v8  ;;  %v7989_v60 = vld [vmem:[#allocation8 + $0xc] sm:$0xf]  ;;  %v7226_v48 = vor.u32 %v8137_v0, %v7223_v57  ;;  %v8218_v57 = vld [vmem:[#allocation11 + $0x30] sm:$0xff] }
 0x233   :  { %4745 = vmatpush.bf16.msrb.mxu2 %v7398_v28  ;;  %v6646_v28 = vor.u32 %v7995_v23, %v6645_v20  ;;  %v8189_v20 = vld [vmem:[#allocation8 + $0x64c] sm:$0xf]  ;;  %v7431_v23 = vld [vmem:[#allocation8 + $0x658] sm:$0xf0] }
 0x234   :  { %4782 = vmatpush.bf16.msrb.mxu3 %v6970_v30  ;;  %v7082_v30 = vor.u32 %v8101_v17, %v7079_v18  ;;  %v7221_v17 = vld [vmem:[#allocation8 + $0x4a8] sm:$0xf]  ;;  %v7993_v18 = vld [vmem:[#allocation8 + $0x2c] sm:$0xf] }
 0x235   :  { %4659 = vmatpush.bf16.msrb.mxu1 %v6662_v15  ;;  %v7222_v24 = vor.u32 %v8139_v51, %v7221_v17  ;;  %v6650_v25 = vor.u32 %v7993_v18, %v6647_v21  ;;  %v6631_v15 = vld [vmem:[#allocation8 + $0x18] sm:$0xf0]  ;;  %v8041_v18 = vld [vmem:[#allocation8 + $0x1ac] sm:$0xf] }
 0x236   :  { %4746 = vmatmul.bf16.vlgmr.msrb.gmra.mxu2 %v8805_v37  ;;  %4753 = vmatpush.bf16.msra.mxu0 %v6730_v33  ;;  %v7018_v33 = vor.u32 %v8085_v11, %v7015_v7  ;;  %v8045_v11 = vld [vmem:[#allocation8 + $0x1cc] sm:$0xf]  ;;  %v6855_v7 = vld [vmem:[#allocation8 + $0x1d8] sm:$0xf0] }
 0x237   :  { %4794 = vmatpush.bf16.msra.mxu2 %v7130_v34  ;;  %v7047_v34 = vld [vmem:[#allocation8 + $0x358] sm:$0xf0]  ;;  %v6858_v17 = vor.u32 %v8045_v11, %v6855_v7  ;;  %v8169_v0 = vld [vmem:[#allocation8 + $0x5ac] sm:$0xf]  ;;  %v4495_v11 = vpop.f32.mrf.mxu1 }
 0x238   :  { %4783 = vmatpush.bf16.msrb.mxu3 %v6954_v3  ;;  %v8093_v3 = vld [vmem:[#allocation8 + $0x34c] sm:$0xf]  ;;  %v6839_v21 = vld [vmem:[#allocation8 + $0x1b8] sm:$0xf0] }
 0x239   :  { %v7050_v39 = vor.u32 %v8093_v3, %v7047_v34  ;;  %4660 = vmatpush.bf16.msrb.mxu1 %v6646_v28  ;;  %v7434_v3 = vor.u32 %v8189_v20, %v7431_v23  ;;  %v7239_v28 = vld [vmem:[#allocation8 + $0x4d8] sm:$0xf0]  ;;  %v7190_v34 = vor.u32 %v8131_v50, %v7189_v55  ;;  %v8021_v50 = vld [vmem:[#allocation8 + $0x10c] sm:$0xf] }
 0x23a   :  { %4754 = vmatpush.bf16.msra.mxu0 %v6714_v54  ;;  %v6791_v20 = vld [vmem:[#allocation8 + $0x158] sm:$0xf0] }
 0x23b   :  { %4795 = vmatpush.bf16.msra.mxu2 %v7114_v2  ;;  %v7031_v2 = vld [vmem:[#allocation8 + $0x338] sm:$0xf0] }
 0x23c   :  { %4784 = vmatpush.bf16.msrb.mxu3 %v6938_v62  ;;  %v6630_v62 = vor.u32 %v7991_v63, %v6629_v61  ;;  %v7034_v52 = vor.u32 %v8089_v43, %v7031_v2  ;;  %v7173_v61 = vld [vmem:[#allocation8 + $0x448] sm:$0xf]  ;;  %v8127_v63 = vld [vmem:[#allocation8 + $0x454] sm:$0xf0]  ;;  %v8133_v43 = vld [vmem:[#allocation8 + $0x48c] sm:$0xf] }
 0x23d   :  { %v7207_v2 = vld [vmem:[#allocation8 + $0x498] sm:$0xf0] }
 0x23e   :  { %4755 = vmatpush.bf16.msra.mxu0 %v6698_v44  ;;  %4661 = vmatpush.bf16.msrb.mxu1 %v6630_v62  ;;  %v8123_v62 = vld [vmem:[#allocation8 + $0x434] sm:$0xf0] }
 0x23f   :  { %4796 = vmatpush.bf16.msra.mxu2 %v7098_v40  ;;  %v7238_v40 = vor.u32 %v8143_v12, %v7237_v5  ;;  %v8119_v5 = vld [vmem:[#allocation8 + $0x414] sm:$0xf0]  ;;  %v7210_v12 = vor.u32 %v8133_v43, %v7207_v2  ;;  %v8161_v2 = vld [vmem:[#allocation8 + $0x56c] sm:$0xf] }
 0x240   :  { %4785 = vmatpush.bf16.msrb.mxu3 %v6922_v35  ;;  %v8197_v35 = vld [vmem:[#allocation8 + $0x68c] sm:$0xf] }
 0x241   :  { %4662 = vmatmul.bf16.vlgmr.msrb.gmra.mxu1 %v8768_v22  ;;  %v7466_v26 = vor.u32 %v8197_v35, %v7463_v41 }
 0x242   :  { %4710 = vmatpush.bf16.msra.mxu1 %v7254_v9  ;;  %4756 = vmatpush.bf16.msra.mxu0 %v6682_v53  ;;  %v7141_v53 = vld [vmem:[#allocation8 + $0x408] sm:$0xf] }
 0x243   :  { %4797 = vmatpush.bf16.msra.mxu2 %v7082_v30  ;;  %v8135_v30 = vld [vmem:[#allocation8 + $0x494] sm:$0xf0] }
 0x244   :  { %4786 = vmatpush.bf16.msrb.mxu3 %v6906_v31  ;;  %v7447_v31 = vld [vmem:[#allocation8 + $0x678] sm:$0xf0]  ;;  %v7206_v54 = vor.u32 %v8135_v30, %v7205_v29 }
 0x245   :  { %v7450_v38 = vor.u32 %v8193_v27, %v7447_v31  ;;  %v8037_v31 = vld [vmem:[#allocation8 + $0x18c] sm:$0xf]  ;;  %v7143_v29 = vld [vmem:[#allocation8 + $0x418] sm:$0xf0] }
 0x246   :  { %4711 = vmatpush.bf16.msra.mxu1 %v7238_v40  ;;  %v8125_v40 = vld [vmem:[#allocation8 + $0x44c] sm:$0xf] }
 0x247   :  { %4798 = vmatpush.bf16.msra.mxu2 %v7066_v10  ;;  %v8141_v10 = vld [vmem:[#allocation8 + $0x4cc] sm:$0xf] }
 0x248   :  { %4787 = vmatpush.bf16.msrb.mxu3 %v6890_v19  ;;  %v6634_v19 = vor.u32 %v7989_v60, %v6631_v15  ;;  %v7242_v44 = vor.u32 %v8141_v10, %v7239_v28  ;;  %v8033_v15 = vld [vmem:[#allocation8 + $0x16c] sm:$0xf]  ;;  %v8219_v28 = vld [vmem:[#allocation11 + $0x38] sm:$0xff] }
 0x249   :  { %v8177_v10 = vld [vmem:[#allocation8 + $0x5ec] sm:$0xf] }
 0x24a   :  { %4712 = vmatpush.bf16.msra.mxu1 %v7222_v24  ;;  %v6823_v24 = vld [vmem:[#allocation8 + $0x198] sm:$0xf0] }
 0x24b   :  { %4788 = vmatmul.bf16.vlgmr.msrb.gmra.mxu3 %v8781_v14  ;;  %4799 = vmatpush.bf16.msra.mxu2 %v7050_v39  ;;  %v6666_v14 = vor.u32 %v7997_v45, %v6663_v42  ;;  %v7157_v39 = vld [vmem:[#allocation8 + $0x428] sm:$0xf]  ;;  %v8049_v45 = vld [vmem:[#allocation8 + $0x1ec] sm:$0xf]  ;;  %v6871_v42 = vld [vmem:[#allocation8 + $0x1f8] sm:$0xf0]  ;;  %v6826_v30 = vor.u32 %v8037_v31, %v6823_v24 }
 0x24c   :  { %4836 = vmatpush.bf16.msra.mxu3 %v7514_v16  ;;  %v7258_v16 = vor.u32 %v8145_v47, %v7255_v59  ;;  %v7158_v9 = vor.u32 %v8123_v62, %v7157_v39  ;;  %v6874_v35 = vor.u32 %v8049_v45, %v6871_v42  ;;  %v6807_v47 = vld [vmem:[#allocation8 + $0x178] sm:$0xf0]  ;;  %v8029_v59 = vld [vmem:[#allocation8 + $0x14c] sm:$0xf]  ;;  %v8216_v62 = vld [vmem:[#allocation11 + $0x20] sm:$0xff] }
 0x24d   :  { %4757 = vmatpush.bf16.msra.mxu0 %v6666_v14  ;;  %v7175_v14 = vld [vmem:[#allocation8 + $0x458] sm:$0xf0]  ;;  %v6794_v23 = vor.u32 %v8029_v59, %v6791_v20  ;;  %v8214_v42 = vld [vmem:[#allocation11 + $0x10] sm:$0xff] }
 0x24e   :  { %4713 = vmatpush.bf16.msra.mxu1 %v7206_v54  ;;  %v7178_v51 = vor.u32 %v8125_v40, %v7175_v14  ;;  %v8025_v54 = vld [vmem:[#allocation8 + $0x12c] sm:$0xf]  ;;  %v7335_v39 = vld [vmem:[#allocation8 + $0x598] sm:$0xf0] }
 0x24f   :  { %4800 = vmatpush.bf16.msra.mxu2 %v7034_v52  ;;  %v7142_v52 = vor.u32 %v8119_v5, %v7141_v53  ;;  %v8215_v5 = vld [vmem:[#allocation11 + $0x18] sm:$0xff]  ;;  %v8149_v14 = vld [vmem:[#allocation8 + $0x50c] sm:$0xf] }
 0x250   :  { %4837 = vmatpush.bf16.msra.mxu3 %v7498_v1  ;;  %v7174_v1 = vor.u32 %v8127_v63, %v7173_v61  ;;  %v7367_v61 = vld [vmem:[#allocation8 + $0x5d8] sm:$0xf0]  ;;  %v8819_v63 = vpop.f32.mrf.mxu2 }
 0x251   :  { %4758 = vmatpush.bf16.msra.mxu0 %v6650_v25  ;;  %v8117_v25 = vld [vmem:[#allocation8 + $0x40c] sm:$0xf]  ;;  %v7303_v45 = vld [vmem:[#allocation8 + $0x558] sm:$0xf0] }
 0x252   :  { %4714 = vmatpush.bf16.msra.mxu1 %v7190_v34  ;;  %v7146_v60 = vor.u32 %v8117_v25, %v7143_v29  ;;  %v8173_v34 = vld [vmem:[#allocation8 + $0x5cc] sm:$0xf]  ;;  %v4497_v25 = vpop.f32.mrf.mxu1 }
 0x253   :  { %4801 = vmatpush.bf16.msra.mxu2 %v7018_v33  ;;  %v7159_v33 = vld [vmem:[#allocation8 + $0x438] sm:$0xf0] }
 0x254   :  { %4838 = vmatpush.bf16.msra.mxu3 %v7482_v13  ;;  %v7191_v13 = vld [vmem:[#allocation8 + $0x478] sm:$0xf0] }
 0x255   :  { %4759 = vmatpush.bf16.msra.mxu0 %v6634_v19  ;;  %v6775_v19 = vld [vmem:[#allocation8 + $0x138] sm:$0xf0] }
 0x256   :  { %4802 = vmatmul.bf16.vlgmr.msra.gmra.mxu2 %v8783_v58  ;;  %v7399_v58 = vld [vmem:[#allocation8 + $0x618] sm:$0xf0]  ;;  %4715 = vmatpush.bf16.msra.mxu1 %v7174_v1  ;;  %v6778_v55 = vor.u32 %v8025_v54, %v6775_v19  ;;  %v8165_v1 = vld [vmem:[#allocation8 + $0x58c] sm:$0xf] }
 0x257   :  { %v7402_v8 = vor.u32 %v8181_v56, %v7399_v58  ;;  %5122 = vmatpush.bf16.msrb.mxu2 %v8219_v28  ;;  %v8217_v56 = vld [vmem:[#allocation11 + $0x28] sm:$0xff]  ;;  %v8222_v28 = vld [vmem:[#allocation11 + $0x50] sm:$0xff] }
 0x258   :  { %4839 = vmatpush.bf16.msra.mxu3 %v7466_v26  ;;  %4760 = vmatmul.bf16.vlgmr.msra.gmra.mxu0 %v8768_v22  ;;  %v8129_v22 = vld [vmem:[#allocation8 + $0x46c] sm:$0xf]  ;;  %v4469_v43 = vpop.f32.mrf.mxu2 }
 0x259   :  { %4808 = vmatpush.bf16.msrb.mxu0 %v7258_v16  ;;  %v7194_v41 = vor.u32 %v8129_v22, %v7191_v13  ;;  %v8121_v26 = vld [vmem:[#allocation8 + $0x42c] sm:$0xf]  ;;  %v6759_v16 = vld [vmem:[#allocation8 + $0x118] sm:$0xf0]  ;;  %v4509_v13 = vpop.f32.mrf.mxu3 }
 0x25a   :  { %4716 = vmatpush.bf16.msra.mxu1 %v7158_v9  ;;  %v7162_v27 = vor.u32 %v8121_v26, %v7159_v33  ;;  %v6762_v36 = vor.u32 %v8021_v50, %v6759_v16  ;;  %v7319_v9 = vld [vmem:[#allocation8 + $0x578] sm:$0xf0]  ;;  %v8212_v33 = vld [vmem:[#allocation11] sm:$0xff] }
 0x25b   :  { %5123 = vmatpush.bf16.msrb.mxu2 %v8218_v57 }
 0x25c   :  { %4840 = vmatpush.bf16.msra.mxu3 %v7450_v38  ;;  %v6810_v38 = vor.u32 %v8033_v15, %v6807_v47  ;;  %v8223_v47 = vld [vmem:[#allocation11 + $0x58] sm:$0xff] }
 0x25d   :  { %4809 = vmatpush.bf16.msrb.mxu0 %v7242_v44  ;;  %v8821_v44 = vpop.f32.mrf.mxu0 }
 0x25e   :  { %4717 = vmatpush.bf16.msra.mxu1 %v7142_v52 }
 0x25f   :  { %5124 = vmatpush.bf16.msrb.mxu2 %v8217_v56 }
 0x260   :  { %4841 = vmatpush.bf16.msra.mxu3 %v7434_v3  ;;  %v7383_v3 = vld [vmem:[#allocation8 + $0x5f8] sm:$0xf0]  ;;  %v4523_v52 = vpop.f32.mrf.mxu2 }
 0x261   :  { %4810 = vmatpush.bf16.msrb.mxu0 %v7226_v48  ;;  %4718 = vmatmul.bf16.vlgmr.msra.gmra.mxu1 %v8787_v4  ;;  %v7386_v49 = vor.u32 %v8177_v10, %v7383_v3  ;;  %v7338_v48 = vor.u32 %v8165_v1, %v7335_v39  ;;  %v4511_v31 = vpop.f32.mrf.mxu3 }
 0x262   :  { %4766 = vmatpush.bf16.msrb.mxu1 %v6874_v35  ;;  %v8153_v35 = vld [vmem:[#allocation8 + $0x52c] sm:$0xf] }
 0x263   :  { %5125 = vmatpush.bf16.msrb.mxu2 %v8216_v62 }
 0x264   :  { %4842 = vmatpush.bf16.msra.mxu3 %v7418_v6  ;;  %v7351_v6 = vld [vmem:[#allocation8 + $0x5b8] sm:$0xf0] }
 0x265   :  { %4811 = vmatpush.bf16.msrb.mxu0 %v7210_v12  ;;  %v7354_v58 = vor.u32 %v8169_v0, %v7351_v6  ;;  %v4483_v53 = vpop.f32.mrf.mxu0  ;;  %v8157_v12 = vld [vmem:[#allocation8 + $0x54c] sm:$0xf]  ;;  %v8220_v6 = vld [vmem:[#allocation11 + $0x40] sm:$0xff] }
 0x266   :  { %4767 = vmatpush.bf16.msrb.mxu1 %v6858_v17  ;;  %v7306_v22 = vor.u32 %v8157_v12, %v7303_v45  ;;  %v7271_v17 = vld [vmem:[#allocation8 + $0x518] sm:$0xf0] }
 0x267   :  { %5126 = vmatpush.bf16.msrb.mxu2 %v8215_v5  ;;  %v7274_v26 = vor.u32 %v8149_v14, %v7271_v17  ;;  %v8233_v14 = vld [vmem:[#allocation11 + $0xa8] sm:$0xff] }
 0x268   :  { %4843 = vmatpush.bf16.msra.mxu3 %v7402_v8  ;;  %v8227_v8 = vld [vmem:[#allocation11 + $0x78] sm:$0xff]  ;;  %v4525_v24 = vpop.f32.mrf.mxu2 }
 0x269   :  { %4812 = vmatpush.bf16.msrb.mxu0 %v7194_v41  ;;  %v7287_v41 = vld [vmem:[#allocation8 + $0x538] sm:$0xf0]  ;;  %v4565_v59 = vpop.f32.mrf.mxu3 }
 0x26a   :  { %v7290_v40 = vor.u32 %v8153_v35, %v7287_v41 }
 0x26b   :  { %4844 = vmatmul.bf16.vlgmr.msra.gmra.mxu3 %v8805_v37  ;;  %v6842_v37 = vor.u32 %v8041_v18, %v6839_v21  ;;  %5127 = vmatpush.bf16.msrb.mxu2 %v8214_v42  ;;  %v8226_v18 = vld [vmem:[#allocation11 + $0x70] sm:$0xff]  ;;  %v8824_v21 = vld [vmem:[#allocation10] sm:$0xf] }
 0x26c   :  { %v8235_v42 = vld [vmem:[#allocation11 + $0xb8] sm:$0xff] }
 0x26d   :  { %4813 = vmatpush.bf16.msrb.mxu0 %v7178_v51  ;;  %4768 = vmatpush.bf16.msrb.mxu1 %v6842_v37  ;;  %v4537_v7 = vpop.f32.mrf.mxu0  ;;  %v8213_v51 = vld [vmem:[#allocation11 + $0x8] sm:$0xff] }
 0x26e   :  { %v8225_v37 = vld [vmem:[#allocation11 + $0x68] sm:$0xff] }
 0x26f   :  { %5128 = vmatpush.bf16.msrb.mxu2 %v8213_v51 }
 0x270   :  { %v4579_v54 = vpop.f32.mrf.mxu2 }
 0x271   :  { %4814 = vmatpush.bf16.msrb.mxu0 %v7162_v27  ;;  %4769 = vmatpush.bf16.msrb.mxu1 %v6826_v30  ;;  %v3330_v27 = vperm.slane %v8824_v21, 0 }
 0x273   :  { %5129 = vmatpush.bf16.msrb.mxu2 %v8212_v33  ;;  %v4468_v30 = vadd.f32 %v8819_v63, %v3330_v27  ;;  %v4470_v15 = vadd.f32 %v4469_v43, %v3330_v27 }
 0x275   :  { %4815 = vmatpush.bf16.msrb.mxu0 %v7146_v60  ;;  %4770 = vmatpush.bf16.msrb.mxu1 %v6810_v38  ;;  %v4539_v29 = vpop.f32.mrf.mxu0  ;;  %v8224_v60 = vld [vmem:[#allocation11 + $0x60] sm:$0xff]  ;;  %v4482_v38 = vadd.f32 %v8821_v44, %v4468_v30 }
 0x277   :  { %v4496_v20 = vadd.f32 %v4495_v11, %v4482_v38 }
 0x278   :  { %4816 = vmatmul.bf16.vlgmr.msrb.gmra.mxu0 %v8787_v4  ;;  %v7370_v4 = vor.u32 %v8173_v34, %v7367_v61  ;;  %v3331_v34 = vperm.slane %v8824_v21, 1  ;;  %v4581_v57 = vpop.f32.mrf.mxu2 }
 0x279   :  { %4771 = vmatpush.bf16.msrb.mxu1 %v6794_v23  ;;  %5136 = vmatpush.bf16.msra.mxu0 %v8227_v8  ;;  %v4484_v23 = vadd.f32 %v4483_v53, %v4470_v15  ;;  %v8230_v15 = vld [vmem:[#allocation11 + $0x90] sm:$0xff] }
 0x27a   :  { %v4566_v56 = vadd.f32 %v4565_v59, %v3331_v34  ;;  %v8228_v59 = vld [vmem:[#allocation11 + $0x80] sm:$0xff] }
 0x27b   :  { %v4498_v50 = vadd.f32 %v4497_v25, %v4484_v23 }
 0x27c   :  { %v4580_v62 = vadd.f32 %v4579_v54, %v4566_v56  ;;  %v8242_v56 = vld [vmem:[#allocation11 + $0xf0] sm:$0xff] }
 0x27d   :  { %4772 = vmatpush.bf16.msrb.mxu1 %v6778_v55  ;;  %5137 = vmatpush.bf16.msra.mxu0 %v8226_v18  ;;  %v4510_v55 = vadd.f32 %v4509_v13, %v4496_v20  ;;  %v4593_v16 = vpop.f32.mrf.mxu0  ;;  %v4512_v10 = vadd.f32 %v4511_v31, %v4498_v50  ;;  %v8232_v31 = vld [vmem:[#allocation11 + $0xa0] sm:$0xff] }
 0x27e   :  { %v4594_v8 = vadd.f32 %v4593_v16, %v4580_v62 }
 0x27f   :  { %v4524_v3 = vadd.f32 %v4523_v52, %v4510_v55  ;;  %v8234_v52 = vld [vmem:[#allocation11 + $0xb0] sm:$0xff] }
 0x280   :  { %v4635_v53 = vpop.f32.mrf.mxu2 }
 0x281   :  { %4773 = vmatpush.bf16.msrb.mxu1 %v6762_v36  ;;  %5138 = vmatpush.bf16.msra.mxu0 %v8225_v37  ;;  %v4526_v36 = vadd.f32 %v4525_v24, %v4512_v10  ;;  %v8231_v24 = vld [vmem:[#allocation11 + $0x98] sm:$0xff] }
 0x283   :  { %v4540_v61 = vadd.f32 %v4539_v29, %v4526_v36 }
 0x284   :  { %4774 = vmatmul.bf16.vlgmr.msrb.gmra.mxu1 %v8755_v46  ;;  %v7322_v46 = vor.u32 %v8161_v2, %v7319_v9 }
 0x285   :  { %4822 = vmatpush.bf16.msra.mxu1 %v7386_v49  ;;  %5139 = vmatpush.bf16.msra.mxu0 %v8224_v60  ;;  %v4538_v49 = vadd.f32 %v4537_v7, %v4524_v3  ;;  %v4595_v39 = vpop.f32.mrf.mxu0  ;;  %v3332_v60 = vperm.slane %v8824_v21, 2 }
 0x289   :  { %4823 = vmatpush.bf16.msra.mxu1 %v7370_v4  ;;  %5140 = vmatpush.bf16.msra.mxu0 %v8223_v47  ;;  %v4567_v4 = vpop.f32.mrf.mxu3  ;;  %v8229_v47 = vld [vmem:[#allocation11 + $0x88] sm:$0xff] }
 0x28a   :  { %v4568_v5 = vadd.f32 %v4567_v4, %v3331_v34 }
 0x28c   :  { %v4582_v12 = vadd.f32 %v4581_v57, %v4568_v5  ;;  %v8238_v5 = vld [vmem:[#allocation11 + $0xd0] sm:$0xff] }
 0x28d   :  { %4824 = vmatpush.bf16.msra.mxu1 %v7354_v58  ;;  %5141 = vmatpush.bf16.msra.mxu0 %v8222_v28 }
 0x291   :  { %4825 = vmatpush.bf16.msra.mxu1 %v7338_v48  ;;  %v4621_v43 = vpop.f32.mrf.mxu3 }
 0x295   :  { %4826 = vmatpush.bf16.msra.mxu1 %v7322_v46 }
 0x299   :  { %4827 = vmatpush.bf16.msra.mxu1 %v7306_v22  ;;  %v4596_v22 = vadd.f32 %v4595_v39, %v4582_v12  ;;  %v4623_v11 = vpop.f32.mrf.mxu3 }
 0x29c   :  { %v4551_v19 = vpop.f32.mrf.mxu1 }
 0x29d   :  { %4828 = vmatpush.bf16.msra.mxu1 %v7290_v40  ;;  %v4552_v63 = vadd.f32 %v4551_v19, %v4538_v49  ;;  %v4649_v46 = vpop.f32.mrf.mxu0  ;;  %v4637_v40 = vpop.f32.mrf.mxu2 }
 0x29f   :  { %v4850_v58 = vmax.f32 %v4552_v63, 0.0 }
 0x2a1   :  { %4829 = vmatpush.bf16.msra.mxu1 %v7274_v26  ;;  %v4677_v25 = vpop.f32.mrf.mxu3 }
 0x2a4   :  { %4830 = vmatmul.bf16.vlgmr.msra.gmra.mxu1 %v8794_v32  ;;  %v8221_v32 = vld [vmem:[#allocation11 + $0x48] sm:$0xff]  ;;  %v4553_v44 = vpop.f32.mrf.mxu1 }
 0x2a5   :  { %v4554_v0 = vadd.f32 %v4553_v44, %v4540_v61  ;;  %5142 = vmatpush.bf16.msra.mxu0 %v8221_v32  ;;  %5150 = vmatpush.bf16.msrb.mxu1 %v8235_v42  ;;  %v4651_v18 = vpop.f32.mrf.mxu0  ;;  %v4691_v30 = vpop.f32.mrf.mxu2  ;;  %v8237_v42 = vld [vmem:[#allocation11 + $0xc8] sm:$0xff] }
 0x2a7   :  { %v4854_v1 = vmax.f32 %v4554_v0, 0.0  ;;  %v8243_v0 = vld [vmem:[#allocation11 + $0xf8] sm:$0xff] }
 0x2a8   :  { %5164 = vmatpush.bf16.msrb.mxu3 %v8243_v0 }
 0x2a9   :  { %v4858_v48 = vpack.c.bf16 %v4854_v1, %v4850_v58  ;;  %5143 = vmatpush.bf16.msra.mxu0 %v8220_v6  ;;  %5151 = vmatpush.bf16.msrb.mxu1 %v8234_v52  ;;  %v4679_v20 = vpop.f32.mrf.mxu3 }
 0x2ab   :  { %5130 = vmatmul.bf16.vlgmr.msrb.gmra.mxu2 %v4858_v48  ;;  %v8241_v48 = vld [vmem:[#allocation11 + $0xe8] sm:$0xff] }
 0x2ac   :  { %v4607_v2 = vpop.f32.mrf.mxu1  ;;  %5165 = vmatpush.bf16.msrb.mxu3 %v8242_v56 }
 0x2ad   :  { %v4608_v9 = vadd.f32 %v4607_v2, %v4594_v8  ;;  %5152 = vmatpush.bf16.msrb.mxu1 %v8233_v14  ;;  %v4693_v19 = vpop.f32.mrf.mxu2 }
 0x2ae   :  { %v4705_v50 = vpop.f32.mrf.mxu0 }
 0x2af   :  { %v4622_v45 = vadd.f32 %v4621_v43, %v4608_v9  ;;  %v8240_v9 = vld [vmem:[#allocation11 + $0xe0] sm:$0xff] }
 0x2b0   :  { %5166 = vmatpush.bf16.msrb.mxu3 %v8241_v48 }
 0x2b1   :  { %v4636_v35 = vadd.f32 %v4635_v53, %v4622_v45  ;;  %5153 = vmatpush.bf16.msrb.mxu1 %v8232_v31  ;;  %v4733_v3 = vpop.f32.mrf.mxu3  ;;  %v8239_v53 = vld [vmem:[#allocation11 + $0xd8] sm:$0xff] }
 0x2b3   :  { %v4650_v17 = vadd.f32 %v4649_v46, %v4636_v35 }
 0x2b4   :  { %v4609_v13 = vpop.f32.mrf.mxu1  ;;  %5167 = vmatpush.bf16.msrb.mxu3 %v8240_v9 }
 0x2b5   :  { %v4610_v41 = vadd.f32 %v4609_v13, %v4596_v22  ;;  %v4851_v33 = vmax.f32 %v4650_v17, 0.0  ;;  %5154 = vmatpush.bf16.msrb.mxu1 %v8231_v24  ;;  %v3333_v22 = vperm.slane %v8824_v21, 3  ;;  %v8236_v13 = vld [vmem:[#allocation11 + $0xc0] sm:$0xff] }
 0x2b6   :  { %v4707_v61 = vpop.f32.mrf.mxu0 }
 0x2b7   :  { %v4624_v7 = vadd.f32 %v4623_v11, %v4610_v41 }
 0x2b8   :  { %5168 = vmatpush.bf16.msrb.mxu3 %v8239_v53 }
 0x2b9   :  { %v4638_v51 = vadd.f32 %v4637_v40, %v4624_v7  ;;  %5155 = vmatpush.bf16.msrb.mxu1 %v8230_v15  ;;  %v4747_v49 = vpop.f32.mrf.mxu2  ;;  %v4735_v57 = vpop.f32.mrf.mxu3 }
 0x2bb   :  { %v4652_v26 = vadd.f32 %v4651_v18, %v4638_v51 }
 0x2bc   :  { %5169 = vmatpush.bf16.msrb.mxu3 %v8238_v5 }
 0x2bd   :  { %v4855_v37 = vmax.f32 %v4652_v26, 0.0  ;;  %5156 = vmatpush.bf16.msrb.mxu1 %v8229_v47 }
 0x2be   :  { %v4663_v29 = vpop.f32.mrf.mxu1 }
 0x2bf   :  { %v4859_v27 = vpack.c.bf16 %v4855_v37, %v4851_v33  ;;  %v4664_v38 = vadd.f32 %v4663_v29, %v3332_v60 }
 0x2c0   :  { %5170 = vmatpush.bf16.msrb.mxu3 %v8237_v42 }
 0x2c1   :  { %5144 = vmatmul.bf16.vlgmr.msra.gmra.mxu0 %v4859_v27  ;;  %v4678_v54 = vadd.f32 %v4677_v25, %v4664_v38  ;;  %5157 = vmatpush.bf16.msrb.mxu1 %v8228_v59  ;;  %v4749_v39 = vpop.f32.mrf.mxu2 }
 0x2c3   :  { %v4692_v16 = vadd.f32 %v4691_v30, %v4678_v54 }
 0x2c4   :  { %5171 = vmatpush.bf16.msrb.mxu3 %v8236_v13 }
 0x2c5   :  { %v4706_v36 = vadd.f32 %v4705_v50, %v4692_v16 }
 0x2c6   :  { %v4665_v23 = vpop.f32.mrf.mxu1 }
 0x2c7   :  { %v4666_v55 = vadd.f32 %v4665_v23, %v3332_v60 }
 0x2c9   :  { %v4680_v10 = vadd.f32 %v4679_v20, %v4666_v55  ;;  %v8262_v55 = vld [vmem:[#allocation13] ss:$0 sm:$0xff] }
 0x2cb   :  { %v4694_v34 = vadd.f32 %v4693_v19, %v4680_v10 }
 0x2cd   :  { %v4708_v4 = vadd.f32 %v4707_v61, %v4694_v34 }
 0x2ce   :  { %v4789_v12 = vpop.f32.mrf.mxu3 }
 0x2d5   :  { %v4761_v46 = vpop.f32.mrf.mxu0 }
 0x2d6   :  { %v4762_v35 = vadd.f32 %v4761_v46, %v3333_v22  ;;  %v4791_v41 = vpop.f32.mrf.mxu3 }
 0x2d9   :  { %v4803_v7 = vpop.f32.mrf.mxu2 }
 0x2dd   :  { %v4763_v52 = vpop.f32.mrf.mxu0 }
 0x2de   :  { %v4719_v28 = vpop.f32.mrf.mxu1  ;;  %v4764_v14 = vadd.f32 %v4763_v52, %v3333_v22 }
 0x2df   :  { %v4720_v32 = vadd.f32 %v4719_v28, %v4706_v36 }
 0x2e1   :  { %v4734_v63 = vadd.f32 %v4733_v3, %v4720_v32  ;;  %v4805_v31 = vpop.f32.mrf.mxu2 }
 0x2e3   :  { %v4748_v58 = vadd.f32 %v4747_v49, %v4734_v63 }
 0x2e5   :  { %v4852_v8 = vmax.f32 %v4748_v58, 0.0 }
 0x2e6   :  { %v4721_v44 = vpop.f32.mrf.mxu1 }
 0x2e7   :  { %v4722_v6 = vadd.f32 %v4721_v44, %v4708_v4 }
 0x2e9   :  { %v4736_v1 = vadd.f32 %v4735_v57, %v4722_v6 }
 0x2eb   :  { %v4750_v62 = vadd.f32 %v4749_v39, %v4736_v1 }
 0x2ed   :  { %v4856_v43 = vmax.f32 %v4750_v62, 0.0 }
 0x2ee   :  { %v4845_v37 = vpop.f32.mrf.mxu3 }
 0x2ef   :  { %v4860_v2 = vpack.c.bf16 %v4856_v43, %v4852_v8 }
 0x2f1   :  { %5158 = vmatmul.bf16.vlgmr.msrb.gmra.mxu1 %v4860_v2 }
 0x2f5   :  { %v4817_v18 = vpop.f32.mrf.mxu0 }
 0x2f6   :  { %v4847_v38 = vpop.f32.mrf.mxu3 }
 0x2fd   :  { %v4819_v29 = vpop.f32.mrf.mxu0 }
 0x301   :  { %v4775_v45 = vpop.f32.mrf.mxu1 }
 0x302   :  { %v4776_v11 = vadd.f32 %v4775_v45, %v4762_v35 }
 0x304   :  { %v4790_v17 = vadd.f32 %v4789_v12, %v4776_v11 }
 0x306   :  { %v4804_v33 = vadd.f32 %v4803_v7, %v4790_v17 }
 0x308   :  { %v4818_v24 = vadd.f32 %v4817_v18, %v4804_v33 }
 0x309   :  { %v4777_v40 = vpop.f32.mrf.mxu1 }
 0x30a   :  { %v4778_v51 = vadd.f32 %v4777_v40, %v4764_v14 }
 0x30c   :  { %v4792_v26 = vadd.f32 %v4791_v41, %v4778_v51 }
 0x30e   :  { %v4806_v21 = vadd.f32 %v4805_v31, %v4792_v26 }
 0x310   :  { %v4820_v30 = vadd.f32 %v4819_v29, %v4806_v21 }
 0x321   :  { %v4831_v27 = vpop.f32.mrf.mxu1 }
 0x322   :  { %v4832_v25 = vadd.f32 %v4831_v27, %v4818_v24 }
 0x324   :  { %v4846_v15 = vadd.f32 %v4845_v37, %v4832_v25 }
 0x326   :  { %v4853_v20 = vmax.f32 %v4846_v15, 0.0 }
 0x329   :  { %v4833_v60 = vpop.f32.mrf.mxu1 }
 0x32a   :  { %v4834_v47 = vadd.f32 %v4833_v60, %v4820_v30 }
 0x32c   :  { %v4848_v59 = vadd.f32 %v4847_v38, %v4834_v47 }
 0x32e   :  { %v4857_v23 = vmax.f32 %v4848_v59, 0.0  ;;  %v5131_v19 = vpop.f32.mrf.mxu2 }
 0x32f   :  { %v5132_v10 = vadd.f32 %v8262_v55, %v5131_v19 }
 0x330   :  { %v4861_v54 = vpack.c.bf16 %v4857_v23, %v4853_v20 }
 0x332   :  { %5172 = vmatmul.bf16.vlgmr.msrb.gmra.mxu3 %v4861_v54 }
 0x336   :  { %v5133_v36 = vpop.f32.mrf.mxu2 }
 0x337   :  { %v5134_v61 = vadd.f32 %v8262_v55, %v5133_v36 }
 0x33e   :  { %v5145_v50 = vpop.f32.mrf.mxu0 }
 0x33f   :  { %v5146_v3 = vadd.f32 %v5145_v50, %v5132_v10 }
 0x346   :  { %v5147_v34 = vpop.f32.mrf.mxu0 }
 0x347   :  { %v5148_v44 = vadd.f32 %v5147_v34, %v5134_v61 }
 0x36e   :  { %v5159_v16 = vpop.f32.mrf.mxu1 }
 0x36f   :  { %v5160_v28 = vadd.f32 %v5159_v16, %v5146_v3 }
 0x376   :  { %v5161_v4 = vpop.f32.mrf.mxu1 }
 0x377   :  { %v5162_v0 = vadd.f32 %v5161_v4, %v5148_v44 }
 0x3b5   :  { %v5173_v49 = vpop.f32.mrf.mxu3 }
 0x3b6   :  { %v5174_v32 = vadd.f32 %v5173_v49, %v5160_v28 }
 0x3b8   :  { %v7643_v63 = vmul.f32 -1.442695, %v5174_v32 }
 0x3ba   :  { %8263 = vpow2.f32 %v7643_v63 }
 0x3bd   :  { %v5175_v6 = vpop.f32.mrf.mxu3 }
 0x3be   :  { %v5176_v57 = vadd.f32 %v5175_v6, %v5162_v0 }
 0x3c0   :  { %v8264_v56 = vpop.eup %8263  ;;  %v7644_v58 = vmul.f32 -1.442695, %v5176_v57 }
 0x3c1   :  { %v5184_v1 = vadd.f32 1.0, %v8264_v56 }
 0x3c2   :  { %8265 = vpow2.f32 %v7644_v58 }
 0x3c3   :  { %8267 = vrcp.f32 %v5184_v1  ;;  %v5197_v2 = vand.u32 2147483648, %v5184_v1  ;;  %v5195_v53 = vand.u32 2147483647, %v5184_v1  ;;  %vm5191_vm2 = vweird.f32 %v5184_v1 }
 0x3c5   :  { %v5198_v12 = vor.u32 1.1754944e-38, %v5197_v2  ;;  %vm5196_vm4 = vcmp.eq.f32.partialorder %v5195_v53, 8.507059e+37 }
 0x3c8   :  { %v8266_v39 = vpop.eup %8265 }
 0x3c9   :  { %v8268_v62 = vpop.eup %8267  ;;  %v5185_v48 = vadd.f32 1.0, %v8266_v39 }
 0x3ca   :  { %v5187_v8 = vmul.f32 %v8268_v62, %v5184_v1  ;;  %vm5192_vm1 = vweird.f32 %v8268_v62 }
 0x3cb   :  { %8269 = vrcp.f32 %v5185_v48  ;;  %vm5193_vm3 = vmor %vm5191_vm2, %vm5192_vm1  ;;  %v5212_v52 = vand.u32 2147483648, %v5185_v48  ;;  %v5210_v41 = vand.u32 2147483647, %v5185_v48  ;;  %vm5206_vm6 = vweird.f32 %v5185_v48 }
 0x3cc   :  { %v5188_v43 = vsub.f32 1.0, %v5187_v8 }
 0x3cd   :  { %v5213_v7 = vor.u32 1.1754944e-38, %v5212_v52  ;;  %vm5211_vm8 = vcmp.eq.f32.partialorder %v5210_v41, 8.507059e+37 }
 0x3ce   :  { %v5189_v9 = vmul.f32 %v8268_v62, %v5188_v43 }
 0x3d0   :  { %v5190_v5 = vadd.f32 %v8268_v62, %v5189_v9 }
 0x3d1   :  { %v8270_v46 = vpop.eup %8269 }
 0x3d2   :  { %v5194_v45 = vsel %vm5193_vm3, %v8268_v62, %v5190_v5  ;;  %v5202_v42 = vmul.f32 %v8270_v46, %v5185_v48  ;;  %vm5207_vm5 = vweird.f32 %v8270_v46 }
 0x3d3   :  { %v5199_v22 = vsel %vm5196_vm4, %v5198_v12, %v5194_v45  ;;  %vm5208_vm7 = vmor %vm5206_vm6, %vm5207_vm5 }
 0x3d4   :  { %5216 = vst [vmem:[#allocation14] sm:$0xff] %v5199_v22  ;;  %v5203_v13 = vsub.f32 1.0, %v5202_v42 }
 0x3d6   :  { %v5204_v35 = vmul.f32 %v8270_v46, %v5203_v13 }
 0x3d8   :  { %v5205_v11 = vadd.f32 %v8270_v46, %v5204_v35 }
 0x3da   :  { %v5209_v40 = vsel %vm5208_vm7, %v8270_v46, %v5205_v11 }
 0x3db   :  { %v5214_v14 = vsel %vm5211_vm8, %v5213_v7, %v5209_v40 }
 0x3dc   :  { %5217 = vst [vmem:[#allocation14 + $0x8] sm:$0xff] %v5214_v14 }
 0x3dd   :  { %5221 = vsyncadd [#allocation4], 224  ;;  %s5224_s15 = sshll.u32 %s8843_s7, 4  ;;  %s8490_s16 = smov [#allocation14]   ;;  %s5225_s15 = int_to_ptr.hbm [resolvable:$true] %s5224_s15 }
 0x3de   :  { %s5222_s17 = sshll.u32 %s8490_s16, 4  ;;  %s8491_s18 = smov 32   ;;  %s5223_s17 = int_to_ptr.vmem [resolvable:$true] %s5222_s17 }
 0x3df   :  { %s8492_s19 = smov 2  }
 0x3e0   :  { %5230 = dma.vmem_to_hbm [thread:$0]  %s5223_s17, 32, %s5225_s15, [#allocation4], %s8491_s18, %s8491_s18, %s8492_s19  }
 0x3e1   :  { %8473 = dma.done.wait [#allocation4], 256  }
 0x3e2   :  { %8474 = vsyncadd [#allocation4], 4294967040 }
 0x3e3   :  { %5235 = vsyncpa [#allocation3], 1 }
 0x3e4   :  { %5236 = vsyncpa [#allocation6], 1 }
 0x3e5   :  { %5237 = vsyncpa [#allocation9], 1 }
 0x3e6   :  { %5238 = vsyncpa [#allocation12], 1 }
 0x3e7   :  { %5239 = vsyncpa [#allocation4], 1 }

</bundles_post_ra>
